<compile_context>
chip_gen: v5e
topology: v5e:2x2
jax: 0.10.0
libtpu: 0.0.40
codegen_flags: <defaults>
</compile_context>

<pallas_src>
import functools

import jax
import jax.numpy as jnp
from jax.experimental import pallas as pl
from jax.experimental.pallas import tpu as pltpu


# --------------------------------------------------------------------------- helpers
@functools.lru_cache(maxsize=None)
def _vmem_limit_bytes():
    """Per-generation scoped-VMEM budget: half of physical, clamped to [32, 96] MiB."""
    cap = 128 * 1024 * 1024
    try:
        cap = int(getattr(pltpu.get_tpu_info(), "vmem_capacity_bytes", cap))
    except Exception:
        pass
    return int(min(max(cap // 2, 32 * 1024 * 1024), 96 * 1024 * 1024))


def _pick_tile(dim, pref, align):
    """Largest aligned tile <= pref that divides `dim` exactly; otherwise the full
    extent (only hit for small dims — row counts are padded to a multiple of 16)."""
    if dim <= pref or dim % align != 0:
        return dim
    t = (pref // align) * align
    while t >= align:
        if dim % t == 0:
            return t
        t -= align
    return dim


# --------------------------------------------------------------------------- fused (LN +) matmul (+ bias / QuickGELU / residual)
def _mm_kernel(*refs, act, has_bias, has_res, has_ln):
    it = iter(refs)
    a_ref = next(it)
    b_ref = next(it)
    g_ref = next(it) if has_ln else None
    beta_ref = next(it) if has_ln else None
    bias_ref = next(it) if has_bias else None
    res_ref = next(it) if has_res else None
    o_ref = next(it)

    a = a_ref[...]
    if has_ln:                                    # fused pre-LN: A block has full rows
        a = a.astype(jnp.float32)
        mean = jnp.mean(a, axis=-1, keepdims=True)
        d = a - mean
        var = jnp.mean(d * d, axis=-1, keepdims=True)
        a = d * jax.lax.rsqrt(var + 1e-5) * g_ref[...] + beta_ref[...]
    a = a.astype(jnp.bfloat16)                    # MXU operands bf16, f32 accumulation

    y = jnp.dot(a, b_ref[...], preferred_element_type=jnp.float32)
    if has_bias:
        y = y + bias_ref[...]
    if act == "quick_gelu":                       # x * sigmoid(1.702 x); divide on EUP
        y = y * pl.reciprocal(1.0 + jnp.exp(-1.702 * y), approx=True)
    if has_res:
        y = y + res_ref[...]
    o_ref[...] = y.astype(o_ref.dtype)


def fused_matmul(a, b, bias=None, residual=None, ln=None, act=None,
                 out_dtype=jnp.float32):
    """out = (LN(a) if ln else a) @ b [+ bias] [quick_gelu] [+ residual].

    K is kept full (no k-loop, no accumulator scratch); weight `b` is fed bf16."""
    M, K = a.shape
    K2, N = b.shape
    assert K == K2
    tm = _pick_tile(M, 256, 16)
    tn = _pick_tile(N, 256, 128)

    inputs = [a, b.astype(jnp.bfloat16)]          # no-op when weights are already bf16
    in_specs = [pl.BlockSpec((tm, K), lambda i, j: (i, 0)),
                pl.BlockSpec((K, tn), lambda i, j: (0, j))]
    if ln is not None:
        gamma, beta = ln
        inputs += [gamma.reshape(1, K).astype(jnp.float32),
                   beta.reshape(1, K).astype(jnp.float32)]
        in_specs += [pl.BlockSpec((1, K), lambda i, j: (0, 0)),
                     pl.BlockSpec((1, K), lambda i, j: (0, 0))]
    if bias is not None:
        inputs.append(bias.reshape(1, N).astype(jnp.float32))
        in_specs.append(pl.BlockSpec((1, tn), lambda i, j: (0, j)))
    if residual is not None:
        inputs.append(residual.astype(jnp.float32))
        in_specs.append(pl.BlockSpec((tm, tn), lambda i, j: (i, j)))

    kernel = functools.partial(_mm_kernel, act=act, has_bias=bias is not None,
                               has_res=residual is not None, has_ln=ln is not None)
    return pl.pallas_call(
        kernel,
        out_shape=jax.ShapeDtypeStruct((M, N), out_dtype),
        grid=(M // tm, N // tn),
        in_specs=in_specs,
        out_specs=pl.BlockSpec((tm, tn), lambda i, j: (i, j)),
        compiler_params=pltpu.CompilerParams(
            dimension_semantics=("parallel", "parallel"),
            vmem_limit_bytes=_vmem_limit_bytes()),
    )(*inputs)


# --------------------------------------------------------------------------- causal MHA (consumes packed qkv, lane-dense output)
def _attn_kernel(qkv_ref, o_ref, *, heads, head_dim, width, scale):
    Lp = qkv_ref.shape[1]
    row = jax.lax.broadcasted_iota(jnp.int32, (Lp, Lp), 0)
    col = jax.lax.broadcasted_iota(jnp.int32, (Lp, Lp), 1)
    causal = col <= row                                   # shared over heads / batch

    for h in range(heads):                                # static unroll over heads
        q = qkv_ref[:, :, pl.ds(h * head_dim, head_dim)] * scale       # (Bt, Lp, hd) bf16
        k = qkv_ref[:, :, pl.ds(width + h * head_dim, head_dim)]
        v = qkv_ref[:, :, pl.ds(2 * width + h * head_dim, head_dim)]
        s = jax.lax.dot_general(q, k, (((2,), (2,)), ((0,), (0,))),
                                preferred_element_type=jnp.float32)     # (Bt, Lp, Lp)
        s = jnp.where(causal, s, -1e30)
        p = jnp.exp(s - jnp.max(s, axis=-1, keepdims=True))
        l = jnp.sum(p, axis=-1, keepdims=True)
        o = jax.lax.dot_general(p.astype(jnp.bfloat16), v, (((2,), (1,)), ((0,), (0,))),
                                preferred_element_type=jnp.float32)     # (Bt, Lp, hd)
        o = o * pl.reciprocal(l, approx=True)             # normalize after the matmul
        o_ref[:, :, pl.ds(h * head_dim, head_dim)] = o.astype(o_ref.dtype)


def pallas_attention(qkv, *, heads, width, out_dtype=jnp.bfloat16):
    """qkv: (B, Lp, 3*W) packed [Q|K|V] (bf16). Returns (B, Lp, W) with heads merged."""
    B, Lp, three_w = qkv.shape
    assert three_w == 3 * width
    head_dim = width // heads
    bt = 1
    for c in range(min(B, 8), 0, -1):                     # batch rows per grid step
        if B % c == 0:
            bt = c
            break
    kernel = functools.partial(_attn_kernel, heads=heads, head_dim=head_dim,
                               width=width, scale=float(head_dim) ** -0.5)
    blk_in = pl.BlockSpec((bt, Lp, 3 * width), lambda b: (b, 0, 0))
    blk_out = pl.BlockSpec((bt, Lp, width), lambda b: (b, 0, 0))
    return pl.pallas_call(
        kernel,
        out_shape=jax.ShapeDtypeStruct((B, Lp, width), out_dtype),
        grid=(B // bt,),
        in_specs=[blk_in],
        out_specs=blk_out,
        compiler_params=pltpu.CompilerParams(
            dimension_semantics=("parallel",),
            vmem_limit_bytes=_vmem_limit_bytes()),
    )(qkv)


# --------------------------------------------------------------------------- forward pass
def text_net_fwd(params, text, *, heads):
    B, L = text.shape
    W = params['token_emb'].shape[1]
    Lp = ((L + 15) // 16) * 16                            # pad so B*Lp tiles cleanly

    # TODO(synk): token-embedding gather / argmax EOT row select stay as host-side jnp
    # gathers (data-dependent gathers have no cheap rectangular BlockSpec form).
    x = params['token_emb'][text].astype(jnp.float32) + params['pos_emb'][None, :L, :]
    if Lp != L:
        x = jnp.pad(x, ((0, 0), (0, Lp - L), (0, 0)))     # pad rows are masked by causality
    x2 = x.reshape(B * Lp, W)                             # residual stream (f32)

    for blk in params['blocks']:
        # --- attention sub-block: x = x + out_proj(attn(ln_1(x))) ---
        qkv = fused_matmul(x2, blk['in_w'], bias=blk['in_b'],
                           ln=(blk['ln1_g'], blk['ln1_b']), out_dtype=jnp.bfloat16)
        attn = pallas_attention(qkv.reshape(B, Lp, 3 * W), heads=heads, width=W)
        x2 = fused_matmul(attn.reshape(B * Lp, W), blk['out_w'],
                          bias=blk['out_b'], residual=x2)

        # --- MLP sub-block: x = x + c_proj(quick_gelu(c_fc(ln_2(x)))) ---
        h = fused_matmul(x2, blk['fc_w'], bias=blk['fc_b'],
                         ln=(blk['ln2_g'], blk['ln2_b']),
                         act='quick_gelu', out_dtype=jnp.bfloat16)
        x2 = fused_matmul(h, blk['proj_w'], bias=blk['proj_b'], residual=x2)

    # ln_final is row-wise, so gather the EOT rows first and fuse LN into the
    # projection matmul: feat_b = LN(x[b, eot_b]) @ text_projection.
    eot = jnp.argmax(text, axis=-1)
    feat = x2.reshape(B, Lp, W)[jnp.arange(B), eot]       # (B, W) f32
    return fused_matmul(feat, params['text_proj'],
                        ln=(params['lnf_g'], params['lnf_b']))


# --------------------------------------------------------------------------- deterministic init (weights stored bf16 once)
def init_params(key, *, embed_dim, context_length, vocab_size, width, layers):
    keys = iter(jax.random.split(key, 4 + 4 * layers))
    nk = lambda: next(keys)
    proj_std = width ** -0.5 * (2 * layers) ** -0.5
    attn_std = width ** -0.5
    fc_std = (2 * width) ** -0.5
    bf = lambda a: a.astype(jnp.bfloat16)

    params = {
        'token_emb': 0.02 * jax.random.normal(nk(), (vocab_size, width), jnp.float32),
        'pos_emb': 0.01 * jax.random.normal(nk(), (context_length, width), jnp.float32),
        'lnf_g': jnp.ones((width,), jnp.float32),
        'lnf_b': jnp.zeros((width,), jnp.float32),
        'text_proj': bf(attn_std * jax.random.normal(nk(), (width, embed_dim), jnp.float32)),
    }
    blocks = []
    for _ in range(layers):
        blocks.append({
            'ln1_g': jnp.ones((width,), jnp.float32), 'ln1_b': jnp.zeros((width,), jnp.float32),
            'ln2_g': jnp.ones((width,), jnp.float32), 'ln2_b': jnp.zeros((width,), jnp.float32),
            # weights stored in (in, out) layout, bf16, so the MXU operand is DMA'd as-is
            'in_w': bf(attn_std * jax.random.normal(nk(), (width, 3 * width), jnp.float32)),
            'in_b': jnp.zeros((3 * width,), jnp.float32),
            'out_w': bf(proj_std * jax.random.normal(nk(), (width, width), jnp.float32)),
            'out_b': jnp.zeros((width,), jnp.float32),
            'fc_w': bf(fc_std * jax.random.normal(nk(), (width, 4 * width), jnp.float32)),
            'fc_b': jnp.zeros((4 * width,), jnp.float32),
            'proj_w': bf(proj_std * jax.random.normal(nk(), (4 * width, width), jnp.float32)),
            'proj_b': jnp.zeros((width,), jnp.float32),
        })
    params['blocks'] = blocks
    return params


if __name__ == "__main__":
    key = jax.random.PRNGKey(0)
    pkey, tkey = jax.random.split(key)

    # Small, lane-aligned demo config.
    embed_dim = 64
    context_length = 16
    vocab_size = 256
    transformer_width = 128
    transformer_heads = 4
    transformer_layers = 2
    batch = 2

    params = init_params(pkey, embed_dim=embed_dim, context_length=context_length,
                         vocab_size=vocab_size, width=transformer_width,
                         layers=transformer_layers)
    text = jax.random.randint(tkey, (batch, context_length), 0, vocab_size, dtype=jnp.int32)

    fwd = jax.jit(text_net_fwd, static_argnames=('heads',))
    out = fwd(params, text, heads=transformer_heads)
    jax.block_until_ready(out)
    assert out.shape == (batch, embed_dim), out.shape
    assert bool(jnp.all(jnp.isfinite(out)))
    print("KERNEL_OK")
</pallas_src>

<mosaic_0001>
module attributes {stable_mosaic.version = 11 : i64} {
  func.func @_attn_kernel(%arg0: i32, %arg1: memref<2x16x384xbf16, #tpu.memory_space<vmem>>, %arg2: memref<2x16x128xbf16, #tpu.memory_space<vmem>>) attributes {dimension_semantics = [#tpu.dimension_semantics<parallel>], iteration_bounds = array<i64: 1>, scalar_prefetch = 0 : i64, scratch_operands = 0 : i64, tpu.core_type = #tpu.core_type<tc>, window_params = [{transform_indices = @transform_0, window_bounds = array<i64: 2, 16, 384>}, {transform_indices = @transform_1, window_bounds = array<i64: 2, 16, 128>}]} {
    %0 = tpu.iota {dimensions = array<i32: 0>} : vector<16x16xi32>
    %1 = tpu.iota {dimensions = array<i32: 1>} : vector<16x16xi32>
    %2 = arith.cmpi sle, %1, %0 : vector<16x16xi32>
    %c0 = arith.constant 0 : index
    %c0_0 = arith.constant 0 : index
    %c0_1 = arith.constant 0 : index
    %3 = vector.load %arg1[%c0, %c0_0, %c0_1] : memref<2x16x384xbf16, #tpu.memory_space<vmem>>, vector<2x16x32xbf16>
    %cst = arith.constant 1.767580e-01 : bf16
    %4 = vector.broadcast %cst : bf16 to vector<2x16x32xbf16>
    %5 = arith.mulf %3, %4 : vector<2x16x32xbf16>
    %c0_2 = arith.constant 0 : index
    %c0_3 = arith.constant 0 : index
    %c128 = arith.constant 128 : index
    %6 = vector.load %arg1[%c0_2, %c0_3, %c128] : memref<2x16x384xbf16, #tpu.memory_space<vmem>>, vector<2x16x32xbf16>
    %c0_4 = arith.constant 0 : index
    %c0_5 = arith.constant 0 : index
    %c256 = arith.constant 256 : index
    %7 = vector.load %arg1[%c0_4, %c0_5, %c256] : memref<2x16x384xbf16, #tpu.memory_space<vmem>>, vector<2x16x32xbf16>
    %cst_6 = arith.constant dense<0.000000e+00> : vector<2x16x16xf32>
    %8 = tpu.matmul %5, %6, %cst_6 {dimension_numbers = #tpu.dot_dimension_numbers<[2], [2], [1], [1], [0, 0, 0, 1, 1, 1], [0], [0]>} : vector<2x16x32xbf16>, vector<2x16x32xbf16>, vector<2x16x16xf32> -> vector<2x16x16xf32>
    %cst_7 = arith.constant -1.000000e+30 : f32
    %9 = vector.shape_cast %2 : vector<16x16xi1> to vector<1x16x16xi1>
    %10 = vector.broadcast %9 : vector<1x16x16xi1> to vector<2x16x16xi1>
    %11 = vector.broadcast %cst_7 : f32 to vector<2x16x16xf32>
    %12 = arith.select %10, %8, %11 : vector<2x16x16xi1>, vector<2x16x16xf32>
    %cst_8 = arith.constant dense<0xFF800000> : vector<2x16xf32>
    %13 = vector.multi_reduction <maximumf>, %12, %cst_8 [2] : vector<2x16x16xf32> to vector<2x16xf32>
    %14 = vector.shape_cast %13 : vector<2x16xf32> to vector<2x16x1xf32>
    %15 = vector.broadcast %14 : vector<2x16x1xf32> to vector<2x16x16xf32>
    %16 = arith.subf %12, %15 : vector<2x16x16xf32>
    %17 = math.exp %16 : vector<2x16x16xf32>
    %cst_9 = arith.constant dense<0.000000e+00> : vector<2x16xf32>
    %18 = vector.multi_reduction <add>, %17, %cst_9 [2] : vector<2x16x16xf32> to vector<2x16xf32>
    %19 = vector.shape_cast %18 : vector<2x16xf32> to vector<2x16x1xf32>
    %20 = arith.truncf %17 : vector<2x16x16xf32> to vector<2x16x16xbf16>
    %cst_10 = arith.constant dense<0.000000e+00> : vector<2x16x32xf32>
    %21 = tpu.matmul %20, %7, %cst_10 {dimension_numbers = #tpu.dot_dimension_numbers<[2], [1], [1], [2], [0, 0, 0, 1, 1, 2], [0], [0]>} : vector<2x16x16xbf16>, vector<2x16x32xbf16>, vector<2x16x32xf32> -> vector<2x16x32xf32>
    %22 = tpu.reciprocal %19 {approx = true} : vector<2x16x1xf32> -> vector<2x16x1xf32>
    %23 = vector.broadcast %22 : vector<2x16x1xf32> to vector<2x16x32xf32>
    %24 = arith.mulf %21, %23 : vector<2x16x32xf32>
    %25 = arith.truncf %24 : vector<2x16x32xf32> to vector<2x16x32xbf16>
    %c0_11 = arith.constant 0 : index
    %c0_12 = arith.constant 0 : index
    %c0_13 = arith.constant 0 : index
    %26 = vector.load %arg2[%c0_11, %c0_12, %c0_13] : memref<2x16x128xbf16, #tpu.memory_space<vmem>>, vector<2x16x32xbf16>
    tpu.vector_store %arg2[%c0_11, %c0_12, %c0_13], %25 {strides = array<i32>} : memref<2x16x128xbf16, #tpu.memory_space<vmem>>, vector<2x16x32xbf16>,
    %c0_14 = arith.constant 0 : index
    %c0_15 = arith.constant 0 : index
    %c32 = arith.constant 32 : index
    %27 = vector.load %arg1[%c0_14, %c0_15, %c32] : memref<2x16x384xbf16, #tpu.memory_space<vmem>>, vector<2x16x32xbf16>
    %cst_16 = arith.constant 1.767580e-01 : bf16
    %28 = vector.broadcast %cst_16 : bf16 to vector<2x16x32xbf16>
    %29 = arith.mulf %27, %28 : vector<2x16x32xbf16>
    %c0_17 = arith.constant 0 : index
    %c0_18 = arith.constant 0 : index
    %c160 = arith.constant 160 : index
    %30 = vector.load %arg1[%c0_17, %c0_18, %c160] : memref<2x16x384xbf16, #tpu.memory_space<vmem>>, vector<2x16x32xbf16>
    %c0_19 = arith.constant 0 : index
    %c0_20 = arith.constant 0 : index
    %c288 = arith.constant 288 : index
    %31 = vector.load %arg1[%c0_19, %c0_20, %c288] : memref<2x16x384xbf16, #tpu.memory_space<vmem>>, vector<2x16x32xbf16>
    %cst_21 = arith.constant dense<0.000000e+00> : vector<2x16x16xf32>
    %32 = tpu.matmul %29, %30, %cst_21 {dimension_numbers = #tpu.dot_dimension_numbers<[2], [2], [1], [1], [0, 0, 0, 1, 1, 1], [0], [0]>} : vector<2x16x32xbf16>, vector<2x16x32xbf16>, vector<2x16x16xf32> -> vector<2x16x16xf32>
    %cst_22 = arith.constant -1.000000e+30 : f32
    %33 = vector.shape_cast %2 : vector<16x16xi1> to vector<1x16x16xi1>
    %34 = vector.broadcast %33 : vector<1x16x16xi1> to vector<2x16x16xi1>
    %35 = vector.broadcast %cst_22 : f32 to vector<2x16x16xf32>
    %36 = arith.select %34, %32, %35 : vector<2x16x16xi1>, vector<2x16x16xf32>
    %cst_23 = arith.constant dense<0xFF800000> : vector<2x16xf32>
    %37 = vector.multi_reduction <maximumf>, %36, %cst_23 [2] : vector<2x16x16xf32> to vector<2x16xf32>
    %38 = vector.shape_cast %37 : vector<2x16xf32> to vector<2x16x1xf32>
    %39 = vector.broadcast %38 : vector<2x16x1xf32> to vector<2x16x16xf32>
    %40 = arith.subf %36, %39 : vector<2x16x16xf32>
    %41 = math.exp %40 : vector<2x16x16xf32>
    %cst_24 = arith.constant dense<0.000000e+00> : vector<2x16xf32>
    %42 = vector.multi_reduction <add>, %41, %cst_24 [2] : vector<2x16x16xf32> to vector<2x16xf32>
    %43 = vector.shape_cast %42 : vector<2x16xf32> to vector<2x16x1xf32>
    %44 = arith.truncf %41 : vector<2x16x16xf32> to vector<2x16x16xbf16>
    %cst_25 = arith.constant dense<0.000000e+00> : vector<2x16x32xf32>
    %45 = tpu.matmul %44, %31, %cst_25 {dimension_numbers = #tpu.dot_dimension_numbers<[2], [1], [1], [2], [0, 0, 0, 1, 1, 2], [0], [0]>} : vector<2x16x16xbf16>, vector<2x16x32xbf16>, vector<2x16x32xf32> -> vector<2x16x32xf32>
    %46 = tpu.reciprocal %43 {approx = true} : vector<2x16x1xf32> -> vector<2x16x1xf32>
    %47 = vector.broadcast %46 : vector<2x16x1xf32> to vector<2x16x32xf32>
    %48 = arith.mulf %45, %47 : vector<2x16x32xf32>
    %49 = arith.truncf %48 : vector<2x16x32xf32> to vector<2x16x32xbf16>
    %c0_26 = arith.constant 0 : index
    %c0_27 = arith.constant 0 : index
    %c32_28 = arith.constant 32 : index
    %50 = vector.load %arg2[%c0_26, %c0_27, %c32_28] : memref<2x16x128xbf16, #tpu.memory_space<vmem>>, vector<2x16x32xbf16>
    tpu.vector_store %arg2[%c0_26, %c0_27, %c32_28], %49 {strides = array<i32>} : memref<2x16x128xbf16, #tpu.memory_space<vmem>>, vector<2x16x32xbf16>,
    %c0_29 = arith.constant 0 : index
    %c0_30 = arith.constant 0 : index
    %c64 = arith.constant 64 : index
    %51 = vector.load %arg1[%c0_29, %c0_30, %c64] : memref<2x16x384xbf16, #tpu.memory_space<vmem>>, vector<2x16x32xbf16>
    %cst_31 = arith.constant 1.767580e-01 : bf16
    %52 = vector.broadcast %cst_31 : bf16 to vector<2x16x32xbf16>
    %53 = arith.mulf %51, %52 : vector<2x16x32xbf16>
    %c0_32 = arith.constant 0 : index
    %c0_33 = arith.constant 0 : index
    %c192 = arith.constant 192 : index
    %54 = vector.load %arg1[%c0_32, %c0_33, %c192] : memref<2x16x384xbf16, #tpu.memory_space<vmem>>, vector<2x16x32xbf16>
    %c0_34 = arith.constant 0 : index
    %c0_35 = arith.constant 0 : index
    %c320 = arith.constant 320 : index
    %55 = vector.load %arg1[%c0_34, %c0_35, %c320] : memref<2x16x384xbf16, #tpu.memory_space<vmem>>, vector<2x16x32xbf16>
    %cst_36 = arith.constant dense<0.000000e+00> : vector<2x16x16xf32>
    %56 = tpu.matmul %53, %54, %cst_36 {dimension_numbers = #tpu.dot_dimension_numbers<[2], [2], [1], [1], [0, 0, 0, 1, 1, 1], [0], [0]>} : vector<2x16x32xbf16>, vector<2x16x32xbf16>, vector<2x16x16xf32> -> vector<2x16x16xf32>
    %cst_37 = arith.constant -1.000000e+30 : f32
    %57 = vector.shape_cast %2 : vector<16x16xi1> to vector<1x16x16xi1>
    %58 = vector.broadcast %57 : vector<1x16x16xi1> to vector<2x16x16xi1>
    %59 = vector.broadcast %cst_37 : f32 to vector<2x16x16xf32>
    %60 = arith.select %58, %56, %59 : vector<2x16x16xi1>, vector<2x16x16xf32>
    %cst_38 = arith.constant dense<0xFF800000> : vector<2x16xf32>
    %61 = vector.multi_reduction <maximumf>, %60, %cst_38 [2] : vector<2x16x16xf32> to vector<2x16xf32>
    %62 = vector.shape_cast %61 : vector<2x16xf32> to vector<2x16x1xf32>
    %63 = vector.broadcast %62 : vector<2x16x1xf32> to vector<2x16x16xf32>
    %64 = arith.subf %60, %63 : vector<2x16x16xf32>
    %65 = math.exp %64 : vector<2x16x16xf32>
    %cst_39 = arith.constant dense<0.000000e+00> : vector<2x16xf32>
    %66 = vector.multi_reduction <add>, %65, %cst_39 [2] : vector<2x16x16xf32> to vector<2x16xf32>
    %67 = vector.shape_cast %66 : vector<2x16xf32> to vector<2x16x1xf32>
    %68 = arith.truncf %65 : vector<2x16x16xf32> to vector<2x16x16xbf16>
    %cst_40 = arith.constant dense<0.000000e+00> : vector<2x16x32xf32>
    %69 = tpu.matmul %68, %55, %cst_40 {dimension_numbers = #tpu.dot_dimension_numbers<[2], [1], [1], [2], [0, 0, 0, 1, 1, 2], [0], [0]>} : vector<2x16x16xbf16>, vector<2x16x32xbf16>, vector<2x16x32xf32> -> vector<2x16x32xf32>
    %70 = tpu.reciprocal %67 {approx = true} : vector<2x16x1xf32> -> vector<2x16x1xf32>
    %71 = vector.broadcast %70 : vector<2x16x1xf32> to vector<2x16x32xf32>
    %72 = arith.mulf %69, %71 : vector<2x16x32xf32>
    %73 = arith.truncf %72 : vector<2x16x32xf32> to vector<2x16x32xbf16>
    %c0_41 = arith.constant 0 : index
    %c0_42 = arith.constant 0 : index
    %c64_43 = arith.constant 64 : index
    %74 = vector.load %arg2[%c0_41, %c0_42, %c64_43] : memref<2x16x128xbf16, #tpu.memory_space<vmem>>, vector<2x16x32xbf16>
    tpu.vector_store %arg2[%c0_41, %c0_42, %c64_43], %73 {strides = array<i32>} : memref<2x16x128xbf16, #tpu.memory_space<vmem>>, vector<2x16x32xbf16>,
    %c0_44 = arith.constant 0 : index
    %c0_45 = arith.constant 0 : index
    %c96 = arith.constant 96 : index
    %75 = vector.load %arg1[%c0_44, %c0_45, %c96] : memref<2x16x384xbf16, #tpu.memory_space<vmem>>, vector<2x16x32xbf16>
    %cst_46 = arith.constant 1.767580e-01 : bf16
    %76 = vector.broadcast %cst_46 : bf16 to vector<2x16x32xbf16>
    %77 = arith.mulf %75, %76 : vector<2x16x32xbf16>
    %c0_47 = arith.constant 0 : index
    %c0_48 = arith.constant 0 : index
    %c224 = arith.constant 224 : index
    %78 = vector.load %arg1[%c0_47, %c0_48, %c224] : memref<2x16x384xbf16, #tpu.memory_space<vmem>>, vector<2x16x32xbf16>
    %c0_49 = arith.constant 0 : index
    %c0_50 = arith.constant 0 : index
    %c352 = arith.constant 352 : index
    %79 = vector.load %arg1[%c0_49, %c0_50, %c352] : memref<2x16x384xbf16, #tpu.memory_space<vmem>>, vector<2x16x32xbf16>
    %cst_51 = arith.constant dense<0.000000e+00> : vector<2x16x16xf32>
    %80 = tpu.matmul %77, %78, %cst_51 {dimension_numbers = #tpu.dot_dimension_numbers<[2], [2], [1], [1], [0, 0, 0, 1, 1, 1], [0], [0]>} : vector<2x16x32xbf16>, vector<2x16x32xbf16>, vector<2x16x16xf32> -> vector<2x16x16xf32>
    %cst_52 = arith.constant -1.000000e+30 : f32
    %81 = vector.shape_cast %2 : vector<16x16xi1> to vector<1x16x16xi1>
    %82 = vector.broadcast %81 : vector<1x16x16xi1> to vector<2x16x16xi1>
    %83 = vector.broadcast %cst_52 : f32 to vector<2x16x16xf32>
    %84 = arith.select %82, %80, %83 : vector<2x16x16xi1>, vector<2x16x16xf32>
    %cst_53 = arith.constant dense<0xFF800000> : vector<2x16xf32>
    %85 = vector.multi_reduction <maximumf>, %84, %cst_53 [2] : vector<2x16x16xf32> to vector<2x16xf32>
    %86 = vector.shape_cast %85 : vector<2x16xf32> to vector<2x16x1xf32>
    %87 = vector.broadcast %86 : vector<2x16x1xf32> to vector<2x16x16xf32>
    %88 = arith.subf %84, %87 : vector<2x16x16xf32>
    %89 = math.exp %88 : vector<2x16x16xf32>
    %cst_54 = arith.constant dense<0.000000e+00> : vector<2x16xf32>
    %90 = vector.multi_reduction <add>, %89, %cst_54 [2] : vector<2x16x16xf32> to vector<2x16xf32>
    %91 = vector.shape_cast %90 : vector<2x16xf32> to vector<2x16x1xf32>
    %92 = arith.truncf %89 : vector<2x16x16xf32> to vector<2x16x16xbf16>
    %cst_55 = arith.constant dense<0.000000e+00> : vector<2x16x32xf32>
    %93 = tpu.matmul %92, %79, %cst_55 {dimension_numbers = #tpu.dot_dimension_numbers<[2], [1], [1], [2], [0, 0, 0, 1, 1, 2], [0], [0]>} : vector<2x16x16xbf16>, vector<2x16x32xbf16>, vector<2x16x32xf32> -> vector<2x16x32xf32>
    %94 = tpu.reciprocal %91 {approx = true} : vector<2x16x1xf32> -> vector<2x16x1xf32>
    %95 = vector.broadcast %94 : vector<2x16x1xf32> to vector<2x16x32xf32>
    %96 = arith.mulf %93, %95 : vector<2x16x32xf32>
    %97 = arith.truncf %96 : vector<2x16x32xf32> to vector<2x16x32xbf16>
    %c0_56 = arith.constant 0 : index
    %c0_57 = arith.constant 0 : index
    %c96_58 = arith.constant 96 : index
    %98 = vector.load %arg2[%c0_56, %c0_57, %c96_58] : memref<2x16x128xbf16, #tpu.memory_space<vmem>>, vector<2x16x32xbf16>
    tpu.vector_store %arg2[%c0_56, %c0_57, %c96_58], %97 {strides = array<i32>} : memref<2x16x128xbf16, #tpu.memory_space<vmem>>, vector<2x16x32xbf16>,
    return
  }
  func.func @transform_0(%arg0: i32) -> (i32, i32, i32) {
    %c0_i32 = arith.constant 0 : i32
    %c0_i32_0 = arith.constant 0 : i32
    %c0_i32_1 = arith.constant 0 : i32
    return %arg0, %c0_i32, %c0_i32_0 : i32, i32, i32
  }
  func.func @transform_1(%arg0: i32) -> (i32, i32, i32) {
    %c0_i32 = arith.constant 0 : i32
    %c0_i32_0 = arith.constant 0 : i32
    %c0_i32_1 = arith.constant 0 : i32
    return %arg0, %c0_i32, %c0_i32_0 : i32, i32, i32
  }
}

module attributes {stable_mosaic.version = 11 : i64} {
  func.func @_mm_kernel(%arg0: i32, %arg1: i32, %arg2: memref<32x128xf32, #tpu.memory_space<vmem>>, %arg3: memref<128x128xbf16, #tpu.memory_space<vmem>>, %arg4: memref<1x128xf32, #tpu.memory_space<vmem>>, %arg5: memref<1x128xf32, #tpu.memory_space<vmem>>, %arg6: memref<1x128xf32, #tpu.memory_space<vmem>>, %arg7: memref<32x128xbf16, #tpu.memory_space<vmem>>) attributes {dimension_semantics = [#tpu.dimension_semantics<parallel>, #tpu.dimension_semantics<parallel>], iteration_bounds = array<i64: 1, 3>, scalar_prefetch = 0 : i64, scratch_operands = 0 : i64, tpu.core_type = #tpu.core_type<tc>, window_params = [{transform_indices = @transform_0, window_bounds = array<i64: 32, 128>}, {transform_indices = @transform_1, window_bounds = array<i64: 128, 128>}, {pipeline_mode = #tpu.pipeline_mode<synchronous>, transform_indices = @transform_2, window_bounds = array<i64: 1, 128>}, {pipeline_mode = #tpu.pipeline_mode<synchronous>, transform_indices = @transform_3, window_bounds = array<i64: 1, 128>}, {transform_indices = @transform_4, window_bounds = array<i64: 1, 128>}, {transform_indices = @transform_5, window_bounds = array<i64: 32, 128>}]} {
    %c0 = arith.constant 0 : index
    %c0_0 = arith.constant 0 : index
    %0 = vector.load %arg2[%c0, %c0_0] : memref<32x128xf32, #tpu.memory_space<vmem>>, vector<32x128xf32>
    %cst = arith.constant dense<0.000000e+00> : vector<32xf32>
    %1 = vector.multi_reduction <add>, %0, %cst [1] : vector<32x128xf32> to vector<32xf32>
    %2 = vector.shape_cast %1 : vector<32xf32> to vector<32x1xf32>
    %cst_1 = arith.constant 1.280000e+02 : f32
    %3 = vector.broadcast %cst_1 : f32 to vector<32x1xf32>
    %4 = arith.divf %2, %3 : vector<32x1xf32>
    %5 = vector.broadcast %4 : vector<32x1xf32> to vector<32x128xf32>
    %6 = arith.subf %0, %5 : vector<32x128xf32>
    %7 = arith.mulf %6, %6 : vector<32x128xf32>
    %cst_2 = arith.constant dense<0.000000e+00> : vector<32xf32>
    %8 = vector.multi_reduction <add>, %7, %cst_2 [1] : vector<32x128xf32> to vector<32xf32>
    %9 = vector.shape_cast %8 : vector<32xf32> to vector<32x1xf32>
    %cst_3 = arith.constant 1.280000e+02 : f32
    %10 = vector.broadcast %cst_3 : f32 to vector<32x1xf32>
    %11 = arith.divf %9, %10 : vector<32x1xf32>
    %cst_4 = arith.constant 9.99999974E-6 : f32
    %12 = vector.broadcast %cst_4 : f32 to vector<32x1xf32>
    %13 = arith.addf %11, %12 : vector<32x1xf32>
    %14 = math.rsqrt %13 : vector<32x1xf32>
    %15 = vector.broadcast %14 : vector<32x1xf32> to vector<32x128xf32>
    %16 = arith.mulf %6, %15 : vector<32x128xf32>
    %c0_5 = arith.constant 0 : index
    %c0_6 = arith.constant 0 : index
    %17 = vector.load %arg4[%c0_5, %c0_6] : memref<1x128xf32, #tpu.memory_space<vmem>>, vector<1x128xf32>
    %18 = vector.broadcast %17 : vector<1x128xf32> to vector<32x128xf32>
    %19 = arith.mulf %16, %18 : vector<32x128xf32>
    %c0_7 = arith.constant 0 : index
    %c0_8 = arith.constant 0 : index
    %20 = vector.load %arg5[%c0_7, %c0_8] : memref<1x128xf32, #tpu.memory_space<vmem>>, vector<1x128xf32>
    %21 = vector.broadcast %20 : vector<1x128xf32> to vector<32x128xf32>
    %22 = arith.addf %19, %21 : vector<32x128xf32>
    %23 = arith.truncf %22 : vector<32x128xf32> to vector<32x128xbf16>
    %c0_9 = arith.constant 0 : index
    %c0_10 = arith.constant 0 : index
    %24 = vector.load %arg3[%c0_9, %c0_10] : memref<128x128xbf16, #tpu.memory_space<vmem>>, vector<128x128xbf16>
    %cst_11 = arith.constant dense<0.000000e+00> : vector<32x128xf32>
    %25 = tpu.matmul %23, %24, %cst_11 {dimension_numbers = #tpu.dot_dimension_numbers<[1], [0], [0], [1], [0, 0, 1, 1], [], []>} : vector<32x128xbf16>, vector<128x128xbf16>, vector<32x128xf32> -> vector<32x128xf32>
    %c0_12 = arith.constant 0 : index
    %c0_13 = arith.constant 0 : index
    %26 = vector.load %arg6[%c0_12, %c0_13] : memref<1x128xf32, #tpu.memory_space<vmem>>, vector<1x128xf32>
    %27 = vector.broadcast %26 : vector<1x128xf32> to vector<32x128xf32>
    %28 = arith.addf %25, %27 : vector<32x128xf32>
    %29 = arith.truncf %28 : vector<32x128xf32> to vector<32x128xbf16>
    %c0_14 = arith.constant 0 : index
    %c0_15 = arith.constant 0 : index
    %30 = vector.load %arg7[%c0_14, %c0_15] : memref<32x128xbf16, #tpu.memory_space<vmem>>, vector<32x128xbf16>
    tpu.vector_store %arg7[%c0_14, %c0_15], %29 {strides = array<i32>} : memref<32x128xbf16, #tpu.memory_space<vmem>>, vector<32x128xbf16>,
    return
  }
  func.func @transform_0(%arg0: i32, %arg1: i32) -> (i32, i32) {
    %c0_i32 = arith.constant 0 : i32
    %c0_i32_0 = arith.constant 0 : i32
    return %arg0, %c0_i32 : i32, i32
  }
  func.func @transform_1(%arg0: i32, %arg1: i32) -> (i32, i32) {
    %c0_i32 = arith.constant 0 : i32
    %c0_i32_0 = arith.constant 0 : i32
    return %c0_i32, %arg1 : i32, i32
  }
  func.func @transform_2(%arg0: i32, %arg1: i32) -> (i32, i32) {
    %c0_i32 = arith.constant 0 : i32
    %c0_i32_0 = arith.constant 0 : i32
    %c0_i32_1 = arith.constant 0 : i32
    return %c0_i32, %c0_i32_0 : i32, i32
  }
  func.func @transform_3(%arg0: i32, %arg1: i32) -> (i32, i32) {
    %c0_i32 = arith.constant 0 : i32
    %c0_i32_0 = arith.constant 0 : i32
    %c0_i32_1 = arith.constant 0 : i32
    return %c0_i32, %c0_i32_0 : i32, i32
  }
  func.func @transform_4(%arg0: i32, %arg1: i32) -> (i32, i32) {
    %c0_i32 = arith.constant 0 : i32
    %c0_i32_0 = arith.constant 0 : i32
    return %c0_i32, %arg1 : i32, i32
  }
  func.func @transform_5(%arg0: i32, %arg1: i32) -> (i32, i32) {
    %c0_i32 = arith.constant 0 : i32
    return %arg0, %arg1 : i32, i32
  }
}

module attributes {stable_mosaic.version = 11 : i64} {
  func.func @_mm_kernel(%arg0: i32, %arg1: i32, %arg2: memref<32x128xbf16, #tpu.memory_space<vmem>>, %arg3: memref<128x128xbf16, #tpu.memory_space<vmem>>, %arg4: memref<1x128xf32, #tpu.memory_space<vmem>>, %arg5: memref<32x128xf32, #tpu.memory_space<vmem>>, %arg6: memref<32x128xf32, #tpu.memory_space<vmem>>) attributes {dimension_semantics = [#tpu.dimension_semantics<parallel>, #tpu.dimension_semantics<parallel>], iteration_bounds = array<i64: 1, 1>, scalar_prefetch = 0 : i64, scratch_operands = 0 : i64, tpu.core_type = #tpu.core_type<tc>, window_params = [{transform_indices = @transform_0, window_bounds = array<i64: 32, 128>}, {transform_indices = @transform_1, window_bounds = array<i64: 128, 128>}, {transform_indices = @transform_2, window_bounds = array<i64: 1, 128>}, {transform_indices = @transform_3, window_bounds = array<i64: 32, 128>}, {transform_indices = @transform_4, window_bounds = array<i64: 32, 128>}]} {
    %c0 = arith.constant 0 : index
    %c0_0 = arith.constant 0 : index
    %0 = vector.load %arg2[%c0, %c0_0] : memref<32x128xbf16, #tpu.memory_space<vmem>>, vector<32x128xbf16>
    %c0_1 = arith.constant 0 : index
    %c0_2 = arith.constant 0 : index
    %1 = vector.load %arg3[%c0_1, %c0_2] : memref<128x128xbf16, #tpu.memory_space<vmem>>, vector<128x128xbf16>
    %cst = arith.constant dense<0.000000e+00> : vector<32x128xf32>
    %2 = tpu.matmul %0, %1, %cst {dimension_numbers = #tpu.dot_dimension_numbers<[1], [0], [0], [1], [0, 0, 1, 1], [], []>} : vector<32x128xbf16>, vector<128x128xbf16>, vector<32x128xf32> -> vector<32x128xf32>
    %c0_3 = arith.constant 0 : index
    %c0_4 = arith.constant 0 : index
    %3 = vector.load %arg4[%c0_3, %c0_4] : memref<1x128xf32, #tpu.memory_space<vmem>>, vector<1x128xf32>
    %4 = vector.broadcast %3 : vector<1x128xf32> to vector<32x128xf32>
    %5 = arith.addf %2, %4 : vector<32x128xf32>
    %c0_5 = arith.constant 0 : index
    %c0_6 = arith.constant 0 : index
    %6 = vector.load %arg5[%c0_5, %c0_6] : memref<32x128xf32, #tpu.memory_space<vmem>>, vector<32x128xf32>
    %7 = arith.addf %5, %6 : vector<32x128xf32>
    %c0_7 = arith.constant 0 : index
    %c0_8 = arith.constant 0 : index
    %8 = vector.load %arg6[%c0_7, %c0_8] : memref<32x128xf32, #tpu.memory_space<vmem>>, vector<32x128xf32>
    tpu.vector_store %arg6[%c0_7, %c0_8], %7 {strides = array<i32>} : memref<32x128xf32, #tpu.memory_space<vmem>>, vector<32x128xf32>,
    return
  }
  func.func @transform_0(%arg0: i32, %arg1: i32) -> (i32, i32) {
    %c0_i32 = arith.constant 0 : i32
    %c0_i32_0 = arith.constant 0 : i32
    return %arg0, %c0_i32 : i32, i32
  }
  func.func @transform_1(%arg0: i32, %arg1: i32) -> (i32, i32) {
    %c0_i32 = arith.constant 0 : i32
    %c0_i32_0 = arith.constant 0 : i32
    return %c0_i32, %arg1 : i32, i32
  }
  func.func @transform_2(%arg0: i32, %arg1: i32) -> (i32, i32) {
    %c0_i32 = arith.constant 0 : i32
    %c0_i32_0 = arith.constant 0 : i32
    return %c0_i32, %arg1 : i32, i32
  }
  func.func @transform_3(%arg0: i32, %arg1: i32) -> (i32, i32) {
    %c0_i32 = arith.constant 0 : i32
    return %arg0, %arg1 : i32, i32
  }
  func.func @transform_4(%arg0: i32, %arg1: i32) -> (i32, i32) {
    %c0_i32 = arith.constant 0 : i32
    return %arg0, %arg1 : i32, i32
  }
}

module attributes {stable_mosaic.version = 11 : i64} {
  func.func @_mm_kernel(%arg0: i32, %arg1: i32, %arg2: memref<32x128xf32, #tpu.memory_space<vmem>>, %arg3: memref<128x256xbf16, #tpu.memory_space<vmem>>, %arg4: memref<1x128xf32, #tpu.memory_space<vmem>>, %arg5: memref<1x128xf32, #tpu.memory_space<vmem>>, %arg6: memref<1x256xf32, #tpu.memory_space<vmem>>, %arg7: memref<32x256xbf16, #tpu.memory_space<vmem>>) attributes {dimension_semantics = [#tpu.dimension_semantics<parallel>, #tpu.dimension_semantics<parallel>], iteration_bounds = array<i64: 1, 2>, scalar_prefetch = 0 : i64, scratch_operands = 0 : i64, tpu.core_type = #tpu.core_type<tc>, window_params = [{transform_indices = @transform_0, window_bounds = array<i64: 32, 128>}, {transform_indices = @transform_1, window_bounds = array<i64: 128, 256>}, {pipeline_mode = #tpu.pipeline_mode<synchronous>, transform_indices = @transform_2, window_bounds = array<i64: 1, 128>}, {pipeline_mode = #tpu.pipeline_mode<synchronous>, transform_indices = @transform_3, window_bounds = array<i64: 1, 128>}, {transform_indices = @transform_4, window_bounds = array<i64: 1, 256>}, {transform_indices = @transform_5, window_bounds = array<i64: 32, 256>}]} {
    %c0 = arith.constant 0 : index
    %c0_0 = arith.constant 0 : index
    %0 = vector.load %arg2[%c0, %c0_0] : memref<32x128xf32, #tpu.memory_space<vmem>>, vector<32x128xf32>
    %cst = arith.constant dense<0.000000e+00> : vector<32xf32>
    %1 = vector.multi_reduction <add>, %0, %cst [1] : vector<32x128xf32> to vector<32xf32>
    %2 = vector.shape_cast %1 : vector<32xf32> to vector<32x1xf32>
    %cst_1 = arith.constant 1.280000e+02 : f32
    %3 = vector.broadcast %cst_1 : f32 to vector<32x1xf32>
    %4 = arith.divf %2, %3 : vector<32x1xf32>
    %5 = vector.broadcast %4 : vector<32x1xf32> to vector<32x128xf32>
    %6 = arith.subf %0, %5 : vector<32x128xf32>
    %7 = arith.mulf %6, %6 : vector<32x128xf32>
    %cst_2 = arith.constant dense<0.000000e+00> : vector<32xf32>
    %8 = vector.multi_reduction <add>, %7, %cst_2 [1] : vector<32x128xf32> to vector<32xf32>
    %9 = vector.shape_cast %8 : vector<32xf32> to vector<32x1xf32>
    %cst_3 = arith.constant 1.280000e+02 : f32
    %10 = vector.broadcast %cst_3 : f32 to vector<32x1xf32>
    %11 = arith.divf %9, %10 : vector<32x1xf32>
    %cst_4 = arith.constant 9.99999974E-6 : f32
    %12 = vector.broadcast %cst_4 : f32 to vector<32x1xf32>
    %13 = arith.addf %11, %12 : vector<32x1xf32>
    %14 = math.rsqrt %13 : vector<32x1xf32>
    %15 = vector.broadcast %14 : vector<32x1xf32> to vector<32x128xf32>
    %16 = arith.mulf %6, %15 : vector<32x128xf32>
    %c0_5 = arith.constant 0 : index
    %c0_6 = arith.constant 0 : index
    %17 = vector.load %arg4[%c0_5, %c0_6] : memref<1x128xf32, #tpu.memory_space<vmem>>, vector<1x128xf32>
    %18 = vector.broadcast %17 : vector<1x128xf32> to vector<32x128xf32>
    %19 = arith.mulf %16, %18 : vector<32x128xf32>
    %c0_7 = arith.constant 0 : index
    %c0_8 = arith.constant 0 : index
    %20 = vector.load %arg5[%c0_7, %c0_8] : memref<1x128xf32, #tpu.memory_space<vmem>>, vector<1x128xf32>
    %21 = vector.broadcast %20 : vector<1x128xf32> to vector<32x128xf32>
    %22 = arith.addf %19, %21 : vector<32x128xf32>
    %23 = arith.truncf %22 : vector<32x128xf32> to vector<32x128xbf16>
    %c0_9 = arith.constant 0 : index
    %c0_10 = arith.constant 0 : index
    %24 = vector.load %arg3[%c0_9, %c0_10] : memref<128x256xbf16, #tpu.memory_space<vmem>>, vector<128x256xbf16>
    %cst_11 = arith.constant dense<0.000000e+00> : vector<32x256xf32>
    %25 = tpu.matmul %23, %24, %cst_11 {dimension_numbers = #tpu.dot_dimension_numbers<[1], [0], [0], [1], [0, 0, 1, 1], [], []>} : vector<32x128xbf16>, vector<128x256xbf16>, vector<32x256xf32> -> vector<32x256xf32>
    %c0_12 = arith.constant 0 : index
    %c0_13 = arith.constant 0 : index
    %26 = vector.load %arg6[%c0_12, %c0_13] : memref<1x256xf32, #tpu.memory_space<vmem>>, vector<1x256xf32>
    %27 = vector.broadcast %26 : vector<1x256xf32> to vector<32x256xf32>
    %28 = arith.addf %25, %27 : vector<32x256xf32>
    %cst_14 = arith.constant -1.702000e+00 : f32
    %29 = vector.broadcast %cst_14 : f32 to vector<32x256xf32>
    %30 = arith.mulf %29, %28 : vector<32x256xf32>
    %31 = math.exp %30 : vector<32x256xf32>
    %cst_15 = arith.constant 1.000000e+00 : f32
    %32 = vector.broadcast %cst_15 : f32 to vector<32x256xf32>
    %33 = arith.addf %32, %31 : vector<32x256xf32>
    %34 = tpu.reciprocal %33 {approx = true} : vector<32x256xf32> -> vector<32x256xf32>
    %35 = arith.mulf %28, %34 : vector<32x256xf32>
    %36 = arith.truncf %35 : vector<32x256xf32> to vector<32x256xbf16>
    %c0_16 = arith.constant 0 : index
    %c0_17 = arith.constant 0 : index
    %37 = vector.load %arg7[%c0_16, %c0_17] : memref<32x256xbf16, #tpu.memory_space<vmem>>, vector<32x256xbf16>
    tpu.vector_store %arg7[%c0_16, %c0_17], %36 {strides = array<i32>} : memref<32x256xbf16, #tpu.memory_space<vmem>>, vector<32x256xbf16>,
    return
  }
  func.func @transform_0(%arg0: i32, %arg1: i32) -> (i32, i32) {
    %c0_i32 = arith.constant 0 : i32
    %c0_i32_0 = arith.constant 0 : i32
    return %arg0, %c0_i32 : i32, i32
  }
  func.func @transform_1(%arg0: i32, %arg1: i32) -> (i32, i32) {
    %c0_i32 = arith.constant 0 : i32
    %c0_i32_0 = arith.constant 0 : i32
    return %c0_i32, %arg1 : i32, i32
  }
  func.func @transform_2(%arg0: i32, %arg1: i32) -> (i32, i32) {
    %c0_i32 = arith.constant 0 : i32
    %c0_i32_0 = arith.constant 0 : i32
    %c0_i32_1 = arith.constant 0 : i32
    return %c0_i32, %c0_i32_0 : i32, i32
  }
  func.func @transform_3(%arg0: i32, %arg1: i32) -> (i32, i32) {
    %c0_i32 = arith.constant 0 : i32
    %c0_i32_0 = arith.constant 0 : i32
    %c0_i32_1 = arith.constant 0 : i32
    return %c0_i32, %c0_i32_0 : i32, i32
  }
  func.func @transform_4(%arg0: i32, %arg1: i32) -> (i32, i32) {
    %c0_i32 = arith.constant 0 : i32
    %c0_i32_0 = arith.constant 0 : i32
    return %c0_i32, %arg1 : i32, i32
  }
  func.func @transform_5(%arg0: i32, %arg1: i32) -> (i32, i32) {
    %c0_i32 = arith.constant 0 : i32
    return %arg0, %arg1 : i32, i32
  }
}

module attributes {stable_mosaic.version = 11 : i64} {
  func.func @_mm_kernel(%arg0: i32, %arg1: i32, %arg2: memref<32x512xbf16, #tpu.memory_space<vmem>>, %arg3: memref<512x128xbf16, #tpu.memory_space<vmem>>, %arg4: memref<1x128xf32, #tpu.memory_space<vmem>>, %arg5: memref<32x128xf32, #tpu.memory_space<vmem>>, %arg6: memref<32x128xf32, #tpu.memory_space<vmem>>) attributes {dimension_semantics = [#tpu.dimension_semantics<parallel>, #tpu.dimension_semantics<parallel>], iteration_bounds = array<i64: 1, 1>, scalar_prefetch = 0 : i64, scratch_operands = 0 : i64, tpu.core_type = #tpu.core_type<tc>, window_params = [{transform_indices = @transform_0, window_bounds = array<i64: 32, 512>}, {transform_indices = @transform_1, window_bounds = array<i64: 512, 128>}, {transform_indices = @transform_2, window_bounds = array<i64: 1, 128>}, {transform_indices = @transform_3, window_bounds = array<i64: 32, 128>}, {transform_indices = @transform_4, window_bounds = array<i64: 32, 128>}]} {
    %c0 = arith.constant 0 : index
    %c0_0 = arith.constant 0 : index
    %0 = vector.load %arg2[%c0, %c0_0] : memref<32x512xbf16, #tpu.memory_space<vmem>>, vector<32x512xbf16>
    %c0_1 = arith.constant 0 : index
    %c0_2 = arith.constant 0 : index
    %1 = vector.load %arg3[%c0_1, %c0_2] : memref<512x128xbf16, #tpu.memory_space<vmem>>, vector<512x128xbf16>
    %cst = arith.constant dense<0.000000e+00> : vector<32x128xf32>
    %2 = tpu.matmul %0, %1, %cst {dimension_numbers = #tpu.dot_dimension_numbers<[1], [0], [0], [1], [0, 0, 1, 1], [], []>} : vector<32x512xbf16>, vector<512x128xbf16>, vector<32x128xf32> -> vector<32x128xf32>
    %c0_3 = arith.constant 0 : index
    %c0_4 = arith.constant 0 : index
    %3 = vector.load %arg4[%c0_3, %c0_4] : memref<1x128xf32, #tpu.memory_space<vmem>>, vector<1x128xf32>
    %4 = vector.broadcast %3 : vector<1x128xf32> to vector<32x128xf32>
    %5 = arith.addf %2, %4 : vector<32x128xf32>
    %c0_5 = arith.constant 0 : index
    %c0_6 = arith.constant 0 : index
    %6 = vector.load %arg5[%c0_5, %c0_6] : memref<32x128xf32, #tpu.memory_space<vmem>>, vector<32x128xf32>
    %7 = arith.addf %5, %6 : vector<32x128xf32>
    %c0_7 = arith.constant 0 : index
    %c0_8 = arith.constant 0 : index
    %8 = vector.load %arg6[%c0_7, %c0_8] : memref<32x128xf32, #tpu.memory_space<vmem>>, vector<32x128xf32>
    tpu.vector_store %arg6[%c0_7, %c0_8], %7 {strides = array<i32>} : memref<32x128xf32, #tpu.memory_space<vmem>>, vector<32x128xf32>,
    return
  }
  func.func @transform_0(%arg0: i32, %arg1: i32) -> (i32, i32) {
    %c0_i32 = arith.constant 0 : i32
    %c0_i32_0 = arith.constant 0 : i32
    return %arg0, %c0_i32 : i32, i32
  }
  func.func @transform_1(%arg0: i32, %arg1: i32) -> (i32, i32) {
    %c0_i32 = arith.constant 0 : i32
    %c0_i32_0 = arith.constant 0 : i32
    return %c0_i32, %arg1 : i32, i32
  }
  func.func @transform_2(%arg0: i32, %arg1: i32) -> (i32, i32) {
    %c0_i32 = arith.constant 0 : i32
    %c0_i32_0 = arith.constant 0 : i32
    return %c0_i32, %arg1 : i32, i32
  }
  func.func @transform_3(%arg0: i32, %arg1: i32) -> (i32, i32) {
    %c0_i32 = arith.constant 0 : i32
    return %arg0, %arg1 : i32, i32
  }
  func.func @transform_4(%arg0: i32, %arg1: i32) -> (i32, i32) {
    %c0_i32 = arith.constant 0 : i32
    return %arg0, %arg1 : i32, i32
  }
}

module attributes {stable_mosaic.version = 11 : i64} {
  func.func @_mm_kernel(%arg0: i32, %arg1: i32, %arg2: memref<32x128xbf16, #tpu.memory_space<vmem>>, %arg3: memref<128x128xbf16, #tpu.memory_space<vmem>>, %arg4: memref<1x128xf32, #tpu.memory_space<vmem>>, %arg5: memref<32x128xf32, #tpu.memory_space<vmem>>, %arg6: memref<32x128xf32, #tpu.memory_space<vmem>>) attributes {dimension_semantics = [#tpu.dimension_semantics<parallel>, #tpu.dimension_semantics<parallel>], iteration_bounds = array<i64: 1, 1>, scalar_prefetch = 0 : i64, scratch_operands = 0 : i64, tpu.core_type = #tpu.core_type<tc>, window_params = [{transform_indices = @transform_0, window_bounds = array<i64: 32, 128>}, {transform_indices = @transform_1, window_bounds = array<i64: 128, 128>}, {transform_indices = @transform_2, window_bounds = array<i64: 1, 128>}, {transform_indices = @transform_3, window_bounds = array<i64: 32, 128>}, {transform_indices = @transform_4, window_bounds = array<i64: 32, 128>}]} {
    %c0 = arith.constant 0 : index
    %c0_0 = arith.constant 0 : index
    %0 = vector.load %arg2[%c0, %c0_0] : memref<32x128xbf16, #tpu.memory_space<vmem>>, vector<32x128xbf16>
    %c0_1 = arith.constant 0 : index
    %c0_2 = arith.constant 0 : index
    %1 = vector.load %arg3[%c0_1, %c0_2] : memref<128x128xbf16, #tpu.memory_space<vmem>>, vector<128x128xbf16>
    %cst = arith.constant dense<0.000000e+00> : vector<32x128xf32>
    %2 = tpu.matmul %0, %1, %cst {dimension_numbers = #tpu.dot_dimension_numbers<[1], [0], [0], [1], [0, 0, 1, 1], [], []>} : vector<32x128xbf16>, vector<128x128xbf16>, vector<32x128xf32> -> vector<32x128xf32>
    %c0_3 = arith.constant 0 : index
    %c0_4 = arith.constant 0 : index
    %3 = vector.load %arg4[%c0_3, %c0_4] : memref<1x128xf32, #tpu.memory_space<vmem>>, vector<1x128xf32>
    %4 = vector.broadcast %3 : vector<1x128xf32> to vector<32x128xf32>
    %5 = arith.addf %2, %4 : vector<32x128xf32>
    %c0_5 = arith.constant 0 : index
    %c0_6 = arith.constant 0 : index
    %6 = vector.load %arg5[%c0_5, %c0_6] : memref<32x128xf32, #tpu.memory_space<vmem>>, vector<32x128xf32>
    %7 = arith.addf %5, %6 : vector<32x128xf32>
    %c0_7 = arith.constant 0 : index
    %c0_8 = arith.constant 0 : index
    %8 = vector.load %arg6[%c0_7, %c0_8] : memref<32x128xf32, #tpu.memory_space<vmem>>, vector<32x128xf32>
    tpu.vector_store %arg6[%c0_7, %c0_8], %7 {strides = array<i32>} : memref<32x128xf32, #tpu.memory_space<vmem>>, vector<32x128xf32>,
    return
  }
  func.func @transform_0(%arg0: i32, %arg1: i32) -> (i32, i32) {
    %c0_i32 = arith.constant 0 : i32
    %c0_i32_0 = arith.constant 0 : i32
    return %arg0, %c0_i32 : i32, i32
  }
  func.func @transform_1(%arg0: i32, %arg1: i32) -> (i32, i32) {
    %c0_i32 = arith.constant 0 : i32
    %c0_i32_0 = arith.constant 0 : i32
    return %c0_i32, %arg1 : i32, i32
  }
  func.func @transform_2(%arg0: i32, %arg1: i32) -> (i32, i32) {
    %c0_i32 = arith.constant 0 : i32
    %c0_i32_0 = arith.constant 0 : i32
    return %c0_i32, %arg1 : i32, i32
  }
  func.func @transform_3(%arg0: i32, %arg1: i32) -> (i32, i32) {
    %c0_i32 = arith.constant 0 : i32
    return %arg0, %arg1 : i32, i32
  }
  func.func @transform_4(%arg0: i32, %arg1: i32) -> (i32, i32) {
    %c0_i32 = arith.constant 0 : i32
    return %arg0, %arg1 : i32, i32
  }
}

module attributes {stable_mosaic.version = 11 : i64} {
  func.func @_mm_kernel(%arg0: i32, %arg1: i32, %arg2: memref<2x128xf32, #tpu.memory_space<vmem>>, %arg3: memref<128x64xbf16, #tpu.memory_space<vmem>>, %arg4: memref<1x128xf32, #tpu.memory_space<vmem>>, %arg5: memref<1x128xf32, #tpu.memory_space<vmem>>, %arg6: memref<2x64xf32, #tpu.memory_space<vmem>>) attributes {dimension_semantics = [#tpu.dimension_semantics<parallel>, #tpu.dimension_semantics<parallel>], iteration_bounds = array<i64: 1, 1>, scalar_prefetch = 0 : i64, scratch_operands = 0 : i64, tpu.core_type = #tpu.core_type<tc>, window_params = [{transform_indices = @transform_0, window_bounds = array<i64: 2, 128>}, {transform_indices = @transform_1, window_bounds = array<i64: 128, 64>}, {pipeline_mode = #tpu.pipeline_mode<synchronous>, transform_indices = @transform_2, window_bounds = array<i64: 1, 128>}, {pipeline_mode = #tpu.pipeline_mode<synchronous>, transform_indices = @transform_3, window_bounds = array<i64: 1, 128>}, {transform_indices = @transform_4, window_bounds = array<i64: 2, 64>}]} {
    %c0 = arith.constant 0 : index
    %c0_0 = arith.constant 0 : index
    %0 = vector.load %arg2[%c0, %c0_0] : memref<2x128xf32, #tpu.memory_space<vmem>>, vector<2x128xf32>
    %cst = arith.constant dense<0.000000e+00> : vector<2xf32>
    %1 = vector.multi_reduction <add>, %0, %cst [1] : vector<2x128xf32> to vector<2xf32>
    %2 = vector.shape_cast %1 : vector<2xf32> to vector<2x1xf32>
    %cst_1 = arith.constant 1.280000e+02 : f32
    %3 = vector.broadcast %cst_1 : f32 to vector<2x1xf32>
    %4 = arith.divf %2, %3 : vector<2x1xf32>
    %5 = vector.broadcast %4 : vector<2x1xf32> to vector<2x128xf32>
    %6 = arith.subf %0, %5 : vector<2x128xf32>
    %7 = arith.mulf %6, %6 : vector<2x128xf32>
    %cst_2 = arith.constant dense<0.000000e+00> : vector<2xf32>
    %8 = vector.multi_reduction <add>, %7, %cst_2 [1] : vector<2x128xf32> to vector<2xf32>
    %9 = vector.shape_cast %8 : vector<2xf32> to vector<2x1xf32>
    %cst_3 = arith.constant 1.280000e+02 : f32
    %10 = vector.broadcast %cst_3 : f32 to vector<2x1xf32>
    %11 = arith.divf %9, %10 : vector<2x1xf32>
    %cst_4 = arith.constant 9.99999974E-6 : f32
    %12 = vector.broadcast %cst_4 : f32 to vector<2x1xf32>
    %13 = arith.addf %11, %12 : vector<2x1xf32>
    %14 = math.rsqrt %13 : vector<2x1xf32>
    %15 = vector.broadcast %14 : vector<2x1xf32> to vector<2x128xf32>
    %16 = arith.mulf %6, %15 : vector<2x128xf32>
    %c0_5 = arith.constant 0 : index
    %c0_6 = arith.constant 0 : index
    %17 = vector.load %arg4[%c0_5, %c0_6] : memref<1x128xf32, #tpu.memory_space<vmem>>, vector<1x128xf32>
    %18 = vector.broadcast %17 : vector<1x128xf32> to vector<2x128xf32>
    %19 = arith.mulf %16, %18 : vector<2x128xf32>
    %c0_7 = arith.constant 0 : index
    %c0_8 = arith.constant 0 : index
    %20 = vector.load %arg5[%c0_7, %c0_8] : memref<1x128xf32, #tpu.memory_space<vmem>>, vector<1x128xf32>
    %21 = vector.broadcast %20 : vector<1x128xf32> to vector<2x128xf32>
    %22 = arith.addf %19, %21 : vector<2x128xf32>
    %23 = arith.truncf %22 : vector<2x128xf32> to vector<2x128xbf16>
    %c0_9 = arith.constant 0 : index
    %c0_10 = arith.constant 0 : index
    %24 = vector.load %arg3[%c0_9, %c0_10] : memref<128x64xbf16, #tpu.memory_space<vmem>>, vector<128x64xbf16>
    %cst_11 = arith.constant dense<0.000000e+00> : vector<2x64xf32>
    %25 = tpu.matmul %23, %24, %cst_11 {dimension_numbers = #tpu.dot_dimension_numbers<[1], [0], [0], [1], [0, 0, 1, 1], [], []>} : vector<2x128xbf16>, vector<128x64xbf16>, vector<2x64xf32> -> vector<2x64xf32>
    %c0_12 = arith.constant 0 : index
    %c0_13 = arith.constant 0 : index
    %26 = vector.load %arg6[%c0_12, %c0_13] : memref<2x64xf32, #tpu.memory_space<vmem>>, vector<2x64xf32>
    tpu.vector_store %arg6[%c0_12, %c0_13], %25 {strides = array<i32>} : memref<2x64xf32, #tpu.memory_space<vmem>>, vector<2x64xf32>,
    return
  }
  func.func @transform_0(%arg0: i32, %arg1: i32) -> (i32, i32) {
    %c0_i32 = arith.constant 0 : i32
    %c0_i32_0 = arith.constant 0 : i32
    return %arg0, %c0_i32 : i32, i32
  }
  func.func @transform_1(%arg0: i32, %arg1: i32) -> (i32, i32) {
    %c0_i32 = arith.constant 0 : i32
    %c0_i32_0 = arith.constant 0 : i32
    return %c0_i32, %arg1 : i32, i32
  }
  func.func @transform_2(%arg0: i32, %arg1: i32) -> (i32, i32) {
    %c0_i32 = arith.constant 0 : i32
    %c0_i32_0 = arith.constant 0 : i32
    %c0_i32_1 = arith.constant 0 : i32
    return %c0_i32, %c0_i32_0 : i32, i32
  }
  func.func @transform_3(%arg0: i32, %arg1: i32) -> (i32, i32) {
    %c0_i32 = arith.constant 0 : i32
    %c0_i32_0 = arith.constant 0 : i32
    %c0_i32_1 = arith.constant 0 : i32
    return %c0_i32, %c0_i32_0 : i32, i32
  }
  func.func @transform_4(%arg0: i32, %arg1: i32) -> (i32, i32) {
    %c0_i32 = arith.constant 0 : i32
    return %arg0, %arg1 : i32, i32
  }
}

module attributes {stable_mosaic.version = 11 : i64} {
  func.func @_mm_kernel(%arg0: i32, %arg1: i32, %arg2: memref<32x128xf32, #tpu.memory_space<vmem>>, %arg3: memref<128x256xbf16, #tpu.memory_space<vmem>>, %arg4: memref<1x128xf32, #tpu.memory_space<vmem>>, %arg5: memref<1x128xf32, #tpu.memory_space<vmem>>, %arg6: memref<1x256xf32, #tpu.memory_space<vmem>>, %arg7: memref<32x256xbf16, #tpu.memory_space<vmem>>) attributes {dimension_semantics = [#tpu.dimension_semantics<parallel>, #tpu.dimension_semantics<parallel>], iteration_bounds = array<i64: 1, 2>, scalar_prefetch = 0 : i64, scratch_operands = 0 : i64, tpu.core_type = #tpu.core_type<tc>, window_params = [{transform_indices = @transform_0, window_bounds = array<i64: 32, 128>}, {transform_indices = @transform_1, window_bounds = array<i64: 128, 256>}, {pipeline_mode = #tpu.pipeline_mode<synchronous>, transform_indices = @transform_2, window_bounds = array<i64: 1, 128>}, {pipeline_mode = #tpu.pipeline_mode<synchronous>, transform_indices = @transform_3, window_bounds = array<i64: 1, 128>}, {transform_indices = @transform_4, window_bounds = array<i64: 1, 256>}, {transform_indices = @transform_5, window_bounds = array<i64: 32, 256>}]} {
    %c0 = arith.constant 0 : index
    %c0_0 = arith.constant 0 : index
    %0 = vector.load %arg2[%c0, %c0_0] : memref<32x128xf32, #tpu.memory_space<vmem>>, vector<32x128xf32>
    %cst = arith.constant dense<0.000000e+00> : vector<32xf32>
    %1 = vector.multi_reduction <add>, %0, %cst [1] : vector<32x128xf32> to vector<32xf32>
    %2 = vector.shape_cast %1 : vector<32xf32> to vector<32x1xf32>
    %cst_1 = arith.constant 1.280000e+02 : f32
    %3 = vector.broadcast %cst_1 : f32 to vector<32x1xf32>
    %4 = arith.divf %2, %3 : vector<32x1xf32>
    %5 = vector.broadcast %4 : vector<32x1xf32> to vector<32x128xf32>
    %6 = arith.subf %0, %5 : vector<32x128xf32>
    %7 = arith.mulf %6, %6 : vector<32x128xf32>
    %cst_2 = arith.constant dense<0.000000e+00> : vector<32xf32>
    %8 = vector.multi_reduction <add>, %7, %cst_2 [1] : vector<32x128xf32> to vector<32xf32>
    %9 = vector.shape_cast %8 : vector<32xf32> to vector<32x1xf32>
    %cst_3 = arith.constant 1.280000e+02 : f32
    %10 = vector.broadcast %cst_3 : f32 to vector<32x1xf32>
    %11 = arith.divf %9, %10 : vector<32x1xf32>
    %cst_4 = arith.constant 9.99999974E-6 : f32
    %12 = vector.broadcast %cst_4 : f32 to vector<32x1xf32>
    %13 = arith.addf %11, %12 : vector<32x1xf32>
    %14 = math.rsqrt %13 : vector<32x1xf32>
    %15 = vector.broadcast %14 : vector<32x1xf32> to vector<32x128xf32>
    %16 = arith.mulf %6, %15 : vector<32x128xf32>
    %c0_5 = arith.constant 0 : index
    %c0_6 = arith.constant 0 : index
    %17 = vector.load %arg4[%c0_5, %c0_6] : memref<1x128xf32, #tpu.memory_space<vmem>>, vector<1x128xf32>
    %18 = vector.broadcast %17 : vector<1x128xf32> to vector<32x128xf32>
    %19 = arith.mulf %16, %18 : vector<32x128xf32>
    %c0_7 = arith.constant 0 : index
    %c0_8 = arith.constant 0 : index
    %20 = vector.load %arg5[%c0_7, %c0_8] : memref<1x128xf32, #tpu.memory_space<vmem>>, vector<1x128xf32>
    %21 = vector.broadcast %20 : vector<1x128xf32> to vector<32x128xf32>
    %22 = arith.addf %19, %21 : vector<32x128xf32>
    %23 = arith.truncf %22 : vector<32x128xf32> to vector<32x128xbf16>
    %c0_9 = arith.constant 0 : index
    %c0_10 = arith.constant 0 : index
    %24 = vector.load %arg3[%c0_9, %c0_10] : memref<128x256xbf16, #tpu.memory_space<vmem>>, vector<128x256xbf16>
    %cst_11 = arith.constant dense<0.000000e+00> : vector<32x256xf32>
    %25 = tpu.matmul %23, %24, %cst_11 {dimension_numbers = #tpu.dot_dimension_numbers<[1], [0], [0], [1], [0, 0, 1, 1], [], []>} : vector<32x128xbf16>, vector<128x256xbf16>, vector<32x256xf32> -> vector<32x256xf32>
    %c0_12 = arith.constant 0 : index
    %c0_13 = arith.constant 0 : index
    %26 = vector.load %arg6[%c0_12, %c0_13] : memref<1x256xf32, #tpu.memory_space<vmem>>, vector<1x256xf32>
    %27 = vector.broadcast %26 : vector<1x256xf32> to vector<32x256xf32>
    %28 = arith.addf %25, %27 : vector<32x256xf32>
    %cst_14 = arith.constant -1.702000e+00 : f32
    %29 = vector.broadcast %cst_14 : f32 to vector<32x256xf32>
    %30 = arith.mulf %29, %28 : vector<32x256xf32>
    %31 = math.exp %30 : vector<32x256xf32>
    %cst_15 = arith.constant 1.000000e+00 : f32
    %32 = vector.broadcast %cst_15 : f32 to vector<32x256xf32>
    %33 = arith.addf %32, %31 : vector<32x256xf32>
    %34 = tpu.reciprocal %33 {approx = true} : vector<32x256xf32> -> vector<32x256xf32>
    %35 = arith.mulf %28, %34 : vector<32x256xf32>
    %36 = arith.truncf %35 : vector<32x256xf32> to vector<32x256xbf16>
    %c0_16 = arith.constant 0 : index
    %c0_17 = arith.constant 0 : index
    %37 = vector.load %arg7[%c0_16, %c0_17] : memref<32x256xbf16, #tpu.memory_space<vmem>>, vector<32x256xbf16>
    tpu.vector_store %arg7[%c0_16, %c0_17], %36 {strides = array<i32>} : memref<32x256xbf16, #tpu.memory_space<vmem>>, vector<32x256xbf16>,
    return
  }
  func.func @transform_0(%arg0: i32, %arg1: i32) -> (i32, i32) {
    %c0_i32 = arith.constant 0 : i32
    %c0_i32_0 = arith.constant 0 : i32
    return %arg0, %c0_i32 : i32, i32
  }
  func.func @transform_1(%arg0: i32, %arg1: i32) -> (i32, i32) {
    %c0_i32 = arith.constant 0 : i32
    %c0_i32_0 = arith.constant 0 : i32
    return %c0_i32, %arg1 : i32, i32
  }
  func.func @transform_2(%arg0: i32, %arg1: i32) -> (i32, i32) {
    %c0_i32 = arith.constant 0 : i32
    %c0_i32_0 = arith.constant 0 : i32
    %c0_i32_1 = arith.constant 0 : i32
    return %c0_i32, %c0_i32_0 : i32, i32
  }
  func.func @transform_3(%arg0: i32, %arg1: i32) -> (i32, i32) {
    %c0_i32 = arith.constant 0 : i32
    %c0_i32_0 = arith.constant 0 : i32
    %c0_i32_1 = arith.constant 0 : i32
    return %c0_i32, %c0_i32_0 : i32, i32
  }
  func.func @transform_4(%arg0: i32, %arg1: i32) -> (i32, i32) {
    %c0_i32 = arith.constant 0 : i32
    %c0_i32_0 = arith.constant 0 : i32
    return %c0_i32, %arg1 : i32, i32
  }
  func.func @transform_5(%arg0: i32, %arg1: i32) -> (i32, i32) {
    %c0_i32 = arith.constant 0 : i32
    return %arg0, %arg1 : i32, i32
  }
}

</mosaic_0001>

<bundles_post_ra>
// kernel: text_net_fwd.13
= control target key start
LH: loop header
LB: loop body
LE: loop exit
PB: predicated region body
PF: predicated region fallthrough
CT: control target
= control target key end

     0   :  { %s277_s1 = inlined_call_operand.vmem [shape: bf16[128,128], index: 1, kind: input, shape index: {}]   ;;  %s278_s2 = inlined_call_operand.vmem [shape: f32[1,128], index: 2, kind: input, shape index: {}]   ;;  %s279_s0 = inlined_call_operand.vmem [shape: bf16[32,128], index: 0, kind: input, shape index: {}]   ;;  %s280_s3 = inlined_call_operand.vmem [shape: f32[32,128], index: 3, kind: input, shape index: {}]   ;;  %s281_s4 = inlined_call_operand.vmem [shape: f32[32,128], index: 4, kind: output, shape index: {}]  }
   0x1   :  { %v185_v0 = vld [vmem:[%s277_s1 + $0x38] sm:$0xff]  ;;  %v184_v1 = vld [vmem:[%s277_s1 + $0x30] sm:$0xff]  ;;  %v183_v2 = vld [vmem:[%s277_s1 + $0x28] sm:$0xff] }
   0x2   :  { %101 = vmatpush.bf16.msra.mxu0 %v185_v0  ;;  %186 = vmatpush.bf16.msra.mxu1 %v185_v0  ;;  %v182_v3 = vld [vmem:[%s277_s1 + $0x20] sm:$0xff]  ;;  %v181_v4 = vld [vmem:[%s277_s1 + $0x18] sm:$0xff]  ;;  %v180_v5 = vld [vmem:[%s277_s1 + $0x10] sm:$0xff] }
   0x3   :  { %v179_v6 = vld [vmem:[%s277_s1 + $0x8] sm:$0xff]  ;;  %v178_v7 = vld [vmem:[%s277_s1] sm:$0xff]  ;;  %v122_v14 = vld [vmem:[%s280_s3 + $0x10] sm:$0xff] }
   0x4   :  { %v176_v8 = vld [vmem:[%s279_s0] sm:$0xff]  ;;  %v177_v9 = vld [vmem:[%s279_s0 + $0x8] sm:$0xff]  ;;  %v123_v22 = vld [vmem:[%s280_s3 + $0x18] sm:$0xff] }
   0x5   :  { %v194_v10 = vld [vmem:[%s278_s2] ss:$0 sm:$0xff]  ;;  %v121_v20 = vld [vmem:[%s280_s3 + $0x8] sm:$0xff] }
   0x6   :  { %102 = vmatpush.bf16.msra.mxu0 %v184_v1  ;;  %187 = vmatpush.bf16.msra.mxu1 %v184_v1  ;;  %v120_v12 = vld [vmem:[%s280_s3] sm:$0xff] }
   0xa   :  { %103 = vmatpush.bf16.msra.mxu0 %v183_v2  ;;  %188 = vmatpush.bf16.msra.mxu1 %v183_v2 }
   0xe   :  { %104 = vmatpush.bf16.msra.mxu0 %v182_v3  ;;  %189 = vmatpush.bf16.msra.mxu1 %v182_v3 }
  0x12   :  { %105 = vmatpush.bf16.msra.mxu0 %v181_v4  ;;  %190 = vmatpush.bf16.msra.mxu1 %v181_v4 }
  0x16   :  { %106 = vmatpush.bf16.msra.mxu0 %v180_v5  ;;  %191 = vmatpush.bf16.msra.mxu1 %v180_v5 }
  0x1a   :  { %107 = vmatpush.bf16.msra.mxu0 %v179_v6  ;;  %192 = vmatpush.bf16.msra.mxu1 %v179_v6 }
  0x1e   :  { %108 = vmatpush.bf16.msra.mxu0 %v178_v7  ;;  %193 = vmatpush.bf16.msra.mxu1 %v178_v7 }
  0x21   :  { %109 = vmatmul.bf16.vlgmr.msra.gmra.mxu0 %v176_v8  ;;  %114 = vmatmul.bf16.vlgmr.msra.gmra.mxu1 %v177_v9 }
  0x9e   :  { %v110_v11 = vpop.f32.mrf.mxu0  ;;  %v115_v13 = vpop.f32.mrf.mxu1 }
  0x9f   :  { %v111_v15 = vadd.f32 %v194_v10, %v110_v11  ;;  %v116_v16 = vadd.f32 %v194_v10, %v115_v13 }
  0xa1   :  { %v124_v17 = vadd.f32 %v120_v12, %v111_v15  ;;  %v126_v18 = vadd.f32 %v122_v14, %v116_v16 }
  0xa3   :  { %128 = vst [vmem:[%s281_s4] sm:$0xff] %v124_v17 }
  0xa4   :  { %130 = vst [vmem:[%s281_s4 + $0x10] sm:$0xff] %v126_v18 }
  0xa6   :  { %v112_v19 = vpop.f32.mrf.mxu0  ;;  %v117_v21 = vpop.f32.mrf.mxu1 }
  0xa7   :  { %v113_v23 = vadd.f32 %v194_v10, %v112_v19  ;;  %v118_v24 = vadd.f32 %v194_v10, %v117_v21 }
  0xa9   :  { %v125_v25 = vadd.f32 %v121_v20, %v113_v23  ;;  %v127_v26 = vadd.f32 %v123_v22, %v118_v24 }
  0xab   :  { %129 = vst [vmem:[%s281_s4 + $0x8] sm:$0xff] %v125_v25 }
  0xac   :  { %131 = vst [vmem:[%s281_s4 + $0x18] sm:$0xff] %v127_v26 }

// kernel: text_net_fwd.11
= control target key start
LH: loop header
LB: loop body
LE: loop exit
PB: predicated region body
PF: predicated region fallthrough
CT: control target
= control target key end

     0   :  { %10 = vsyncpa [#allocation3], 0  ;;  %s1076_s0 = inlined_call_operand.vmem [shape: f32[32,128], index: 0, kind: input, shape index: {}]   ;;  %s1077_s1 = inlined_call_operand.hbm [shape: bf16[128,384], index: 1, kind: input, shape index: {}]   ;;  %s1078_s2 = inlined_call_operand.vmem [shape: f32[1,128], index: 2, kind: input, shape index: {}]   ;;  %s1079_s3 = inlined_call_operand.vmem [shape: f32[1,128], index: 3, kind: input, shape index: {}]   ;;  %s1080_s4 = inlined_call_operand.vmem [shape: f32[1,384], index: 4, kind: input, shape index: {}]   ;;  %s1081_s5 = inlined_call_operand.vmem [shape: bf16[32,384], index: 5, kind: output, shape index: {}]  }
   0x1   :  { %12 = vsyncpa [#allocation3 + $0x1], 0  ;;  %s917_s18 = smov 0   ;;  %s919_s19 = smov 0  }
   0x2   :  { %s921_s20 = smov 0   ;;  %s923_s21 = smov 0  }
   0x3   :  { %s925_s22 = smov 0   ;;  %s927_s23 = smov 0  }
   0x4 LB: > { %s656_s24 = sadd.s32 4294967295, %s881_s23   ;;  %s27_s25 = sadd.s32 1, %s877_s22  ;;  %s881_s23 = sphi %s927_s23, %s18_s23   ;;  %s877_s22 = sphi %s925_s22, %s1089_s22   ;;  %s873_s21 = sphi %s923_s21, %s1088_s21   ;;  %s869_s20 = sphi %s921_s20, %s1087_s20   ;;  %s865_s19 = sphi %s919_s19, %s1086_s19   ;;  %s861_s18 = sphi %s917_s18, %s1085_s18  }
   0x5   : > { %p28_p0 = scmp.ge.s32.totalorder %s27_s25, 3  ;;  %s63_s26 = sadd.s32 1, %s869_s20 }
   0x6   : > { %p70_p1 = scmp.ne.s32.totalorder %s869_s20, %s865_s19  ;;  %p71_p2 = scmp.eq.s32.totalorder %s881_s23, 0 }
   0x7   : > { %s1091_s25 = smov (%p28_p0, %s27_s25), 0  ;;  %p76_p4 = scmp.ne.s32.totalorder %s865_s19, %s861_s18 }
   0x8   : > { %p953_p3 = por %p71_p2, %p70_p1  ;;  %s60_s28 = ssub.s32 %s877_s22, %s1091_s25 }
   0x9   : > { %p77_p5 = scmp.eq.s32.totalorder %s656_s24, 0  ;;  %p61_p6 = scmp.eq.s32.totalorder %s60_s28, 0 }
   0xa   : > { %p170_p7 = scmp.eq.s32.totalorder %s656_s24, 2  ;;  %p735_p10 = scmp.lt.s32.totalorder %s881_s23, 3 }
   0xb   : > { %p960_p8 = por %p77_p5, %p76_p4  ;;  %s211_s7 = sand.u32 1, %s869_s20  }
   0xc   : > { %s965_s30 = scalar_select %p61_p6, %s869_s20, %s63_s26  }
   0xd   : > { %p967_p9 = por %p170_p7, %p70_p1  ;;  %s662_s8 = sshll.u32 %s877_s22, 2 }
   0xe   : > { %s661_s9 = sshll.u32 %s211_s7, 6  ;;  %s219_s12 = scalar_lea.hbm %s1077_s1, %s662_s8 }
   0xf   : > { %s220_s13 = sshll.u32 %s219_s12, 4  ;;  %s215_s14 = scalar_lea.vmem [#allocation2], %s661_s9  ;;  %s221_s13 = int_to_ptr.hbm [resolvable:$true] %s220_s13 }
  0x10   : > { %s222_s15 = sshll.u32 %s215_s14, 4  ;;  %p732_p11 = pnand %p735_p10, %p953_p3  ;;  %s223_s15 = int_to_ptr.vmem [resolvable:$true] %s222_s15 }
  0x11   : > { %p663_p12 = scmp.ge.s32.totalorder %s881_s23, 1  ;;  %s212_s16 = scalar_lea.sflag [#allocation3], %s211_s7 }
  0x12   : > { %s883_s17 = smov 192   ;;  %s884_s18 = smov 64  }
  0x13   : > { %s885_s24 = smov 4   ;;  %p236_p13 = scmp.lt.s32.totalorder %s881_s23, 4 }
  0x14   : > { %734 = dma.hbm_to_vmem [thread:$0]  (!%p732_p11), %s221_s13, 1024, %s223_s15, %s212_s16, %s883_s17, %s884_s18, %s885_s24  }
  0x15   : > { %p237_p0 = pnand %p663_p12, %p236_p13 }
  0x16   : > { %s982_s26 = sand.u32 (!%p237_p0), 1, %s865_s19  }
  0x17   : > { %240 = sbr.rel (%p237_p0) target bundleno = 456 (0x1c8), region = 40  ;;  %s664_s28 = sshll.u32 (!%p237_p0), %s982_s26, 6 }
  0x18   : > { %s243_s8 = scalar_lea.sflag (!%p237_p0), [#allocation3], %s982_s26  ;;  %s986_s9 = scalar_lea.vmem (!%p237_p0), [#allocation2], %s664_s28 }
  0x1c   : > { %856 = dma.done.wait (%p960_p8), %s243_s8, 1024  }
  0x1d   : > { %858 = vsyncadd (%p960_p8), %s243_s8, 4294966272  ;;  %v293_v0 = vld [vmem:[%s1076_s0 + $0x10] sm:$0xff]  ;;  %v291_v1 = vld [vmem:[%s1076_s0] sm:$0xff]  ;;  %v886_v4 = vmov 128.0   ;;  %p287_p1 = scmp.lt.s32.totalorder %s873_s21, 2  ;;  %s665_s10 = sshll.u32 %s982_s26, 4 }
  0x1e   : > { %299 = vadd.xlane.f32.xlu1 %v293_v0  ;;  %295 = vadd.xlane.f32.xlu0 %v291_v1  ;;  %v294_v2 = vld [vmem:[%s1076_s0 + $0x18] sm:$0xff]  ;;  %v292_v3 = vld [vmem:[%s1076_s0 + $0x8] sm:$0xff]  ;;  %791 = vrcp.f32 %v886_v4  ;;  %v708_v28 = vld [vmem:[%s986_s9 + $0x30] sm:$0xff]  ;;  %s280_s11 = scalar_lea.vmem [#allocation4], %s665_s10  ;;  %s699_s12 = sshll.u32 (%p967_p9), %s873_s21, 2 }
  0x1f   : > { %s1022_s29 = scalar_select %p287_p1, %s873_s21, 2  ;;  %v709_v27 = vld [vmem:[%s986_s9 + $0x38] sm:$0xff]  ;;  %v707_v29 = vld [vmem:[%s986_s9 + $0x28] sm:$0xff]  ;;  %v706_v30 = vld [vmem:[%s986_s9 + $0x20] sm:$0xff] }
  0x20   : > { %468 = vmatpush.bf16.msra.mxu0 %v709_v27  ;;  %721 = vmatpush.bf16.msra.mxu1 %v709_v27  ;;  %v705_v31 = vld [vmem:[%s986_s9 + $0x18] sm:$0xff]  ;;  %v704_v32 = vld [vmem:[%s986_s9 + $0x10] sm:$0xff]  ;;  %v703_v33 = vld [vmem:[%s986_s9 + $0x8] sm:$0xff]  ;;  %s506_s14 = scalar_lea.vmem (%p967_p9), %s1081_s5, %s699_s12 }
  0x21   : > { %s289_s18 = scalar_lea.vmem %s1080_s4, %s1022_s29  ;;  %v702_v38 = vld [vmem:[%s986_s9] sm:$0xff] }
  0x24   : > { %v792_v5 = vpop.eup %791  ;;  %469 = vmatpush.bf16.msra.mxu0 %v708_v28  ;;  %722 = vmatpush.bf16.msra.mxu1 %v708_v28 }
  0x25   : > { %v304_v6 = vmul.f32 128.0, %v792_v5  ;;  %vm308_vm0 = vweird.f32 %v792_v5 }
  0x26   : > { %301 = vadd.xlane.f32.xlu1 %v294_v2  ;;  %297 = vadd.xlane.f32.xlu0 %v292_v3 }
  0x27   : > { %v305_v7 = vsub.f32 1.0, %v304_v6 }
  0x28   : > { %470 = vmatpush.bf16.msra.mxu0 %v707_v29  ;;  %723 = vmatpush.bf16.msra.mxu1 %v707_v29 }
  0x29   : > { %v306_v8 = vmul.f32 %v792_v5, %v305_v7  ;;  %v788_v7 = vld [vmem:[%s1078_s2] ss:$0 sm:$0xff] }
  0x2b   : > { %v307_v9 = vadd.f32 %v792_v5, %v306_v8 }
  0x2c   : > { %471 = vmatpush.bf16.msra.mxu0 %v706_v30  ;;  %724 = vmatpush.bf16.msra.mxu1 %v706_v30 }
  0x2d   : > { %v309_v10 = vsel %vm308_vm0, %v792_v5, %v307_v9 }
  0x30   : > { %472 = vmatpush.bf16.msra.mxu0 %v705_v31  ;;  %725 = vmatpush.bf16.msra.mxu1 %v705_v31 }
  0x34   : > { %473 = vmatpush.bf16.msra.mxu0 %v704_v32  ;;  %726 = vmatpush.bf16.msra.mxu1 %v704_v32 }
  0x38   : > { %474 = vmatpush.bf16.msra.mxu0 %v703_v33  ;;  %727 = vmatpush.bf16.msra.mxu1 %v703_v33 }
  0x3c   : > { %475 = vmatpush.bf16.msra.mxu0 %v702_v38  ;;  %728 = vmatpush.bf16.msra.mxu1 %v702_v38 }
  0x91   : > { %v300_v11 = vpop.xlane.xlu1 %299  ;;  %v296_v12 = vpop.xlane.xlu0 %295 }
  0x92   : > { %v312_v13 = vmul.f32 %v309_v10, %v300_v11  ;;  %v310_v14 = vmul.f32 %v309_v10, %v296_v12 }
  0x94   : > { %v1004_v15 = vsub.f32 %v293_v0, %v312_v13  ;;  %v1006_v16 = vsub.f32 %v291_v1, %v310_v14  ;;  %v789_v14 = vld [vmem:[%s1079_s3] ss:$0 sm:$0xff] }
  0x96   : > { %v320_v17 = vmul.f32 %v1004_v15, %v1004_v15  ;;  %v318_v18 = vmul.f32 %v1006_v16, %v1006_v16 }
  0x98   : > { %326 = vadd.xlane.f32.xlu0 %v320_v17  ;;  %322 = vadd.xlane.f32.xlu2 %v318_v18 }
  0x99   : > { %v302_v19 = vpop.xlane.xlu1 %301  ;;  %v298_v20 = vpop.xlane.xlu0 %297 }
  0x9a   : > { %v313_v21 = vmul.f32 %v309_v10, %v302_v19  ;;  %v311_v22 = vmul.f32 %v309_v10, %v298_v20 }
  0x9c   : > { %v1012_v23 = vsub.f32 %v294_v2, %v313_v21  ;;  %v1014_v24 = vsub.f32 %v292_v3, %v311_v22 }
  0x9e   : > { %v321_v25 = vmul.f32 %v1012_v23, %v1012_v23  ;;  %v319_v26 = vmul.f32 %v1014_v24, %v1014_v24 }
  0xa0   : > { %328 = vadd.xlane.f32.xlu1 %v321_v25  ;;  %324 = vadd.xlane.f32.xlu2 %v319_v26 }
 0x10b   : > { %v323_v34 = vpop.xlane.xlu2 %322  ;;  %v327_v35 = vpop.xlane.xlu0 %326 }
 0x10c   : > { %v330_v36 = vmul.f32 %v323_v34, %v309_v10  ;;  %v332_v37 = vmul.f32 %v327_v35, %v309_v10 }
 0x10e   : > { %v334_v39 = vadd.f32 1e-05, %v330_v36  ;;  %v336_v40 = vadd.f32 1e-05, %v332_v37 }
 0x110   : > { %793 = vrsqrt.f32 %v334_v39  ;;  %vm364_vm3 = vweird.f32 %v336_v40  ;;  %vm344_vm4 = vweird.f32 %v334_v39 }
 0x111   : > { %795 = vrsqrt.f32 %v336_v40 }
 0x113   : > { %v329_v41 = vpop.xlane.xlu1 %328  ;;  %v325_v42 = vpop.xlane.xlu2 %324 }
 0x114   : > { %v333_v43 = vmul.f32 %v329_v41, %v309_v10  ;;  %v331_v44 = vmul.f32 %v325_v42, %v309_v10 }
 0x116   : > { %v794_v45 = vpop.eup %793  ;;  %v337_v46 = vadd.f32 1e-05, %v333_v43  ;;  %v335_v47 = vadd.f32 1e-05, %v331_v44 }
 0x117   : > { %v796_v48 = vpop.eup %795  ;;  %v339_v49 = vmul.f32 %v794_v45, %v334_v39  ;;  %vm345_vm2 = vweird.f32 %v794_v45 }
 0x118   : > { %v359_v50 = vmul.f32 %v796_v48, %v336_v40  ;;  %797 = vrsqrt.f32 %v337_v46  ;;  %vm365_vm1 = vweird.f32 %v796_v48  ;;  %vm346_vm6 = vmor %vm344_vm4, %vm345_vm2  ;;  %vm374_vm9 = vweird.f32 %v337_v46 }
 0x119   : > { %v340_v51 = vmul.f32 %v794_v45, %v339_v49  ;;  %799 = vrsqrt.f32 %v335_v47  ;;  %vm366_vm5 = vmor %vm364_vm3, %vm365_vm1  ;;  %vm354_vm11 = vweird.f32 %v335_v47 }
 0x11a   : > { %v360_v52 = vmul.f32 %v796_v48, %v359_v50 }
 0x11b   : > { %v341_v53 = vmul.f32 0.5, %v340_v51 }
 0x11c   : > { %v361_v54 = vmul.f32 0.5, %v360_v52 }
 0x11d   : > { %v342_v55 = vsub.f32 1.5, %v341_v53 }
 0x11e   : > { %v798_v56 = vpop.eup %797  ;;  %v362_v57 = vsub.f32 1.5, %v361_v54 }
 0x11f   : > { %v800_v58 = vpop.eup %799  ;;  %v369_v59 = vmul.f32 %v798_v56, %v337_v46  ;;  %v343_v60 = vmul.f32 %v794_v45, %v342_v55  ;;  %vm375_vm7 = vweird.f32 %v798_v56 }
 0x120   : > { %v363_v61 = vmul.f32 %v796_v48, %v362_v57  ;;  %v349_v62 = vmul.f32 %v800_v58, %v335_v47  ;;  %vm355_vm8 = vweird.f32 %v800_v58  ;;  %vm376_vm10 = vmor %vm374_vm9, %vm375_vm7 }
 0x121   : > { %v370_v63 = vmul.f32 %v798_v56, %v369_v59  ;;  %v347_v4 = vsel %vm346_vm6, %v794_v45, %v343_v60  ;;  %vm356_vm12 = vmor %vm354_vm11, %vm355_vm8 }
 0x122   : > { %v350_v0 = vmul.f32 %v800_v58, %v349_v62  ;;  %v367_v2 = vsel %vm366_vm5, %v796_v48, %v363_v61  ;;  %v378_v10 = vmul.f32 %v347_v4, %v1006_v16 }
 0x123   : > { %v371_v1 = vmul.f32 0.5, %v370_v63  ;;  %v380_v8 = vmul.f32 %v367_v2, %v1004_v15 }
 0x124   : > { %v351_v3 = vmul.f32 0.5, %v350_v0  ;;  %v386_v19 = vmul.f32 %v788_v7, %v378_v10 }
 0x125   : > { %v372_v5 = vsub.f32 1.5, %v371_v1  ;;  %v388_v18 = vmul.f32 %v788_v7, %v380_v8 }
 0x126   : > { %v352_v6 = vsub.f32 1.5, %v351_v3  ;;  %v394_v25 = vadd.f32 %v789_v14, %v386_v19 }
 0x127   : > { %v373_v9 = vmul.f32 %v798_v56, %v372_v5  ;;  %v396_v21 = vadd.f32 %v789_v14, %v388_v18 }
 0x128   : > { %v353_v11 = vmul.f32 %v800_v58, %v352_v6 }
 0x129   : > { %v377_v12 = vsel %vm376_vm10, %v798_v56, %v373_v9 }
 0x12a   : > { %v357_v13 = vsel %vm356_vm12, %v800_v58, %v353_v11  ;;  %v381_v17 = vmul.f32 %v377_v12, %v1012_v23  ;;  %v790_v23 = vld [vmem:[%s289_s18] ss:$0 sm:$0xff] }
 0x12b   : > { %v379_v15 = vmul.f32 %v357_v13, %v1014_v24 }
 0x12c   : > { %v389_v20 = vmul.f32 %v788_v7, %v381_v17 }
 0x12d   : > { %v387_v16 = vmul.f32 %v788_v7, %v379_v15 }
 0x12e   : > { %v397_v22 = vadd.f32 %v789_v14, %v389_v20 }
 0x12f   : > { %v395_v26 = vadd.f32 %v789_v14, %v387_v16 }
 0x130   : > { %v399_v27 = vpack.c.bf16 %v397_v22, %v396_v21 }
 0x131   : > { %v398_v28 = vpack.c.bf16 %v395_v26, %v394_v25 }
 0x132   : > { %481 = vmatmul.bf16.vlgmr.msra.gmra.mxu1 %v399_v27 }
 0x133   : > { %476 = vmatmul.bf16.vlgmr.msra.gmra.mxu0 %v398_v28 }
 0x1af   : > { %v482_v29 = vpop.f32.mrf.mxu1 }
 0x1b0   : > { %v477_v30 = vpop.f32.mrf.mxu0  ;;  %v483_v31 = vadd.f32 %v790_v23, %v482_v29 }
 0x1b1   : > { %v478_v34 = vadd.f32 %v790_v23, %v477_v30 }
 0x1b7   : > { %v484_v24 = vpop.f32.mrf.mxu1 }
 0x1b8   : > { %v479_v32 = vpop.f32.mrf.mxu0  ;;  %v485_v33 = vadd.f32 %v790_v23, %v484_v24 }
 0x1b9   : > { %v480_v35 = vadd.f32 %v790_v23, %v479_v32  ;;  %501 = sbr.rel (!%p967_p9) target bundleno = 456 (0x1c8), region = 48 }
 0x1ba   : > { %v718_v36 = vpack.c.bf16 %v485_v33, %v483_v31 }
 0x1bb   : > { %v713_v37 = vpack.c.bf16 %v480_v35, %v478_v34 }
 0x1bc   : > { %720 = vst [vmem:[%s280_s11 + $0x8] sm:$0xff] %v718_v36  }
 0x1bd   : > { %714 = vst [vmem:[%s280_s11] sm:$0xff] %v713_v37  }
 0x1c3   : > { %v527_v40 = vld [vmem:[%s280_s11 + $0x8] sm:$0xf]  ;;  %v529_v41 = vld [vmem:[%s280_s11 + $0xc] sm:$0xf] }
 0x1c4   : > { %v523_v38 = vld [vmem:[%s280_s11] sm:$0xf]  ;;  %v525_v39 = vld [vmem:[%s280_s11 + $0x4] sm:$0xf]  ;;  %528 = vst [vmem:[%s506_s14 + $0x18] sm:$0xf] %v527_v40 }
 0x1c5   : > { %524 = vst [vmem:[%s506_s14] sm:$0xf] %v523_v38 }
 0x1c6   : > { %526 = vst [vmem:[%s506_s14 + $0xc] sm:$0xf] %v525_v39 }
 0x1c7   : > { %530 = vst [vmem:[%s506_s14 + $0x24] sm:$0xf] %v529_v41 }
 0x1c8 PF: > { %s18_s23 = sadd.s32 1, %s881_s23   ;;  %s1085_s18 = smov %s865_s19 }
 0x1c9   : > { %p15_p2 = scmp.ge.s32.totalorder %s18_s23, 5   ;;  %s1086_s19 = smov %s869_s20 }
 0x1ca   : > { %s1087_s20 = smov %s965_s30  ;;  %s1088_s21 = smov %s877_s22 }
 0x1cb   : > { %s1089_s22 = smov %s1091_s25  ;;  %17 = sbr.rel (!%p15_p2) target bundleno = 4 (0x4), region = 127 }
 0x1d0   :  { %572 = vsyncpa [#allocation3], 1 }
 0x1d1   :  { %574 = vsyncpa [#allocation3 + $0x1], 1 }

// kernel: text_net_fwd.14
= control target key start
LH: loop header
LB: loop body
LE: loop exit
PB: predicated region body
PF: predicated region fallthrough
CT: control target
= control target key end

     0   :  { %s1099_s18 = smov 0   ;;  %s1101_s19 = smov 0   ;;  %s1279_s0 = inlined_call_operand.vmem [shape: f32[32,128], index: 0, kind: input, shape index: {}]   ;;  %s1280_s1 = inlined_call_operand.vmem [shape: bf16[128,512], index: 1, kind: input, shape index: {}]   ;;  %s1281_s2 = inlined_call_operand.vmem [shape: f32[1,128], index: 2, kind: input, shape index: {}]   ;;  %s1282_s3 = inlined_call_operand.vmem [shape: f32[1,128], index: 3, kind: input, shape index: {}]   ;;  %s1283_s4 = inlined_call_operand.vmem [shape: f32[1,512], index: 4, kind: input, shape index: {}]   ;;  %s1284_s5 = inlined_call_operand.vmem [shape: bf16[32,512], index: 5, kind: output, shape index: {}]  }
   0x1   :  { %s1103_s20 = smov 0   ;;  %s1105_s21 = smov 0  }
   0x2   :  { %s1107_s22 = smov 0  }
   0x3 LB: > { %s24_s23 = sadd.s32 1, %s1062_s21  ;;  %s828_s24 = sadd.s32 4294967295, %s1066_s22   ;;  %s1066_s22 = sphi %s1107_s22, %s15_s22   ;;  %s1062_s21 = sphi %s1105_s21, %s1289_s21   ;;  %s1058_s20 = sphi %s1103_s20, %s1288_s20   ;;  %s1054_s19 = sphi %s1101_s19, %s1287_s19   ;;  %s1050_s18 = sphi %s1099_s18, %s1286_s18  }
   0x4   : > { %p25_p0 = scmp.ge.s32.totalorder %s24_s23, 2  ;;  %p67_p1 = scmp.ne.s32.totalorder %s1054_s19, %s1050_s18 }
   0x5   : > { %p68_p2 = scmp.eq.s32.totalorder %s1066_s22, 0  ;;  %p167_p4 = scmp.eq.s32.totalorder %s828_s24, 1 }
   0x6   : > { %s1291_s23 = smov (%p25_p0, %s24_s23), 0  ;;  %s60_s26 = sadd.s32 1, %s1054_s19 }
   0x7   : > { %p69_p3 = por %p68_p2, %p67_p1  ;;  %s57_s25 = ssub.s32 %s1062_s21, %s1291_s23 }
   0x8   : > { %p58_p5 = scmp.eq.s32.totalorder %s57_s25, 0  ;;  %p1134_p6 = por %p167_p4, %p67_p1 }
   0x9   : > { %p832_p7 = scmp.ge.s32.totalorder %s1066_s22, 2 }
   0xa   : > { %s1139_s28 = scalar_select %p58_p5, %s1054_s19, %s60_s26  }
   0xb   : > { %204 = sbr.rel (%p832_p7) target bundleno = 36 (0x24), region = 28 }
  0x10   : > { %207 = sbr.rel (!%p69_p3) target bundleno = 36 (0x24), region = 32  ;;  %s209_s29 = sand.u32 (%p69_p3), 1, %s1054_s19  }
  0x11   : > { %s909_s30 = sshll.u32 (%p69_p3), %s1062_s21, 3  ;;  %s833_s6 = sshll.u32 (%p69_p3), %s209_s29, 7 }
  0x12   : > { %s1147_s9 = scalar_lea.vmem (%p69_p3), %s1280_s1, %s909_s30  ;;  %s211_s10 = scalar_lea.vmem (%p69_p3), [#allocation2], %s833_s6 }
  0x13   : > { %v273_v0 = vld [vmem:[%s1147_s9] sm:$0xff] (%p69_p3)  ;;  %v275_v1 = vld [vmem:[%s1147_s9 + $0x10] sm:$0xff] (%p69_p3) }
  0x14   : > { %v277_v2 = vld [vmem:[%s1147_s9 + $0x20] sm:$0xff] (%p69_p3)  ;;  %274 = vst [vmem:[%s211_s10] sm:$0xff] (%p69_p3), %v273_v0  ;;  %v279_v3 = vld [vmem:[%s1147_s9 + $0x30] sm:$0xff] (%p69_p3) }
  0x15   : > { %276 = vst [vmem:[%s211_s10 + $0x8] sm:$0xff] %v275_v1  ;;  %v281_v4 = vld [vmem:[%s1147_s9 + $0x40] sm:$0xff]  ;;  %v283_v5 = vld [vmem:[%s1147_s9 + $0x50] sm:$0xff] }
  0x16   : > { %278 = vst [vmem:[%s211_s10 + $0x10] sm:$0xff] %v277_v2  ;;  %v285_v6 = vld [vmem:[%s1147_s9 + $0x60] sm:$0xff]  ;;  %v287_v7 = vld [vmem:[%s1147_s9 + $0x70] sm:$0xff] }
  0x17   : > { %280 = vst [vmem:[%s211_s10 + $0x18] sm:$0xff] %v279_v3  ;;  %v289_v8 = vld [vmem:[%s1147_s9 + $0x80] sm:$0xff]  ;;  %v291_v9 = vld [vmem:[%s1147_s9 + $0x90] sm:$0xff] }
  0x18   : > { %282 = vst [vmem:[%s211_s10 + $0x20] sm:$0xff] %v281_v4  ;;  %v293_v10 = vld [vmem:[%s1147_s9 + $0xa0] sm:$0xff]  ;;  %v295_v11 = vld [vmem:[%s1147_s9 + $0xb0] sm:$0xff] }
  0x19   : > { %284 = vst [vmem:[%s211_s10 + $0x28] sm:$0xff] %v283_v5  ;;  %v297_v12 = vld [vmem:[%s1147_s9 + $0xc0] sm:$0xff]  ;;  %v299_v13 = vld [vmem:[%s1147_s9 + $0xd0] sm:$0xff] }
  0x1a   : > { %286 = vst [vmem:[%s211_s10 + $0x30] sm:$0xff] %v285_v6  ;;  %v301_v14 = vld [vmem:[%s1147_s9 + $0xe0] sm:$0xff]  ;;  %v303_v15 = vld [vmem:[%s1147_s9 + $0xf0] sm:$0xff] }
  0x1b   : > { %288 = vst [vmem:[%s211_s10 + $0x38] sm:$0xff] %v287_v7 }
  0x1c   : > { %290 = vst [vmem:[%s211_s10 + $0x40] sm:$0xff] %v289_v8 }
  0x1d   : > { %292 = vst [vmem:[%s211_s10 + $0x48] sm:$0xff] %v291_v9 }
  0x1e   : > { %294 = vst [vmem:[%s211_s10 + $0x50] sm:$0xff] %v293_v10 }
  0x1f   : > { %296 = vst [vmem:[%s211_s10 + $0x58] sm:$0xff] %v295_v11 }
  0x20   : > { %298 = vst [vmem:[%s211_s10 + $0x60] sm:$0xff] %v297_v12 }
  0x21   : > { %300 = vst [vmem:[%s211_s10 + $0x68] sm:$0xff] %v299_v13 }
  0x22   : > { %302 = vst [vmem:[%s211_s10 + $0x70] sm:$0xff] %v301_v14 }
  0x23   : > { %304 = vst [vmem:[%s211_s10 + $0x78] sm:$0xff] %v303_v15 }
  0x24 PF: > { %p836_p8 = scmp.ge.s32.totalorder %s1066_s22, 1  ;;  %p317_p9 = scmp.lt.s32.totalorder %s1066_s22, 3 }
  0x26   : > { %p318_p10 = pnand %p836_p8, %p317_p9 }
  0x27   : > { %s324_s25 = sand.u32 (!%p318_p10), 1, %s1050_s18   ;;  %s839_s9 = sshll.u32 (!%p318_p10), %s1058_s20, 1 }
  0x28   : > { %321 = sbr.rel (%p318_p10) target bundleno = 500 (0x1f4), region = 74  ;;  %s837_s26 = sshll.u32 (!%p318_p10), %s324_s25, 7 }
  0x29   : > { %s1204_s29 = scalar_lea.vmem (!%p318_p10), [#allocation2], %s837_s26  ;;  %p367_p11 = scmp.lt.s32.totalorder (!%p318_p10), %s839_s9, 3 }
  0x2a   : > { %s838_s13 = sshll.u32 (!%p318_p10), %s324_s25, 5 }
  0x2b   : > { %s358_s14 = scalar_lea.vmem (!%p318_p10), [#allocation3], %s838_s13 }
  0x2d   : > { %v375_v16 = vld [vmem:[%s1279_s0 + $0x10] sm:$0xff]  ;;  %v373_v17 = vld [vmem:[%s1279_s0] sm:$0xff]  ;;  %v376_v18 = vld [vmem:[%s1279_s0 + $0x18] sm:$0xff]  ;;  %v1068_v20 = vmov 128.0   ;;  %s1293_s9 = smov (!%p367_p11, %s839_s9), 3  ;;  %s926_s18 = sshll.u32 (%p1134_p6), %s1058_s20, 3 }
  0x2e   : > { %381 = vadd.xlane.f32.xlu0 %v375_v16  ;;  %377 = vadd.xlane.f32.xlu1 %v373_v17  ;;  %v374_v19 = vld [vmem:[%s1279_s0 + $0x8] sm:$0xff]  ;;  %986 = vrcp.f32 %v1068_v20  ;;  %v898_v43 = vld [vmem:[%s1204_s29 + $0x70] sm:$0xf]  ;;  %v925_v44 = vld [vmem:[%s1204_s29 + $0x74] sm:$0xf0]  ;;  %s369_s12 = scalar_lea.vmem %s1283_s4, %s1293_s9  ;;  %s690_s17 = scalar_lea.vmem (%p1134_p6), %s1284_s5, %s926_s18 }
  0x2f   : > { %v924_v45 = vld [vmem:[%s1204_s29 + $0x74] sm:$0xf]  ;;  %v899_v46 = vor.u32 %v925_v44, %v898_v43  ;;  %v900_v47 = vld [vmem:[%s1204_s29 + $0x78] sm:$0xf0]  ;;  %v890_v49 = vld [vmem:[%s1204_s29 + $0x60] sm:$0xf] }
  0x30   : > { %v903_v48 = vor.u32 %v924_v45, %v900_v47  ;;  %v923_v50 = vld [vmem:[%s1204_s29 + $0x64] sm:$0xf0]  ;;  %v922_v51 = vld [vmem:[%s1204_s29 + $0x64] sm:$0xf]  ;;  %v892_v53 = vld [vmem:[%s1204_s29 + $0x68] sm:$0xf0] }
  0x31   : > { %584 = vmatpush.bf16.msra.mxu0 %v899_v46  ;;  %927 = vmatpush.bf16.msra.mxu2 %v899_v46  ;;  %v891_v52 = vor.u32 %v923_v50, %v890_v49  ;;  %v895_v54 = vor.u32 %v922_v51, %v892_v53  ;;  %v882_v55 = vld [vmem:[%s1204_s29 + $0x50] sm:$0xf]  ;;  %v921_v56 = vld [vmem:[%s1204_s29 + $0x54] sm:$0xf0]  ;;  %v920_v57 = vld [vmem:[%s1204_s29 + $0x54] sm:$0xf] }
  0x32   : > { %603 = vmatpush.bf16.msra.mxu1 %v903_v48  ;;  %935 = vmatpush.bf16.msra.mxu3 %v903_v48  ;;  %v883_v58 = vor.u32 %v921_v56, %v882_v55  ;;  %v884_v59 = vld [vmem:[%s1204_s29 + $0x58] sm:$0xf0]  ;;  %v874_v61 = vld [vmem:[%s1204_s29 + $0x40] sm:$0xf]  ;;  %v919_v62 = vld [vmem:[%s1204_s29 + $0x44] sm:$0xf0] }
  0x33   : > { %v887_v60 = vor.u32 %v920_v57, %v884_v59  ;;  %v918_v63 = vld [vmem:[%s1204_s29 + $0x44] sm:$0xf]  ;;  %v875_v0 = vor.u32 %v919_v62, %v874_v61  ;;  %v876_v1 = vld [vmem:[%s1204_s29 + $0x48] sm:$0xf0]  ;;  %v866_v3 = vld [vmem:[%s1204_s29 + $0x30] sm:$0xf] }
  0x34   : > { %v987_v21 = vpop.eup %986  ;;  %v879_v2 = vor.u32 %v918_v63, %v876_v1  ;;  %v917_v4 = vld [vmem:[%s1204_s29 + $0x34] sm:$0xf0]  ;;  %v916_v5 = vld [vmem:[%s1204_s29 + $0x34] sm:$0xf]  ;;  %v868_v7 = vld [vmem:[%s1204_s29 + $0x38] sm:$0xf0] }
  0x35   : > { %v386_v22 = vmul.f32 128.0, %v987_v21  ;;  %vm390_vm0 = vweird.f32 %v987_v21  ;;  %585 = vmatpush.bf16.msra.mxu0 %v891_v52  ;;  %928 = vmatpush.bf16.msra.mxu2 %v891_v52  ;;  %v867_v6 = vor.u32 %v917_v4, %v866_v3  ;;  %v871_v8 = vor.u32 %v916_v5, %v868_v7  ;;  %v858_v9 = vld [vmem:[%s1204_s29 + $0x20] sm:$0xf]  ;;  %v915_v10 = vld [vmem:[%s1204_s29 + $0x24] sm:$0xf0] }
  0x36   : > { %383 = vadd.xlane.f32.xlu0 %v376_v18  ;;  %379 = vadd.xlane.f32.xlu1 %v374_v19  ;;  %v914_v11 = vld [vmem:[%s1204_s29 + $0x24] sm:$0xf]  ;;  %v859_v12 = vor.u32 %v915_v10, %v858_v9  ;;  %v860_v13 = vld [vmem:[%s1204_s29 + $0x28] sm:$0xf0]  ;;  %v850_v15 = vld [vmem:[%s1204_s29 + $0x10] sm:$0xf] }
  0x37   : > { %v387_v23 = vsub.f32 1.0, %v386_v22  ;;  %604 = vmatpush.bf16.msra.mxu1 %v895_v54  ;;  %936 = vmatpush.bf16.msra.mxu3 %v895_v54  ;;  %v863_v14 = vor.u32 %v914_v11, %v860_v13  ;;  %v842_v20 = vld [vmem:[%s1204_s29] sm:$0xf] }
  0x38   : > { %v984_v3 = vld [vmem:[%s1281_s2] ss:$0 sm:$0xff] }
  0x39   : > { %v388_v24 = vmul.f32 %v987_v21, %v387_v23  ;;  %586 = vmatpush.bf16.msra.mxu0 %v883_v58  ;;  %929 = vmatpush.bf16.msra.mxu2 %v883_v58  ;;  %v910_v23 = vld [vmem:[%s1204_s29 + $0x4] sm:$0xf]  ;;  %v985_v10 = vld [vmem:[%s1282_s3] ss:$0 sm:$0xff] }
  0x3b   : > { %v389_v25 = vadd.f32 %v987_v21, %v388_v24  ;;  %605 = vmatpush.bf16.msra.mxu1 %v887_v60  ;;  %937 = vmatpush.bf16.msra.mxu3 %v887_v60  ;;  %v844_v24 = vld [vmem:[%s1204_s29 + $0x8] sm:$0xf0] }
  0x3d   : > { %v1179_v26 = vsel %vm390_vm0, %v987_v21, %v389_v25  ;;  %587 = vmatpush.bf16.msra.mxu0 %v875_v0  ;;  %930 = vmatpush.bf16.msra.mxu2 %v875_v0  ;;  %v911_v21 = vld [vmem:[%s1204_s29 + $0x4] sm:$0xf0] }
  0x3f   : > { %606 = vmatpush.bf16.msra.mxu1 %v879_v2  ;;  %938 = vmatpush.bf16.msra.mxu3 %v879_v2 }
  0x41   : > { %588 = vmatpush.bf16.msra.mxu0 %v867_v6  ;;  %931 = vmatpush.bf16.msra.mxu2 %v867_v6 }
  0x43   : > { %607 = vmatpush.bf16.msra.mxu1 %v871_v8  ;;  %939 = vmatpush.bf16.msra.mxu3 %v871_v8 }
  0x45   : > { %589 = vmatpush.bf16.msra.mxu0 %v859_v12  ;;  %932 = vmatpush.bf16.msra.mxu2 %v859_v12 }
  0x47   : > { %608 = vmatpush.bf16.msra.mxu1 %v863_v14  ;;  %940 = vmatpush.bf16.msra.mxu3 %v863_v14 }
  0xa1   : > { %v382_v27 = vpop.xlane.xlu0 %381  ;;  %v378_v28 = vpop.xlane.xlu1 %377 }
  0xa2   : > { %v394_v29 = vmul.f32 %v1179_v26, %v382_v27  ;;  %v392_v30 = vmul.f32 %v1179_v26, %v378_v28 }
  0xa4   : > { %v1183_v31 = vsub.f32 %v373_v17, %v392_v30  ;;  %v1185_v32 = vsub.f32 %v375_v16, %v394_v29  ;;  %v913_v16 = vld [vmem:[%s1204_s29 + $0x14] sm:$0xf0]  ;;  %v912_v17 = vld [vmem:[%s1204_s29 + $0x14] sm:$0xf]  ;;  %v843_v30 = vor.u32 %v911_v21, %v842_v20 }
  0xa6   : > { %v402_v33 = vmul.f32 %v1185_v32, %v1185_v32  ;;  %v400_v34 = vmul.f32 %v1183_v31, %v1183_v31 }
  0xa8   : > { %408 = vadd.xlane.f32.xlu2 %v402_v33  ;;  %404 = vadd.xlane.f32.xlu0 %v400_v34  ;;  %v847_v33 = vor.u32 %v910_v23, %v844_v24 }
  0xa9   : > { %v384_v35 = vpop.xlane.xlu0 %383  ;;  %v380_v36 = vpop.xlane.xlu1 %379 }
  0xaa   : > { %v395_v37 = vmul.f32 %v1179_v26, %v384_v35  ;;  %v393_v38 = vmul.f32 %v1179_v26, %v380_v36 }
  0xac   : > { %v1193_v39 = vsub.f32 %v376_v18, %v395_v37  ;;  %v1195_v40 = vsub.f32 %v374_v19, %v393_v38  ;;  %v851_v18 = vor.u32 %v913_v16, %v850_v15  ;;  %v852_v19 = vld [vmem:[%s1204_s29 + $0x18] sm:$0xf0] }
  0xad   : > { %v855_v22 = vor.u32 %v912_v17, %v852_v19 }
  0xae   : > { %v403_v41 = vmul.f32 %v1193_v39, %v1193_v39  ;;  %v401_v42 = vmul.f32 %v1195_v40, %v1195_v40  ;;  %590 = vmatpush.bf16.msra.mxu0 %v851_v18  ;;  %933 = vmatpush.bf16.msra.mxu2 %v851_v18 }
  0xaf   : > { %609 = vmatpush.bf16.msra.mxu1 %v855_v22  ;;  %941 = vmatpush.bf16.msra.mxu3 %v855_v22 }
  0xb0   : > { %410 = vadd.xlane.f32.xlu2 %v403_v41  ;;  %406 = vadd.xlane.f32.xlu1 %v401_v42 }
  0xb2   : > { %591 = vmatpush.bf16.msra.mxu0 %v843_v30  ;;  %934 = vmatpush.bf16.msra.mxu2 %v843_v30 }
  0xb3   : > { %610 = vmatpush.bf16.msra.mxu1 %v847_v33  ;;  %942 = vmatpush.bf16.msra.mxu3 %v847_v33 }
 0x11b   : > { %v409_v25 = vpop.xlane.xlu2 %408  ;;  %v405_v27 = vpop.xlane.xlu0 %404 }
 0x11c   : > { %v414_v28 = vmul.f32 %v409_v25, %v1179_v26  ;;  %v412_v29 = vmul.f32 %v405_v27, %v1179_v26 }
 0x11e   : > { %v418_v34 = vadd.f32 1e-05, %v414_v28  ;;  %v416_v35 = vadd.f32 1e-05, %v412_v29 }
 0x120   : > { %988 = vrsqrt.f32 %v418_v34  ;;  %vm426_vm2 = vweird.f32 %v416_v35  ;;  %vm446_vm4 = vweird.f32 %v418_v34 }
 0x121   : > { %990 = vrsqrt.f32 %v416_v35 }
 0x123   : > { %v411_v36 = vpop.xlane.xlu2 %410  ;;  %v407_v37 = vpop.xlane.xlu1 %406 }
 0x124   : > { %v415_v38 = vmul.f32 %v411_v36, %v1179_v26  ;;  %v413_v41 = vmul.f32 %v407_v37, %v1179_v26 }
 0x126   : > { %v989_v42 = vpop.eup %988  ;;  %v419_v43 = vadd.f32 1e-05, %v415_v38  ;;  %v417_v44 = vadd.f32 1e-05, %v413_v41 }
 0x127   : > { %v991_v45 = vpop.eup %990  ;;  %v441_v46 = vmul.f32 %v989_v42, %v418_v34  ;;  %vm447_vm1 = vweird.f32 %v989_v42 }
 0x128   : > { %v421_v47 = vmul.f32 %v991_v45, %v416_v35  ;;  %992 = vrsqrt.f32 %v419_v43  ;;  %vm427_vm3 = vweird.f32 %v991_v45  ;;  %vm448_vm5 = vmor %vm446_vm4, %vm447_vm1  ;;  %vm436_vm8 = vweird.f32 %v417_v44 }
 0x129   : > { %v442_v48 = vmul.f32 %v989_v42, %v441_v46  ;;  %994 = vrsqrt.f32 %v417_v44  ;;  %vm428_vm6 = vmor %vm426_vm2, %vm427_vm3  ;;  %vm456_vm10 = vweird.f32 %v419_v43 }
 0x12a   : > { %v422_v49 = vmul.f32 %v991_v45, %v421_v47 }
 0x12b   : > { %v443_v50 = vmul.f32 0.5, %v442_v48 }
 0x12c   : > { %v423_v51 = vmul.f32 0.5, %v422_v49 }
 0x12d   : > { %v444_v52 = vsub.f32 1.5, %v443_v50 }
 0x12e   : > { %v993_v53 = vpop.eup %992  ;;  %v424_v54 = vsub.f32 1.5, %v423_v51 }
 0x12f   : > { %v995_v55 = vpop.eup %994  ;;  %v445_v56 = vmul.f32 %v989_v42, %v444_v52  ;;  %v451_v57 = vmul.f32 %v993_v53, %v419_v43  ;;  %vm457_vm7 = vweird.f32 %v993_v53 }
 0x130   : > { %v425_v26 = vmul.f32 %v991_v45, %v424_v54  ;;  %v431_v58 = vmul.f32 %v995_v55, %v417_v44  ;;  %vm437_vm9 = vweird.f32 %v995_v55  ;;  %vm458_vm11 = vmor %vm456_vm10, %vm457_vm7 }
 0x131   : > { %v452_v59 = vmul.f32 %v993_v53, %v451_v57  ;;  %v449_v62 = vsel %vm448_vm5, %v989_v42, %v445_v56  ;;  %vm438_vm12 = vmor %vm436_vm8, %vm437_vm9 }
 0x132   : > { %v432_v60 = vmul.f32 %v995_v55, %v431_v58  ;;  %v429_v0 = vsel %vm428_vm6, %v991_v45, %v425_v26  ;;  %v462_v4 = vmul.f32 %v449_v62, %v1185_v32 }
 0x133   : > { %v453_v61 = vmul.f32 0.5, %v452_v59  ;;  %v460_v6 = vmul.f32 %v429_v0, %v1183_v31 }
 0x134   : > { %v433_v63 = vmul.f32 0.5, %v432_v60  ;;  %v470_v12 = vmul.f32 %v984_v3, %v462_v4 }
 0x135   : > { %v454_v1 = vsub.f32 1.5, %v453_v61  ;;  %v468_v32 = vmul.f32 %v984_v3, %v460_v6 }
 0x136   : > { %v434_v2 = vsub.f32 1.5, %v433_v63  ;;  %v478_v16 = vadd.f32 %v985_v10, %v470_v12 }
 0x137   : > { %v455_v5 = vmul.f32 %v993_v53, %v454_v1  ;;  %v476_v17 = vadd.f32 %v985_v10, %v468_v32 }
 0x138   : > { %v435_v7 = vmul.f32 %v995_v55, %v434_v2 }
 0x139   : > { %v459_v8 = vsel %vm458_vm11, %v993_v53, %v455_v5 }
 0x13a   : > { %v439_v9 = vsel %vm438_vm12, %v995_v55, %v435_v7  ;;  %v463_v11 = vmul.f32 %v459_v8, %v1193_v39  ;;  %v498_v39 = vld [vmem:[%s369_s12] sm:$0x3] }
 0x13b   : > { %v461_v13 = vmul.f32 %v439_v9, %v1195_v40  ;;  %v500_v40 = vperm.slane %v498_v39, 0  ;;  %v501_v21 = vperm.slane %v498_v39, 1 }
 0x13c   : > { %v471_v14 = vmul.f32 %v984_v3, %v463_v11 }
 0x13d   : > { %v469_v15 = vmul.f32 %v984_v3, %v461_v13 }
 0x13e   : > { %v479_v31 = vadd.f32 %v985_v10, %v471_v14 }
 0x13f   : > { %v477_v18 = vadd.f32 %v985_v10, %v469_v15 }
 0x140   : > { %v481_v19 = vpack.c.bf16 %v479_v31, %v478_v16 }
 0x141   : > { %v480_v20 = vpack.c.bf16 %v477_v18, %v476_v17 }
 0x142   : > { %597 = vmatmul.bf16.vlgmr.msra.gmra.mxu2 %v481_v19  ;;  %616 = vmatmul.bf16.vlgmr.msra.gmra.mxu3 %v481_v19 }
 0x143   : > { %592 = vmatmul.bf16.vlgmr.msra.gmra.mxu0 %v480_v20  ;;  %611 = vmatmul.bf16.vlgmr.msra.gmra.mxu1 %v480_v20 }
 0x1c0   : > { %v593_v22 = vpop.f32.mrf.mxu0  ;;  %v612_v23 = vpop.f32.mrf.mxu1 }
 0x1c1   : > { %v594_v24 = vadd.f32 %v593_v22, %v500_v40  ;;  %v613_v25 = vadd.f32 %v612_v23, %v501_v21 }
 0x1c3   : > { %v622_v27 = vmul.f32 -1.702, %v594_v24  ;;  %v623_v28 = vmul.f32 -1.702, %v613_v25 }
 0x1c5   : > { %v630_v29 = vmul.f32 1.442695, %v622_v27  ;;  %v632_v30 = vmul.f32 1.442695, %v623_v28  ;;  %v598_v33 = vpop.f32.mrf.mxu2  ;;  %v617_v34 = vpop.f32.mrf.mxu3 }
 0x1c6   : > { %v599_v35 = vadd.f32 %v598_v33, %v500_v40  ;;  %v618_v36 = vadd.f32 %v617_v34, %v501_v21 }
 0x1c7   : > { %996 = vpow2.f32 %v630_v29 }
 0x1c8   : > { %998 = vpow2.f32 %v632_v30  ;;  %v626_v37 = vmul.f32 -1.702, %v599_v35  ;;  %v627_v38 = vmul.f32 -1.702, %v618_v36  ;;  %v595_v41 = vpop.f32.mrf.mxu0  ;;  %v614_v42 = vpop.f32.mrf.mxu1 }
 0x1c9   : > { %v596_v43 = vadd.f32 %v595_v41, %v500_v40  ;;  %v615_v44 = vadd.f32 %v614_v42, %v501_v21 }
 0x1ca   : > { %v638_v45 = vmul.f32 1.442695, %v626_v37  ;;  %v640_v46 = vmul.f32 1.442695, %v627_v38 }
 0x1cb   : > { %v624_v47 = vmul.f32 -1.702, %v596_v43  ;;  %v625_v48 = vmul.f32 -1.702, %v615_v44 }
 0x1cc   : > { %1000 = vpow2.f32 %v638_v45 }
 0x1cd   : > { %v997_v49 = vpop.eup %996  ;;  %1002 = vpow2.f32 %v640_v46  ;;  %v634_v50 = vmul.f32 1.442695, %v624_v47  ;;  %v600_v51 = vpop.f32.mrf.mxu2  ;;  %v636_v55 = vmul.f32 1.442695, %v625_v48 }
 0x1ce   : > { %v619_v52 = vpop.f32.mrf.mxu3  ;;  %v999_v53 = vpop.eup %998  ;;  %v646_v54 = vadd.f32 1.0, %v997_v49  ;;  %v601_v56 = vadd.f32 %v600_v51, %v500_v40 }
 0x1cf   : > { %v620_v57 = vadd.f32 %v619_v52, %v501_v21  ;;  %v647_v26 = vadd.f32 1.0, %v999_v53  ;;  %1004 = vpow2.f32 %v634_v50 }
 0x1d0   : > { %1006 = vrcp.f32 %v646_v54  ;;  %v628_v58 = vmul.f32 -1.702, %v601_v56 }
 0x1d1   : > { %v629_v59 = vmul.f32 -1.702, %v620_v57  ;;  %1008 = vrcp.f32 %v647_v26 }
 0x1d2   : > { %v1001_v60 = vpop.eup %1000  ;;  %1010 = vpow2.f32 %v636_v55  ;;  %v642_v61 = vmul.f32 1.442695, %v628_v58 }
 0x1d3   : > { %v1003_v62 = vpop.eup %1002  ;;  %v650_v63 = vadd.f32 1.0, %v1001_v60  ;;  %v644_v0 = vmul.f32 1.442695, %v629_v59 }
 0x1d4   : > { %v651_v1 = vadd.f32 1.0, %v1003_v62  ;;  %1012 = vpow2.f32 %v642_v61 }
 0x1d5   : > { %v1005_v2 = vpop.eup %1004  ;;  %1014 = vrcp.f32 %v650_v63 }
 0x1d6   : > { %v1007_v3 = vpop.eup %1006  ;;  %1016 = vrcp.f32 %v651_v1  ;;  %v648_v4 = vadd.f32 1.0, %v1005_v2 }
 0x1d7   : > { %v1009_v5 = vpop.eup %1008  ;;  %v662_v6 = vmul.f32 %v1007_v3, %v594_v24  ;;  %1018 = vpow2.f32 %v644_v0 }
 0x1d8   : > { %v1011_v7 = vpop.eup %1010  ;;  %v663_v8 = vmul.f32 %v1009_v5, %v613_v25  ;;  %1020 = vrcp.f32 %v648_v4 }
 0x1d9   : > { %v649_v9 = vadd.f32 1.0, %v1011_v7 }
 0x1da   : > { %v1013_v10 = vpop.eup %1012  ;;  %v670_v11 = vpack.c.bf16 %v663_v8, %v662_v6 }
 0x1db   : > { %v1015_v12 = vpop.eup %1014  ;;  %1022 = vrcp.f32 %v649_v9  ;;  %v652_v13 = vadd.f32 1.0, %v1013_v10 }
 0x1dc   : > { %v1017_v32 = vpop.eup %1016  ;;  %674 = vst [vmem:[%s358_s14] sm:$0xff] %v670_v11  ;;  %v666_v14 = vmul.f32 %v1015_v12, %v599_v35 }
 0x1dd   : > { %v1019_v15 = vpop.eup %1018  ;;  %v667_v16 = vmul.f32 %v1017_v32, %v618_v36  ;;  %1024 = vrcp.f32 %v652_v13 }
 0x1de   : > { %v1021_v31 = vpop.eup %1020  ;;  %v653_v17 = vadd.f32 1.0, %v1019_v15 }
 0x1df   : > { %v672_v18 = vpack.c.bf16 %v667_v16, %v666_v14  ;;  %v664_v19 = vmul.f32 %v1021_v31, %v596_v43 }
 0x1e0   : > { %1026 = vrcp.f32 %v653_v17 }
 0x1e1   : > { %v1023_v20 = vpop.eup %1022  ;;  %676 = vst [vmem:[%s358_s14 + $0x10] sm:$0xff] %v672_v18 }
 0x1e2   : > { %v665_v39 = vmul.f32 %v1023_v20, %v615_v44 }
 0x1e3   : > { %v1025_v40 = vpop.eup %1024  ;;  %v725_v27 = vld [vmem:[%s358_s14] sm:$0xff] (%p1134_p6) }
 0x1e4   : > { %v671_v21 = vpack.c.bf16 %v665_v39, %v664_v19  ;;  %v668_v22 = vmul.f32 %v1025_v40, %v601_v56  ;;  %726 = vst [vmem:[%s690_s17] sm:$0xff] (%p1134_p6), %v725_v27 }
 0x1e6   : > { %v1027_v23 = vpop.eup %1026  ;;  %675 = vst [vmem:[%s358_s14 + $0x8] sm:$0xff] %v671_v21 }
 0x1e7   : > { %v669_v24 = vmul.f32 %v1027_v23, %v620_v57  ;;  %684 = sbr.rel (!%p1134_p6) target bundleno = 500 (0x1f4), region = 82 }
 0x1e8   : > { %v729_v29 = vld [vmem:[%s358_s14 + $0x10] sm:$0xff] (%p1134_p6) }
 0x1e9   : > { %v673_v25 = vpack.c.bf16 %v669_v24, %v668_v22  ;;  %730 = vst [vmem:[%s690_s17 + $0x20] sm:$0xff] (%p1134_p6), %v729_v29 }
 0x1eb   : > { %677 = vst [vmem:[%s358_s14 + $0x18] sm:$0xff] %v673_v25 }
 0x1ed   : > { %v727_v28 = vld [vmem:[%s358_s14 + $0x8] sm:$0xff] }
 0x1ee   : > { %728 = vst [vmem:[%s690_s17 + $0x10] sm:$0xff] %v727_v28 }
 0x1f2   : > { %v731_v30 = vld [vmem:[%s358_s14 + $0x18] sm:$0xff] }
 0x1f3   : > { %732 = vst [vmem:[%s690_s17 + $0x30] sm:$0xff] %v731_v30 }
 0x1f4 PF: > { %s15_s22 = sadd.s32 1, %s1066_s22   ;;  %s1286_s18 = smov %s1054_s19 }
 0x1f5   : > { %p12_p12 = scmp.ge.s32.totalorder %s15_s22, 4   ;;  %s1287_s19 = smov %s1139_s28 }
 0x1f6   : > { %s1288_s20 = smov %s1062_s21  ;;  %s1289_s21 = smov %s1291_s23 }
 0x1f7   :  { %14 = sbr.rel (!%p12_p12) target bundleno = 3 (0x3), region = 157 }

// kernel: text_net_fwd.12
= control target key start
LH: loop header
LB: loop body
LE: loop exit
PB: predicated region body
PF: predicated region fallthrough
CT: control target
= control target key end

     0   :  { %vm50_vm0 = vcmask 261120   ;;  %s1077_s26 = smov 96   ;;  %v9_v33 = vlaneseq  ;;  %vm109_vm2 = vcmask 130048   ;;  %s1078_s22 = smov 64   ;;  %vm218_vm4 = vcmask 257024   ;;  %s1517_s0 = inlined_call_operand.vmem [shape: bf16[2,16,384], index: 0, kind: input, shape index: {}]   ;;  %s1518_s1 = inlined_call_operand.vmem [shape: bf16[2,16,128], index: 1, kind: output, shape index: {}]  }
   0x1   :  { %v916_v0 = vld [vmem:[%s1517_s0 + $0x4] sm:$0xf]  ;;  %v994_v1 = vld [vmem:[%s1517_s0 + $0xc] sm:$0xf0]  ;;  %v921_v2 = vld [vmem:[%s1517_s0 + $0x1c] sm:$0xf] }
   0x2   :  { %v917_v3 = vor.u32 %v994_v1, %v916_v0  ;;  %v995_v4 = vld [vmem:[%s1517_s0 + $0x24] sm:$0xf0]  ;;  %v16_v5 = vld [vmem:[%s1517_s0] sm:$0xf]  ;;  %v17_v6 = vld [vmem:[%s1517_s0 + $0xc] sm:$0xf] }
   0x3   :  { %v922_v7 = vor.u32 %v995_v4, %v921_v2  ;;  %v20_v8 = vunpack.c.l.bf16 %v16_v5  ;;  %v21_v9 = vunpack.c.l.bf16 %v17_v6  ;;  %v18_v10 = vld [vmem:[%s1517_s0 + $0x18] sm:$0xf]  ;;  %v19_v11 = vld [vmem:[%s1517_s0 + $0x24] sm:$0xf]  ;;  %v998_v31 = vld [vmem:[%s1517_s0 + $0xc] sm:$0xf0] }
   0x4   :  { %v55_v12 = vsel %vm50_vm0, %v917_v3, 0  ;;  %v22_v13 = vunpack.c.l.bf16 %v18_v10  ;;  %v23_v14 = vunpack.c.l.bf16 %v19_v11  ;;  %v936_v30 = vld [vmem:[%s1517_s0 + $0x4] sm:$0xf]  ;;  %v10_v34 = vshrl.u32 %v9_v33, 7  ;;  %v941_v44 = vld [vmem:[%s1517_s0 + $0x1c] sm:$0xf] }
   0x5   :  { %64 = vmatpush.bf16.xpose.msra.mxu0 %v55_v12  ;;  %v85_v15 = vsel %vm50_vm0, %v922_v7, 0  ;;  %v24_v16 = vmul.f32 0.17675781, %v20_v8  ;;  %v25_v17 = vmul.f32 0.17675781, %v21_v9  ;;  %v937_v32 = vor.u32 %v998_v31, %v936_v30  ;;  %v999_v45 = vld [vmem:[%s1517_s0 + $0x24] sm:$0xf0]  ;;  %s1079_s15 = smov 32  }
   0x6   :  { %94 = vmatpush.bf16.xpose.msra.mxu1 %v85_v15  ;;  %v26_v18 = vmul.f32 0.17675781, %v22_v13  ;;  %v27_v19 = vmul.f32 0.17675781, %v23_v14  ;;  %v13_v35 = vand.u32 127, %v9_v33  ;;  %v11_v42 = vadd.s32 8, %v10_v34  ;;  %v223_v49 = vld [vmem:[%s1517_s0] sm:$0xf] }
   0x7   :  { %v28_v20 = vpack.c.bf16 %v24_v16, %v24_v16  ;;  %v29_v21 = vpack.c.bf16 %v25_v17, %v25_v17  ;;  %259 = vrot.lane.b32.xlu2 %v937_v32, %s1077_s26  ;;  %v942_v47 = vor.u32 %v999_v45, %v941_v44  ;;  %v224_v50 = vld [vmem:[%s1517_s0 + $0xc] sm:$0xf]  ;;  %v956_v53 = vld [vmem:[%s1517_s0 + $0x4] sm:$0xf]  ;;  %v1002_v54 = vld [vmem:[%s1517_s0 + $0xc] sm:$0xf0]  ;;  %v227_v58 = vunpack.c.l.bf16 %v223_v49 }
   0x8   :  { %v30_v22 = vpack.c.bf16 %v26_v18, %v26_v18  ;;  %v31_v23 = vpack.c.bf16 %v27_v19, %v27_v19  ;;  %vm1125_vm1 = vcmp.le.s32.totalorder %v13_v35, %v10_v34  ;;  %vm1147_vm3 = vcmp.le.s32.totalorder %v13_v35, %v11_v42  ;;  %v225_v61 = vld [vmem:[%s1517_s0 + $0x18] sm:$0xf]  ;;  %v226_v62 = vld [vmem:[%s1517_s0 + $0x24] sm:$0xf]  ;;  %v452_v2 = vld [vmem:[%s1517_s0] sm:$0xf] }
   0x9   :  { %v42_v24 = vunpack.c.l.b16 %v28_v20  ;;  %v43_v25 = vunpack.c.l.b16 %v29_v21  ;;  %v228_v59 = vunpack.c.l.bf16 %v224_v50  ;;  %v957_v60 = vor.u32 %v1002_v54, %v956_v53  ;;  %v454_v63 = vld [vmem:[%s1517_s0 + $0x18] sm:$0xf]  ;;  %v453_v3 = vld [vmem:[%s1517_s0 + $0xc] sm:$0xf]  ;;  %v455_v4 = vld [vmem:[%s1517_s0 + $0x24] sm:$0xf] }
   0xa   :  { %v73_v26 = vunpack.c.l.b16 %v30_v22  ;;  %v74_v27 = vunpack.c.l.b16 %v31_v23  ;;  %v231_v0 = vmul.f32 0.17675781, %v227_v58  ;;  %v456_v5 = vunpack.c.l.bf16 %v452_v2  ;;  %v961_v9 = vld [vmem:[%s1517_s0 + $0x1c] sm:$0xf]  ;;  %v1003_v10 = vld [vmem:[%s1517_s0 + $0x24] sm:$0xf0] }
   0xb   :  { %v44_v28 = vpack.c.b16 %v43_v25, %v42_v24  ;;  %v232_v1 = vmul.f32 0.17675781, %v228_v59  ;;  %v457_v6 = vunpack.c.l.bf16 %v453_v3  ;;  %v229_v7 = vunpack.c.l.bf16 %v225_v61  ;;  %v683_v32 = vld [vmem:[%s1517_s0 + $0x18] sm:$0xf]  ;;  %v684_v33 = vld [vmem:[%s1517_s0 + $0x24] sm:$0xf] }
   0xc   :  { %v75_v29 = vpack.c.b16 %v74_v27, %v73_v26  ;;  %v230_v8 = vunpack.c.l.bf16 %v226_v62  ;;  %v458_v11 = vunpack.c.l.bf16 %v454_v63  ;;  %v460_v12 = vmul.f32 0.17675781, %v456_v5  ;;  %v681_v26 = vld [vmem:[%s1517_s0] sm:$0xf]  ;;  %v682_v27 = vld [vmem:[%s1517_s0 + $0xc] sm:$0xf] }
   0xd   :  { %918 = vmatmul.msk.bf16.vlgmr.msra.gmra.mxu0 %vm50_vm0, %v44_v28  ;;  %v461_v13 = vmul.f32 0.17675781, %v457_v6  ;;  %v235_v14 = vpack.c.bf16 %v231_v0, %v231_v0  ;;  %v236_v15 = vpack.c.bf16 %v232_v1, %v232_v1  ;;  %v459_v16 = vunpack.c.l.bf16 %v455_v4  ;;  %v1006_v58 = vld [vmem:[%s1517_s0 + $0xc] sm:$0xf0]  ;;  %v981_v1 = vld [vmem:[%s1517_s0 + $0x1c] sm:$0xf] }
   0xe   :  { %923 = vmatmul.msk.bf16.vlgmr.msra.gmra.mxu1 %vm50_vm0, %v75_v29  ;;  %v962_v17 = vor.u32 %v1003_v10, %v961_v9  ;;  %v464_v18 = vpack.c.bf16 %v460_v12, %v460_v12  ;;  %v233_v20 = vmul.f32 0.17675781, %v229_v7  ;;  %v234_v21 = vmul.f32 0.17675781, %v230_v8  ;;  %v1007_v2 = vld [vmem:[%s1517_s0 + $0x24] sm:$0xf0]  ;;  %v996_v12 = vld [vmem:[%s1517_s0 + $0x10] sm:$0xf0] }
   0xf   :  { %293 = vrot.lane.b32.xlu2 %v942_v47, %s1077_s26  ;;  %v465_v19 = vpack.c.bf16 %v461_v13, %v461_v13  ;;  %v462_v22 = vmul.f32 0.17675781, %v458_v11  ;;  %v249_v23 = vunpack.c.l.b16 %v235_v14  ;;  %v250_v24 = vunpack.c.l.b16 %v236_v15  ;;  %v926_v11 = vld [vmem:[%s1517_s0 + $0x8] sm:$0xf]  ;;  %v931_v13 = vld [vmem:[%s1517_s0 + $0x20] sm:$0xf] }
  0x10   :  { %v463_v25 = vmul.f32 0.17675781, %v459_v16  ;;  %v478_v28 = vunpack.c.l.b16 %v464_v18  ;;  %v237_v30 = vpack.c.bf16 %v233_v20, %v233_v20  ;;  %v238_v31 = vpack.c.bf16 %v234_v21, %v234_v21  ;;  %v997_v16 = vld [vmem:[%s1517_s0 + $0x28] sm:$0xf0] }
  0x11   :  { %v479_v29 = vunpack.c.l.b16 %v465_v19  ;;  %v466_v34 = vpack.c.bf16 %v462_v22, %v462_v22  ;;  %v251_v35 = vpack.c.b16 %v250_v24, %v249_v23  ;;  %v688_v44 = vunpack.c.l.bf16 %v684_v33 }
  0x12   :  { %v283_v45 = vunpack.c.l.b16 %v237_v30  ;;  %v284_v47 = vunpack.c.l.b16 %v238_v31  ;;  %v982_v7 = vor.u32 %v1007_v2, %v981_v1  ;;  %v927_v14 = vor.u32 %v996_v12, %v926_v11  ;;  %v966_v1 = vld [vmem:[%s1517_s0 + $0x8] sm:$0xf]  ;;  %v1004_v2 = vld [vmem:[%s1517_s0 + $0x10] sm:$0xf0] }
  0x13   :  { %v480_v42 = vpack.c.b16 %v479_v29, %v478_v28  ;;  %v692_v54 = vmul.f32 0.17675781, %v688_v44  ;;  %vm447_vm5 = vcmask 519424   ;;  %vm676_vm6 = vcmask 781824  }
  0x14   :  { %171 = vmatpush.bf16.msra.mxu2 %v927_v14  ;;  %vm905_vm7 = vcmask 1044224  }
  0x15   :  { %v696_v0 = vpack.c.bf16 %v692_v54, %v692_v54 }
  0x17   :  { %488 = vrot.lane.b32.xlu2 %v957_v60, %s1078_s22  ;;  %v742_v6 = vunpack.c.l.b16 %v696_v0 }
  0x1f   :  { %522 = vrot.lane.b32.xlu2 %v962_v17, %s1078_s22  ;;  %v932_v17 = vor.u32 %v997_v16, %v931_v13 }
  0x21   :  { %199 = vmatpush.bf16.msra.mxu3 %v932_v17 }
  0x27   :  { %481 = vrot.lane.b32.xlu2 %v480_v42, %s1078_s22 }
  0x61   :  { %v260_v10 = vpop.permute.xlu2 %259 }
  0x62   :  { %v265_v15 = vsel %vm50_vm0, %v260_v10, 0 }
  0x63   :  { %274 = vmatpush.bf16.xpose.msrb.mxu2 %v265_v15 }
  0x69   :  { %v294_v18 = vpop.permute.xlu2 %293 }
  0x6a   :  { %v299_v19 = vsel %vm50_vm0, %v294_v18, 0 }
  0x6b   :  { %308 = vmatpush.bf16.xpose.msrb.mxu3 %v299_v19 }
  0x8a   :  { %v66_v37 = vpop.f32.mrf.mxu0 }
  0x8b   :  { %v1131_v38 = vsel %vm1125_vm1, %v66_v37, -1e+30  ;;  %v96_v39 = vpop.f32.mrf.mxu1  ;;  %v467_v37 = vpack.c.bf16 %v463_v25, %v463_v25 }
  0x8c   :  { %v1135_v40 = vsel %vm1125_vm1, %v96_v39, -1e+30  ;;  %v110_v41 = vsel %vm109_vm2, %v1131_v38, -inf  ;;  %v685_v39 = vunpack.c.l.bf16 %v681_v26  ;;  %v489_v26 = vpop.permute.xlu2 %488 }
  0x8d   :  { %v116_v43 = vsel %vm109_vm2, %v1135_v40, -inf  ;;  %111 = vmax.xlane.f32.xlu0 %v110_v41  ;;  %v686_v41 = vunpack.c.l.bf16 %v682_v27  ;;  %v513_v49 = vunpack.c.l.b16 %v467_v37 }
  0x8e   :  { %117 = vmax.xlane.f32.xlu1 %v116_v43  ;;  %v687_v43 = vunpack.c.l.bf16 %v683_v32  ;;  %v689_v50 = vmul.f32 0.17675781, %v685_v39 }
  0x90   :  { %v691_v53 = vmul.f32 0.17675781, %v687_v43  ;;  %v693_v60 = vpack.c.bf16 %v689_v50, %v689_v50 }
  0x92   :  { %v68_v48 = vpop.f32.mrf.mxu0  ;;  %v695_v63 = vpack.c.bf16 %v691_v53, %v691_v53  ;;  %v707_v3 = vunpack.c.l.b16 %v693_v60  ;;  %v1001_v60 = vld [vmem:[%s1517_s0 + $0x28] sm:$0xf0] }
  0x93   :  { %v1160_v51 = vsel %vm1147_vm3, %v68_v48, -1e+30  ;;  %v98_v52 = vpop.f32.mrf.mxu1  ;;  %v512_v48 = vunpack.c.l.b16 %v466_v34 }
  0x94   :  { %v1170_v55 = vsel %vm1147_vm3, %v98_v52, -1e+30  ;;  %v113_v56 = vsel %vm109_vm2, %v1160_v51, -inf  ;;  %v690_v52 = vmul.f32 0.17675781, %v686_v41  ;;  %v741_v5 = vunpack.c.l.b16 %v695_v63  ;;  %v1000_v63 = vld [vmem:[%s1517_s0 + $0x10] sm:$0xf0] }
  0x95   :  { %v119_v57 = vsel %vm109_vm2, %v1170_v55, -inf  ;;  %114 = vmax.xlane.f32.xlu0 %v113_v56  ;;  %v285_v56 = vpack.c.b16 %v284_v47, %v283_v45  ;;  %v514_v59 = vpack.c.b16 %v513_v49, %v512_v48  ;;  %v494_v47 = vsel %vm50_vm0, %v489_v26, 0 }
  0x96   :  { %120 = vmax.xlane.f32.xlu1 %v119_v57  ;;  %v976_v57 = vld [vmem:[%s1517_s0 + $0x4] sm:$0xf]  ;;  %v694_v61 = vpack.c.bf16 %v690_v52, %v690_v52  ;;  %v743_v9 = vpack.c.b16 %v742_v6, %v741_v5 }
  0x97   :  { %v977_v62 = vor.u32 %v1006_v58, %v976_v57 }
  0x98   :  { %v708_v4 = vunpack.c.l.b16 %v694_v61 }
  0x99   :  { %717 = vrot.lane.b32.xlu2 %v977_v62, %s1079_s15  ;;  %v946_v62 = vld [vmem:[%s1517_s0 + $0x8] sm:$0xf] }
  0x9a   :  { %v709_v8 = vpack.c.b16 %v708_v4, %v707_v3  ;;  %v947_v0 = vor.u32 %v1000_v63, %v946_v62  ;;  %v967_v3 = vor.u32 %v1004_v2, %v966_v1 }
  0xa1   :  { %744 = vrot.lane.b32.xlu2 %v743_v9, %s1079_s15 }
  0xa9   :  { %252 = vrot.lane.b32.xlu0 %v251_v35, %s1077_s26 }
  0xaf   :  { %286 = vrot.lane.b32.xlu1 %v285_v56, %s1077_s26 }
  0xb1   :  { %515 = vrot.lane.b32.xlu0 %v514_v59, %s1078_s22  ;;  %v951_v59 = vld [vmem:[%s1517_s0 + $0x20] sm:$0xf] }
  0xb2   :  { %v952_v61 = vor.u32 %v1001_v60, %v951_v59 }
  0xb4   :  { %399 = vrot.lane.b32.xlu2 %v952_v61, %s1077_s26 }
  0xb7   :  { %751 = vrot.lane.b32.xlu1 %v982_v7, %s1079_s15 }
  0xb9   :  { %710 = vrot.lane.b32.xlu0 %v709_v8, %s1079_s15 }
  0xbc   :  { %598 = vrot.lane.b32.xlu2 %v967_v3, %s1078_s22 }
  0xc1   :  { %369 = vrot.lane.b32.xlu0 %v947_v0, %s1077_s26 }
 0x100   :  { %v112_v20 = vpop.xlane.xlu0 %111 }
 0x101   :  { %v118_v21 = vpop.xlane.xlu1 %117  ;;  %v122_v22 = vsub.f32 %v1131_v38, %v112_v20 }
 0x102   :  { %v124_v23 = vsub.f32 %v1135_v40, %v118_v21  ;;  %v523_v40 = vpop.permute.xlu2 %522 }
 0x103   :  { %v126_v24 = vmul.f32 1.442695, %v122_v22  ;;  %v528_v49 = vsel %vm50_vm0, %v523_v40, 0 }
 0x104   :  { %v130_v25 = vmul.f32 1.442695, %v124_v23 }
 0x105   :  { %1013 = vpow2.f32 %v126_v24 }
 0x106   :  { %1015 = vpow2.f32 %v130_v25 }
 0x108   :  { %v115_v27 = vpop.xlane.xlu0 %114 }
 0x109   :  { %v121_v28 = vpop.xlane.xlu1 %120  ;;  %v123_v29 = vsub.f32 %v1160_v51, %v115_v27 }
 0x10a   :  { %v125_v30 = vsub.f32 %v1170_v55, %v121_v28  ;;  %v482_v50 = vpop.permute.xlu2 %481 }
 0x10b   :  { %v128_v31 = vmul.f32 1.442695, %v123_v29  ;;  %v1252_v33 = vpop.eup %1013 }
 0x10c   :  { %v132_v32 = vmul.f32 1.442695, %v125_v30  ;;  %v1254_v38 = vpop.eup %1015  ;;  %v146_v34 = vpack.c.bf16 %v1252_v33, %v1252_v33  ;;  %v134_v63 = vsel %vm109_vm2, %v1252_v33, 0.0 }
 0x10d   :  { %1017 = vpow2.f32 %v128_v31  ;;  %v148_v51 = vpack.c.bf16 %v1254_v38, %v1254_v38  ;;  %v140_v1 = vsel %vm109_vm2, %v1254_v38, 0.0 }
 0x10e   :  { %1019 = vpow2.f32 %v132_v32  ;;  %v152_v41 = vunpack.c.l.b16 %v146_v34 }
 0x10f   :  { %v180_v43 = vunpack.c.l.b16 %v148_v51 }
 0x112   :  { %v718_v53 = vpop.permute.xlu2 %717 }
 0x113   :  { %v1258_v35 = vpop.eup %1017  ;;  %v723_v56 = vsel %vm50_vm0, %v718_v53, 0 }
 0x114   :  { %v1262_v37 = vpop.eup %1019  ;;  %v147_v55 = vpack.c.bf16 %v1258_v35, %v1258_v35  ;;  %v137_v46 = vsel %vm109_vm2, %v1258_v35, 0.0 }
 0x115   :  { %v149_v39 = vpack.c.bf16 %v1262_v37, %v1262_v37  ;;  %v143_v2 = vsel %vm109_vm2, %v1262_v37, 0.0 }
 0x116   :  { %v153_v42 = vunpack.c.l.b16 %v147_v55 }
 0x117   :  { %v181_v44 = vunpack.c.l.b16 %v149_v39 }
 0x118   :  { %v154_v45 = vpack.c.b16 %v153_v42, %v152_v41 }
 0x119   :  { %v182_v48 = vpack.c.b16 %v181_v44, %v180_v43 }
 0x11a   :  { %928 = vmatmul.msk.bf16.vlgmr.msra.gmra.mxu2 %vm109_vm2, %v154_v45  ;;  %v745_v6 = vpop.permute.xlu2 %744 }
 0x11b   :  { %933 = vmatmul.msk.bf16.vlgmr.msra.gmra.mxu3 %vm109_vm2, %v182_v48  ;;  %503 = vmatpush.bf16.xpose.msra.mxu2 %v494_v47  ;;  %v253_v54 = vpop.permute.xlu0 %252  ;;  %v986_v47 = vld [vmem:[%s1517_s0 + $0x8] sm:$0xf]  ;;  %v1008_v48 = vld [vmem:[%s1517_s0 + $0x10] sm:$0xf0] }
 0x11c   :  { %537 = vmatpush.bf16.xpose.msra.mxu3 %v528_v49  ;;  %v971_v49 = vld [vmem:[%s1517_s0 + $0x20] sm:$0xf] }
 0x121   :  { %v287_v52 = vpop.permute.xlu1 %286 }
 0x123   :  { %v516_v4 = vpop.permute.xlu0 %515 }
 0x129   :  { %v752_v57 = vpop.permute.xlu1 %751 }
 0x12a   :  { %938 = vmatmul.msk.bf16.vlgmr.msrb.gmra.mxu2 %vm50_vm0, %v253_v54  ;;  %v757_v58 = vsel %vm50_vm0, %v752_v57, 0  ;;  %v991_v54 = vld [vmem:[%s1517_s0 + $0x20] sm:$0xf] }
 0x12b   :  { %943 = vmatmul.msk.bf16.vlgmr.msrb.gmra.mxu3 %vm50_vm0, %v287_v52  ;;  %732 = vmatpush.bf16.xpose.msrb.mxu2 %v723_v56  ;;  %v711_v5 = vpop.permute.xlu0 %710  ;;  %v987_v52 = vor.u32 %v1008_v48, %v986_v47  ;;  %v1009_v56 = vld [vmem:[%s1517_s0 + $0x28] sm:$0xf0] }
 0x12c   :  { %766 = vmatpush.bf16.xpose.msrb.mxu3 %v757_v58  ;;  %v992_v57 = vor.u32 %v1009_v56, %v991_v54  ;;  %v400_v58 = vpop.permute.xlu2 %399 }
 0x12d   :  { %412 = vmatpush.bf16.msrb.mxu1 %v400_v58 }
 0x133   :  { %v370_v59 = vpop.permute.xlu0 %369 }
 0x134   :  { %v599_v60 = vpop.permute.xlu2 %598  ;;  %382 = vmatpush.bf16.msrb.mxu0 %v370_v59 }
 0x138   :  { %611 = vmatpush.bf16.msra.mxu0 %v599_v60 }
 0x13a   :  { %958 = vmatmul.msk.bf16.vlgmr.msra.gmra.mxu2 %vm50_vm0, %v482_v50  ;;  %v1005_v50 = vld [vmem:[%s1517_s0 + $0x28] sm:$0xf0] }
 0x13b   :  { %963 = vmatmul.msk.bf16.vlgmr.msra.gmra.mxu3 %vm50_vm0, %v516_v4  ;;  %v972_v53 = vor.u32 %v1005_v50, %v971_v49 }
 0x14a   :  { %978 = vmatmul.msk.bf16.vlgmr.msrb.gmra.mxu2 %vm50_vm0, %v711_v5 }
 0x14b   :  { %983 = vmatmul.msk.bf16.vlgmr.msrb.gmra.mxu3 %vm50_vm0, %v745_v6 }
 0x19d   :  { %v1301_v7 = vpop.f32.mrf.mxu2 }
 0x19e   :  { %v1303_v8 = vpop.f32.mrf.mxu3 }
 0x1a5   :  { %v1305_v9 = vpop.f32.mrf.mxu2 }
 0x1a6   :  { %v1307_v10 = vpop.f32.mrf.mxu3 }
 0x1ad   :  { %v276_v11 = vpop.f32.mrf.mxu2 }
 0x1ae   :  { %v1311_v12 = vsel %vm1125_vm1, %v276_v11, -1e+30  ;;  %v310_v13 = vpop.f32.mrf.mxu3 }
 0x1af   :  { %v1315_v14 = vsel %vm1125_vm1, %v310_v13, -1e+30  ;;  %v319_v15 = vsel %vm109_vm2, %v1311_v12, -inf }
 0x1b0   :  { %v325_v16 = vsel %vm109_vm2, %v1315_v14, -inf  ;;  %320 = vmax.xlane.f32.xlu1 %v319_v15 }
 0x1b1   :  { %326 = vmax.xlane.f32.xlu2 %v325_v16 }
 0x1b5   :  { %v278_v17 = vpop.f32.mrf.mxu2 }
 0x1b6   :  { %v1323_v18 = vsel %vm1147_vm3, %v278_v17, -1e+30  ;;  %v312_v19 = vpop.f32.mrf.mxu3 }
 0x1b7   :  { %v1327_v20 = vsel %vm1147_vm3, %v312_v19, -1e+30  ;;  %v322_v21 = vsel %vm109_vm2, %v1323_v18, -inf }
 0x1b8   :  { %v328_v22 = vsel %vm109_vm2, %v1327_v20, -inf  ;;  %323 = vmax.xlane.f32.xlu0 %v322_v21 }
 0x1b9   :  { %329 = vmax.xlane.f32.xlu1 %v328_v22 }
 0x1bd   :  { %v505_v23 = vpop.f32.mrf.mxu2 }
 0x1be   :  { %v1335_v24 = vsel %vm1125_vm1, %v505_v23, -1e+30  ;;  %v539_v25 = vpop.f32.mrf.mxu3 }
 0x1bf   :  { %v1339_v26 = vsel %vm1125_vm1, %v539_v25, -1e+30  ;;  %v548_v27 = vsel %vm109_vm2, %v1335_v24, -inf }
 0x1c0   :  { %v554_v28 = vsel %vm109_vm2, %v1339_v26, -inf }
 0x1c1   :  { %549 = vmax.xlane.f32.xlu1 %v548_v27  ;;  %555 = vmax.xlane.f32.xlu0 %v554_v28 }
 0x1c5   :  { %v507_v29 = vpop.f32.mrf.mxu2 }
 0x1c6   :  { %v1347_v30 = vsel %vm1147_vm3, %v507_v29, -1e+30  ;;  %v541_v31 = vpop.f32.mrf.mxu3 }
 0x1c7   :  { %v551_v32 = vsel %vm109_vm2, %v1347_v30, -inf  ;;  %v1353_v40 = vsel %vm1147_vm3, %v541_v31, -1e+30 }
 0x1c8   :  { %v557_v43 = vsel %vm109_vm2, %v1353_v40, -inf }
 0x1c9   :  { %552 = vmax.xlane.f32.xlu1 %v551_v32 }
 0x1cd   :  { %v734_v34 = vpop.f32.mrf.mxu2 }
 0x1ce   :  { %v1357_v51 = vsel %vm1125_vm1, %v734_v34, -1e+30  ;;  %v768_v55 = vpop.f32.mrf.mxu3 }
 0x1cf   :  { %v1361_v39 = vsel %vm1125_vm1, %v768_v55, -1e+30  ;;  %v777_v41 = vsel %vm109_vm2, %v1357_v51, -inf }
 0x1d0   :  { %v783_v42 = vsel %vm109_vm2, %v1361_v39, -inf  ;;  %778 = vmax.xlane.f32.xlu2 %v777_v41 }
 0x1d1   :  { %784 = vmax.xlane.f32.xlu0 %v783_v42  ;;  %558 = vmax.xlane.f32.xlu1 %v557_v43 }
 0x1d5   :  { %v736_v61 = vpop.f32.mrf.mxu2 }
 0x1d6   :  { %v770_v44 = vpop.f32.mrf.mxu3  ;;  %v1398_v62 = vsel %vm1147_vm3, %v736_v61, -1e+30 }
 0x1d7   :  { %v1371_v45 = vsel %vm1147_vm3, %v770_v44, -1e+30  ;;  %v780_v0 = vsel %vm109_vm2, %v1398_v62, -inf }
 0x1d8   :  { %v786_v36 = vsel %vm109_vm2, %v1371_v45, -inf }
 0x1d9   :  { %787 = vmax.xlane.f32.xlu0 %v786_v36 }
 0x1e8   :  { %827 = vrot.lane.b32.xlu2 %v987_v52, %s1079_s15 }
 0x1ea   :  { %628 = vrot.lane.b32.xlu1 %v972_v53, %s1078_s22 }
 0x1ed   :  { %857 = vrot.lane.b32.xlu0 %v992_v57, %s1079_s15 }
 0x211   :  { %135 = vadd.xlane.f32.xlu2 %v134_v63 }
 0x214   :  { %781 = vmax.xlane.f32.xlu1 %v780_v0 }
 0x217   :  { %141 = vadd.xlane.f32.xlu0 %v140_v1 }
 0x219   :  { %144 = vadd.xlane.f32.xlu2 %v143_v2 }
 0x21c   :  { %138 = vadd.xlane.f32.xlu1 %v137_v46 }
 0x223   :  { %v321_v3 = vpop.xlane.xlu1 %320 }
 0x224   :  { %v327_v4 = vpop.xlane.xlu2 %326  ;;  %v331_v33 = vsub.f32 %v1311_v12, %v321_v3 }
 0x225   :  { %v333_v5 = vsub.f32 %v1315_v14, %v327_v4 }
 0x226   :  { %v335_v6 = vmul.f32 1.442695, %v331_v33 }
 0x227   :  { %v339_v11 = vmul.f32 1.442695, %v333_v5 }
 0x228   :  { %1021 = vpow2.f32 %v335_v6 }
 0x229   :  { %1023 = vpow2.f32 %v339_v11 }
 0x22b   :  { %v324_v38 = vpop.xlane.xlu0 %323 }
 0x22c   :  { %v330_v13 = vpop.xlane.xlu1 %329  ;;  %v332_v15 = vsub.f32 %v1323_v18, %v324_v38 }
 0x22d   :  { %v334_v37 = vsub.f32 %v1327_v20, %v330_v13 }
 0x22e   :  { %v1022_v16 = vpop.eup %1021  ;;  %v337_v17 = vmul.f32 1.442695, %v332_v15 }
 0x22f   :  { %v1024_v35 = vpop.eup %1023  ;;  %v341_v19 = vmul.f32 1.442695, %v334_v37  ;;  %v343_v21 = vsel %vm109_vm2, %v1022_v16, 0.0  ;;  %v355_v23 = vpack.c.bf16 %v1022_v16, %v1022_v16 }
 0x230   :  { %1025 = vpow2.f32 %v337_v17  ;;  %v349_v12 = vsel %vm109_vm2, %v1024_v35, 0.0  ;;  %344 = vadd.xlane.f32.xlu1 %v343_v21  ;;  %v357_v27 = vpack.c.bf16 %v1024_v35, %v1024_v35 }
 0x231   :  { %1027 = vpow2.f32 %v341_v19  ;;  %350 = vadd.xlane.f32.xlu2 %v349_v12  ;;  %v361_v41 = vunpack.c.l.b16 %v355_v23 }
 0x232   :  { %v391_v43 = vunpack.c.l.b16 %v357_v27 }
 0x234   :  { %v550_v14 = vpop.xlane.xlu1 %549  ;;  %v556_v22 = vpop.xlane.xlu0 %555 }
 0x235   :  { %v560_v25 = vsub.f32 %v1335_v24, %v550_v14  ;;  %v562_v31 = vsub.f32 %v1339_v26, %v556_v22 }
 0x236   :  { %v1026_v18 = vpop.eup %1025 }
 0x237   :  { %v1028_v20 = vpop.eup %1027  ;;  %v356_v28 = vpack.c.bf16 %v1026_v18, %v1026_v18  ;;  %v564_v29 = vmul.f32 1.442695, %v560_v25  ;;  %v346_v32 = vsel %vm109_vm2, %v1026_v18, 0.0  ;;  %v568_v24 = vmul.f32 1.442695, %v562_v31 }
 0x238   :  { %v358_v34 = vpack.c.bf16 %v1028_v20, %v1028_v20  ;;  %v352_v55 = vsel %vm109_vm2, %v1028_v20, 0.0  ;;  %347 = vadd.xlane.f32.xlu0 %v346_v32 }
 0x239   :  { %v362_v42 = vunpack.c.l.b16 %v356_v28  ;;  %1029 = vpow2.f32 %v564_v29  ;;  %353 = vadd.xlane.f32.xlu1 %v352_v55 }
 0x23a   :  { %v392_v44 = vunpack.c.l.b16 %v358_v34  ;;  %1031 = vpow2.f32 %v568_v24 }
 0x23b   :  { %v363_v36 = vpack.c.b16 %v362_v42, %v361_v41 }
 0x23c   :  { %v553_v47 = vpop.xlane.xlu1 %552  ;;  %v393_v48 = vpack.c.b16 %v392_v44, %v391_v43 }
 0x23d   :  { %v561_v49 = vsub.f32 %v1347_v30, %v553_v47  ;;  %948 = vmatmul.msk.bf16.vlgmr.msrb.gmra.mxu0 %vm109_vm2, %v363_v36 }
 0x23e   :  { %953 = vmatmul.msk.bf16.vlgmr.msrb.gmra.mxu1 %vm109_vm2, %v393_v48 }
 0x23f   :  { %v1030_v26 = vpop.eup %1029  ;;  %v566_v50 = vmul.f32 1.442695, %v561_v49 }
 0x240   :  { %v572_v52 = vsel %vm109_vm2, %v1030_v26, 0.0  ;;  %v1032_v58 = vpop.eup %1031  ;;  %v584_v30 = vpack.c.bf16 %v1030_v26, %v1030_v26 }
 0x241   :  { %1033 = vpow2.f32 %v566_v50  ;;  %573 = vadd.xlane.f32.xlu1 %v572_v52  ;;  %v578_v0 = vsel %vm109_vm2, %v1032_v58, 0.0  ;;  %v586_v16 = vpack.c.bf16 %v1032_v58, %v1032_v58 }
 0x242   :  { %v590_v2 = vunpack.c.l.b16 %v584_v30 }
 0x243   :  { %v779_v53 = vpop.xlane.xlu2 %778  ;;  %v620_v19 = vunpack.c.l.b16 %v586_v16 }
 0x244   :  { %v559_v54 = vpop.xlane.xlu1 %558  ;;  %v789_v56 = vsub.f32 %v1357_v51, %v779_v53  ;;  %v785_v57 = vpop.xlane.xlu0 %784 }
 0x245   :  { %v563_v59 = vsub.f32 %v1353_v40, %v559_v54  ;;  %v791_v40 = vsub.f32 %v1361_v39, %v785_v57 }
 0x246   :  { %v793_v60 = vmul.f32 1.442695, %v789_v56 }
 0x247   :  { %v1034_v61 = vpop.eup %1033  ;;  %v570_v1 = vmul.f32 1.442695, %v563_v59  ;;  %v797_v15 = vmul.f32 1.442695, %v791_v40 }
 0x248   :  { %v585_v63 = vpack.c.bf16 %v1034_v61, %v1034_v61  ;;  %1035 = vpow2.f32 %v793_v60  ;;  %v575_v11 = vsel %vm109_vm2, %v1034_v61, 0.0 }
 0x249   :  { %579 = vadd.xlane.f32.xlu1 %v578_v0  ;;  %1037 = vpow2.f32 %v570_v1 }
 0x24a   :  { %v591_v46 = vunpack.c.l.b16 %v585_v63 }
 0x24b   :  { %v828_v38 = vpop.permute.xlu2 %827 }
 0x24c   :  { %v592_v3 = vpack.c.b16 %v591_v46, %v590_v2  ;;  %v788_v4 = vpop.xlane.xlu0 %787  ;;  %840 = vmatpush.bf16.msrb.mxu0 %v828_v38 }
 0x24d   :  { %v792_v51 = vsub.f32 %v1371_v45, %v788_v4 }
 0x24e   :  { %v1428_v33 = vpop.eup %1035  ;;  %968 = vmatmul.msk.bf16.vlgmr.msra.gmra.mxu0 %vm109_vm2, %v592_v3 }
 0x24f   :  { %v799_v5 = vmul.f32 1.442695, %v792_v51  ;;  %v801_v6 = vsel %vm109_vm2, %v1428_v33, 0.0  ;;  %v1038_v13 = vpop.eup %1037 }
 0x250   :  { %802 = vadd.xlane.f32.xlu0 %v801_v6  ;;  %v587_v45 = vpack.c.bf16 %v1038_v13, %v1038_v13  ;;  %v581_v17 = vsel %vm109_vm2, %v1038_v13, 0.0 }
 0x251   :  { %1039 = vpow2.f32 %v799_v5  ;;  %576 = vadd.xlane.f32.xlu1 %v575_v11 }
 0x252   :  { %1041 = vpow2.f32 %v797_v15  ;;  %v621_v35 = vunpack.c.l.b16 %v587_v45 }
 0x254   :  { %v622_v14 = vpack.c.b16 %v621_v35, %v620_v19 }
 0x257   :  { %v1040_v37 = vpop.eup %1039 }
 0x258   :  { %v810_v39 = vsel %vm109_vm2, %v1040_v37, 0.0  ;;  %v1042_v12 = vpop.eup %1041  ;;  %v816_v25 = vpack.c.bf16 %v1040_v37, %v1040_v37 }
 0x259   :  { %582 = vadd.xlane.f32.xlu1 %v581_v17  ;;  %811 = vadd.xlane.f32.xlu0 %v810_v39  ;;  %v807_v23 = vsel %vm109_vm2, %v1042_v12, 0.0  ;;  %v815_v18 = vpack.c.bf16 %v1042_v12, %v1042_v12 }
 0x25a   :  { %v850_v27 = vunpack.c.l.b16 %v816_v25 }
 0x25b   :  { %v849_v20 = vunpack.c.l.b16 %v815_v18 }
 0x25c   :  { %v629_v21 = vpop.permute.xlu1 %628 }
 0x25d   :  { %641 = vmatpush.bf16.msra.mxu1 %v629_v21  ;;  %v851_v28 = vpack.c.b16 %v850_v27, %v849_v20 }
 0x25f   :  { %v858_v22 = vpop.permute.xlu0 %857 }
 0x260   :  { %973 = vmatmul.msk.bf16.vlgmr.msra.gmra.mxu1 %vm109_vm2, %v622_v14 }
 0x261   :  { %808 = vadd.xlane.f32.xlu1 %v807_v23  ;;  %870 = vmatpush.bf16.msrb.mxu1 %v858_v22 }
 0x270   :  { %993 = vmatmul.msk.bf16.vlgmr.msrb.gmra.mxu1 %vm109_vm2, %v851_v28 }
 0x284   :  { %v136_v29 = vpop.xlane.xlu2 %135 }
 0x285   :  { %1043 = vrcp.f32 %v136_v29 }
 0x287   :  { %v782_v31 = vpop.xlane.xlu1 %781 }
 0x288   :  { %v790_v32 = vsub.f32 %v1398_v62, %v782_v31  ;;  %v813_v62 = vpack.c.bf16 %v1428_v33, %v1428_v33 }
 0x28a   :  { %v795_v34 = vmul.f32 1.442695, %v790_v32  ;;  %v142_v55 = vpop.xlane.xlu0 %141  ;;  %v819_v53 = vunpack.c.l.b16 %v813_v62 }
 0x28b   :  { %v1044_v41 = vpop.eup %1043  ;;  %1045 = vrcp.f32 %v142_v55 }
 0x28c   :  { %v210_v42 = vmul.f32 %v1044_v41, %v1301_v7  ;;  %1047 = vpow2.f32 %v795_v34  ;;  %v145_v43 = vpop.xlane.xlu2 %144 }
 0x28d   :  { %1049 = vrcp.f32 %v145_v43 }
 0x28e   :  { %v214_v44 = vpack.c.bf16 %v210_v42, %v210_v42 }
 0x28f   :  { %v139_v24 = vpop.xlane.xlu1 %138 }
 0x290   :  { %1051 = vrcp.f32 %v139_v24  ;;  %219 = vst.msk [vmem:[%s1518_s1] sm:$0xf] %vm218_vm4, %v214_v44 }
 0x291   :  { %v1046_v36 = vpop.eup %1045 }
 0x292   :  { %v1048_v47 = vpop.eup %1047  ;;  %v212_v48 = vmul.f32 %v1046_v36, %v1303_v8 }
 0x293   :  { %v1050_v7 = vpop.eup %1049  ;;  %v814_v49 = vpack.c.bf16 %v1048_v47, %v1048_v47  ;;  %v804_v26 = vsel %vm109_vm2, %v1048_v47, 0.0 }
 0x294   :  { %v216_v50 = vpack.c.bf16 %v212_v48, %v212_v48  ;;  %v213_v52 = vmul.f32 %v1050_v7, %v1307_v10  ;;  %805 = vadd.xlane.f32.xlu2 %v804_v26 }
 0x295   :  { %v820_v54 = vunpack.c.l.b16 %v814_v49 }
 0x296   :  { %v1052_v56 = vpop.eup %1051  ;;  %v217_v57 = vpack.c.bf16 %v213_v52, %v213_v52  ;;  %221 = vst.msk [vmem:[%s1518_s1 + $0x8] sm:$0xf] %vm218_vm4, %v216_v50 }
 0x297   :  { %v821_v58 = vpack.c.b16 %v820_v54, %v819_v53  ;;  %v211_v8 = vmul.f32 %v1052_v56, %v1305_v9 }
 0x298   :  { %222 = vst.msk [vmem:[%s1518_s1 + $0xc] sm:$0xf] %vm218_vm4, %v217_v57 }
 0x299   :  { %v215_v59 = vpack.c.bf16 %v211_v8, %v211_v8  ;;  %988 = vmatmul.msk.bf16.vlgmr.msrb.gmra.mxu0 %vm109_vm2, %v821_v58 }
 0x29b   :  { %220 = vst.msk [vmem:[%s1518_s1 + $0x4] sm:$0xf] %vm218_vm4, %v215_v59 }
 0x2a3   :  { %v345_v10 = vpop.xlane.xlu1 %344 }
 0x2a4   :  { %v351_v60 = vpop.xlane.xlu2 %350  ;;  %1053 = vrcp.f32 %v345_v10 }
 0x2a5   :  { %1055 = vrcp.f32 %v351_v60 }
 0x2aa   :  { %v1054_v63 = vpop.eup %1053 }
 0x2ab   :  { %v348_v9 = vpop.xlane.xlu0 %347  ;;  %v1056_v1 = vpop.eup %1055 }
 0x2ac   :  { %v354_v30 = vpop.xlane.xlu1 %353  ;;  %1057 = vrcp.f32 %v348_v9 }
 0x2ad   :  { %1059 = vrcp.f32 %v354_v30 }
 0x2b2   :  { %v1058_v40 = vpop.eup %1057 }
 0x2b3   :  { %v1060_v13 = vpop.eup %1059 }
 0x2b4   :  { %v574_v61 = vpop.xlane.xlu1 %573 }
 0x2b5   :  { %1061 = vrcp.f32 %v574_v61 }
 0x2ba   :  { %v384_v0 = vpop.f32.mrf.mxu0 }
 0x2bb   :  { %v423_v2 = vmul.f32 %v1054_v63, %v384_v0  ;;  %v414_v46 = vpop.f32.mrf.mxu1  ;;  %v1062_v37 = vpop.eup %1061 }
 0x2bc   :  { %v425_v3 = vmul.f32 %v1056_v1, %v414_v46  ;;  %v580_v33 = vpop.xlane.xlu1 %579 }
 0x2bd   :  { %v427_v4 = vpack.c.bf16 %v423_v2, %v423_v2 }
 0x2be   :  { %v429_v51 = vpack.c.bf16 %v425_v3, %v425_v3 }
 0x2bf   :  { %435 = vrot.lane.b32.xlu1 %v427_v4, %s1079_s15 }
 0x2c0   :  { %439 = vrot.lane.b32.xlu2 %v429_v51, %s1079_s15 }
 0x2c2   :  { %v386_v5 = vpop.f32.mrf.mxu0 }
 0x2c3   :  { %v424_v6 = vmul.f32 %v1058_v40, %v386_v5  ;;  %v416_v38 = vpop.f32.mrf.mxu1  ;;  %v803_v43 = vpop.xlane.xlu0 %802 }
 0x2c4   :  { %v426_v15 = vmul.f32 %v1060_v13, %v416_v38  ;;  %v577_v45 = vpop.xlane.xlu1 %576 }
 0x2c5   :  { %v428_v11 = vpack.c.bf16 %v424_v6, %v424_v6  ;;  %1063 = vrcp.f32 %v577_v45 }
 0x2c6   :  { %v430_v39 = vpack.c.bf16 %v426_v15, %v426_v15  ;;  %1065 = vrcp.f32 %v580_v33 }
 0x2c7   :  { %437 = vrot.lane.b32.xlu0 %v428_v11, %s1079_s15 }
 0x2cb   :  { %v613_v16 = vpop.f32.mrf.mxu0  ;;  %v1064_v19 = vpop.eup %1063 }
 0x2cc   :  { %v652_v17 = vmul.f32 %v1062_v37, %v613_v16  ;;  %v583_v22 = vpop.xlane.xlu1 %582  ;;  %v1066_v23 = vpop.eup %1065 }
 0x2cd   :  { %1067 = vrcp.f32 %v583_v22  ;;  %v812_v24 = vpop.xlane.xlu0 %811 }
 0x2ce   :  { %v656_v35 = vpack.c.bf16 %v652_v17, %v652_v17 }
 0x2cf   :  { %441 = vrot.lane.b32.xlu0 %v430_v39, %s1079_s15 }
 0x2d0   :  { %664 = vrot.lane.b32.xlu1 %v656_v35, %s1078_s22 }
 0x2d3   :  { %v615_v21 = vpop.f32.mrf.mxu0  ;;  %v1068_v28 = vpop.eup %1067 }
 0x2d4   :  { %v653_v12 = vmul.f32 %v1064_v19, %v615_v21  ;;  %v809_v20 = vpop.xlane.xlu1 %808 }
 0x2d5   :  { %1069 = vrcp.f32 %v809_v20 }
 0x2d6   :  { %v657_v14 = vpack.c.bf16 %v653_v12, %v653_v12  ;;  %1071 = vrcp.f32 %v803_v43 }
 0x2d7   :  { %1073 = vrcp.f32 %v812_v24 }
 0x2d8   :  { %666 = vrot.lane.b32.xlu2 %v657_v14, %s1078_s22 }
 0x2db   :  { %v1070_v34 = vpop.eup %1069 }
 0x2dc   :  { %v1072_v36 = vpop.eup %1071 }
 0x2dd   :  { %v643_v25 = vpop.f32.mrf.mxu1  ;;  %v1074_v26 = vpop.eup %1073 }
 0x2de   :  { %v654_v18 = vmul.f32 %v1066_v23, %v643_v25 }
 0x2e0   :  { %v658_v27 = vpack.c.bf16 %v654_v18, %v654_v18 }
 0x2e2   :  { %668 = vrot.lane.b32.xlu0 %v658_v27, %s1078_s22 }
 0x2e5   :  { %v645_v29 = vpop.f32.mrf.mxu1 }
 0x2e6   :  { %v655_v31 = vmul.f32 %v1068_v28, %v645_v29 }
 0x2e8   :  { %v659_v32 = vpack.c.bf16 %v655_v31, %v655_v31 }
 0x2ea   :  { %670 = vrot.lane.b32.xlu1 %v659_v32, %s1078_s22 }
 0x2ed   :  { %v872_v55 = vpop.f32.mrf.mxu1 }
 0x2ee   :  { %v883_v41 = vmul.f32 %v1070_v34, %v872_v55 }
 0x2f0   :  { %v887_v42 = vpack.c.bf16 %v883_v41, %v883_v41 }
 0x2f2   :  { %897 = vrot.lane.b32.xlu1 %v887_v42, %s1077_s26 }
 0x2f5   :  { %v874_v7 = vpop.f32.mrf.mxu1 }
 0x2f6   :  { %v884_v50 = vmul.f32 %v1074_v26, %v874_v7 }
 0x2f8   :  { %v888_v56 = vpack.c.bf16 %v884_v50, %v884_v50 }
 0x307   :  { %v806_v44 = vpop.xlane.xlu2 %805 }
 0x308   :  { %1075 = vrcp.f32 %v806_v44 }
 0x30e   :  { %v1076_v52 = vpop.eup %1075 }
 0x316   :  { %v842_v62 = vpop.f32.mrf.mxu0 }
 0x317   :  { %v881_v47 = vmul.f32 %v1072_v36, %v842_v62 }
 0x319   :  { %v885_v48 = vpack.c.bf16 %v881_v47, %v881_v47 }
 0x31a   :  { %v440_v49 = vpop.permute.xlu2 %439 }
 0x31b   :  { %450 = vst.msk [vmem:[%s1518_s1 + $0x8] sm:$0xf] %vm447_vm5, %v440_v49  ;;  %893 = vrot.lane.b32.xlu2 %v885_v48, %s1077_s26 }
 0x31e   :  { %v844_v53 = vpop.f32.mrf.mxu0 }
 0x31f   :  { %v882_v54 = vmul.f32 %v1076_v52, %v844_v53 }
 0x321   :  { %v886_v57 = vpack.c.bf16 %v882_v54, %v882_v54 }
 0x323   :  { %895 = vrot.lane.b32.xlu0 %v886_v57, %s1077_s26  ;;  %899 = vrot.lane.b32.xlu2 %v888_v56, %s1077_s26 }
 0x331   :  { %v436_v58 = vpop.permute.xlu1 %435 }
 0x332   :  { %448 = vst.msk [vmem:[%s1518_s1] sm:$0xf] %vm447_vm5, %v436_v58  ;;  %v667_v59 = vpop.permute.xlu2 %666 }
 0x339   :  { %v438_v8 = vpop.permute.xlu0 %437 }
 0x33a   :  { %449 = vst.msk [vmem:[%s1518_s1 + $0x4] sm:$0xf] %vm447_vm5, %v438_v8 }
 0x33b   :  { %678 = vst.msk [vmem:[%s1518_s1 + $0x4] sm:$0xf] %vm676_vm6, %v667_v59 }
 0x341   :  { %v442_v10 = vpop.permute.xlu0 %441 }
 0x342   :  { %v665_v30 = vpop.permute.xlu1 %664  ;;  %451 = vst.msk [vmem:[%s1518_s1 + $0xc] sm:$0xf] %vm447_vm5, %v442_v10 }
 0x343   :  { %677 = vst.msk [vmem:[%s1518_s1] sm:$0xf] %vm676_vm6, %v665_v30 }
 0x354   :  { %v669_v60 = vpop.permute.xlu0 %668 }
 0x355   :  { %679 = vst.msk [vmem:[%s1518_s1 + $0x8] sm:$0xf] %vm676_vm6, %v669_v60 }
 0x35c   :  { %v671_v61 = vpop.permute.xlu1 %670 }
 0x35d   :  { %680 = vst.msk [vmem:[%s1518_s1 + $0xc] sm:$0xf] %vm676_vm6, %v671_v61 }
 0x364   :  { %v898_v9 = vpop.permute.xlu1 %897 }
 0x365   :  { %908 = vst.msk [vmem:[%s1518_s1 + $0x8] sm:$0xf] %vm905_vm7, %v898_v9 }
 0x375   :  { %v894_v63 = vpop.permute.xlu2 %893 }
 0x376   :  { %906 = vst.msk [vmem:[%s1518_s1] sm:$0xf] %vm905_vm7, %v894_v63 }
 0x37d   :  { %v900_v0 = vpop.permute.xlu2 %899 }
 0x37e   :  { %909 = vst.msk [vmem:[%s1518_s1 + $0xc] sm:$0xf] %vm905_vm7, %v900_v0 }
 0x395   :  { %v896_v1 = vpop.permute.xlu0 %895 }
 0x396   :  { %907 = vst.msk [vmem:[%s1518_s1 + $0x4] sm:$0xf] %vm905_vm7, %v896_v1 }

// kernel: text_net_fwd.18
= control target key start
LH: loop header
LB: loop body
LE: loop exit
PB: predicated region body
PF: predicated region fallthrough
CT: control target
= control target key end

     0   :  { %9 = vsyncpa [#allocation3], 0  ;;  %s241_s18 = smov [#allocation2]   ;;  %s242_s20 = smov 64   ;;  %s305_s0 = inlined_call_operand.vmem [shape: bf16[32,128], index: 0, kind: input, shape index: {}]   ;;  %s306_s1 = inlined_call_operand.hbm [shape: bf16[128,128], index: 1, kind: input, shape index: {}]   ;;  %s307_s2 = inlined_call_operand.vmem [shape: f32[1,128], index: 2, kind: input, shape index: {}]   ;;  %s308_s3 = inlined_call_operand.vmem [shape: f32[32,128], index: 3, kind: input, shape index: {}]   ;;  %s309_s4 = inlined_call_operand.vmem [shape: f32[32,128], index: 4, kind: output, shape index: {}]  }
   0x1   :  { %s16_s17 = sshll.u32 %s306_s1, 4  ;;  %s18_s19 = sshll.u32 %s241_s18, 4  ;;  %s17_s17 = int_to_ptr.hbm [resolvable:$true] %s16_s17  ;;  %s19_s19 = int_to_ptr.vmem [resolvable:$true] %s18_s19 }
   0x2   :  { %s243_s21 = smov 4  }
   0x3   :  { %24 = dma.hbm_to_vmem [thread:$0]  %s17_s17, 1024, %s19_s19, [#allocation3], %s242_s20, %s242_s20, %s243_s21  }
   0x4   :  { %239 = dma.done.wait [#allocation3], 1024  }
   0x5   :  { %240 = vsyncadd [#allocation3], 4294966272  ;;  %v202_v0 = vld [vmem:[#allocation2 + $0x38] sm:$0xff]  ;;  %v201_v1 = vld [vmem:[#allocation2 + $0x30] sm:$0xff] }
   0x6   :  { %117 = vmatpush.bf16.msra.mxu0 %v202_v0  ;;  %203 = vmatpush.bf16.msra.mxu1 %v202_v0  ;;  %v200_v2 = vld [vmem:[#allocation2 + $0x28] sm:$0xff]  ;;  %v199_v3 = vld [vmem:[#allocation2 + $0x20] sm:$0xff]  ;;  %v198_v4 = vld [vmem:[#allocation2 + $0x18] sm:$0xff] }
   0x7   :  { %v197_v5 = vld [vmem:[#allocation2 + $0x10] sm:$0xff]  ;;  %v196_v6 = vld [vmem:[#allocation2 + $0x8] sm:$0xff]  ;;  %v195_v7 = vld [vmem:[#allocation2] sm:$0xff] }
   0x8   :  { %v193_v8 = vld [vmem:[%s305_s0] sm:$0xff]  ;;  %v194_v9 = vld [vmem:[%s305_s0 + $0x8] sm:$0xff]  ;;  %v138_v14 = vld [vmem:[%s308_s3 + $0x10] sm:$0xff] }
   0x9   :  { %v214_v10 = vld [vmem:[%s307_s2] ss:$0 sm:$0xff]  ;;  %v137_v20 = vld [vmem:[%s308_s3 + $0x8] sm:$0xff]  ;;  %v139_v22 = vld [vmem:[%s308_s3 + $0x18] sm:$0xff] }
   0xa   :  { %118 = vmatpush.bf16.msra.mxu0 %v201_v1  ;;  %204 = vmatpush.bf16.msra.mxu1 %v201_v1  ;;  %v136_v12 = vld [vmem:[%s308_s3] sm:$0xff] }
   0xe   :  { %119 = vmatpush.bf16.msra.mxu0 %v200_v2  ;;  %205 = vmatpush.bf16.msra.mxu1 %v200_v2 }
  0x12   :  { %120 = vmatpush.bf16.msra.mxu0 %v199_v3  ;;  %206 = vmatpush.bf16.msra.mxu1 %v199_v3 }
  0x16   :  { %121 = vmatpush.bf16.msra.mxu0 %v198_v4  ;;  %207 = vmatpush.bf16.msra.mxu1 %v198_v4 }
  0x1a   :  { %122 = vmatpush.bf16.msra.mxu0 %v197_v5  ;;  %208 = vmatpush.bf16.msra.mxu1 %v197_v5 }
  0x1e   :  { %123 = vmatpush.bf16.msra.mxu0 %v196_v6  ;;  %209 = vmatpush.bf16.msra.mxu1 %v196_v6 }
  0x22   :  { %124 = vmatpush.bf16.msra.mxu0 %v195_v7  ;;  %210 = vmatpush.bf16.msra.mxu1 %v195_v7 }
  0x25   :  { %125 = vmatmul.bf16.vlgmr.msra.gmra.mxu0 %v193_v8  ;;  %130 = vmatmul.bf16.vlgmr.msra.gmra.mxu1 %v194_v9 }
  0xa2   :  { %v126_v11 = vpop.f32.mrf.mxu0  ;;  %v131_v13 = vpop.f32.mrf.mxu1 }
  0xa3   :  { %v127_v15 = vadd.f32 %v214_v10, %v126_v11  ;;  %v132_v16 = vadd.f32 %v214_v10, %v131_v13 }
  0xa5   :  { %v140_v17 = vadd.f32 %v136_v12, %v127_v15  ;;  %v142_v18 = vadd.f32 %v138_v14, %v132_v16 }
  0xa7   :  { %144 = vst [vmem:[%s309_s4] sm:$0xff] %v140_v17 }
  0xa8   :  { %146 = vst [vmem:[%s309_s4 + $0x10] sm:$0xff] %v142_v18 }
  0xaa   :  { %v128_v19 = vpop.f32.mrf.mxu0  ;;  %v133_v21 = vpop.f32.mrf.mxu1 }
  0xab   :  { %v129_v23 = vadd.f32 %v214_v10, %v128_v19  ;;  %v134_v24 = vadd.f32 %v214_v10, %v133_v21 }
  0xad   :  { %v141_v25 = vadd.f32 %v137_v20, %v129_v23  ;;  %v143_v26 = vadd.f32 %v139_v22, %v134_v24 }
  0xaf   :  { %145 = vst [vmem:[%s309_s4 + $0x8] sm:$0xff] %v141_v25 }
  0xb0   :  { %147 = vst [vmem:[%s309_s4 + $0x18] sm:$0xff] %v143_v26 }
  0xb1   :  { %152 = vsyncpa [#allocation3], 1 }

// kernel: text_net_fwd.15
= control target key start
LH: loop header
LB: loop body
LE: loop exit
PB: predicated region body
PF: predicated region fallthrough
CT: control target
= control target key end

     0   :  { %9 = vsyncpa [#allocation3], 0  ;;  %s664_s18 = smov [#allocation2]   ;;  %s665_s20 = smov 64   ;;  %s770_s0 = inlined_call_operand.vmem [shape: bf16[32,512], index: 0, kind: input, shape index: {}]   ;;  %s771_s1 = inlined_call_operand.hbm [shape: bf16[512,128], index: 1, kind: input, shape index: {}]   ;;  %s772_s2 = inlined_call_operand.vmem [shape: f32[1,128], index: 2, kind: input, shape index: {}]   ;;  %s773_s3 = inlined_call_operand.vmem [shape: f32[32,128], index: 3, kind: input, shape index: {}]   ;;  %s774_s4 = inlined_call_operand.vmem [shape: f32[32,128], index: 4, kind: output, shape index: {}]  }
   0x1   :  { %s16_s17 = sshll.u32 %s771_s1, 4  ;;  %s18_s19 = sshll.u32 %s664_s18, 4  ;;  %s17_s17 = int_to_ptr.hbm [resolvable:$true] %s16_s17  ;;  %s19_s19 = int_to_ptr.vmem [resolvable:$true] %s18_s19 }
   0x2   :  { %s666_s21 = smov 4  }
   0x3   :  { %24 = dma.hbm_to_vmem [thread:$0]  %s17_s17, 4096, %s19_s19, [#allocation3], %s665_s20, %s665_s20, %s666_s21  }
   0x4   :  { %662 = dma.done.wait [#allocation3], 4096  }
   0x5   :  { %663 = vsyncadd [#allocation3], 4294963200  ;;  %v609_v0 = vld [vmem:[#allocation2 + $0x38] sm:$0xff]  ;;  %v608_v4 = vld [vmem:[#allocation2 + $0x30] sm:$0xff] }
   0x6   :  { %v617_v1 = vld [vmem:[#allocation2 + $0x78] sm:$0xff]  ;;  %341 = vmatpush.bf16.msra.mxu0 %v609_v0  ;;  %v616_v5 = vld [vmem:[#allocation2 + $0x70] sm:$0xff]  ;;  %v607_v8 = vld [vmem:[#allocation2 + $0x28] sm:$0xff] }
   0x7   :  { %v625_v2 = vld [vmem:[#allocation2 + $0xb8] sm:$0xff]  ;;  %360 = vmatpush.bf16.msra.mxu1 %v617_v1  ;;  %v624_v6 = vld [vmem:[#allocation2 + $0xb0] sm:$0xff]  ;;  %v615_v9 = vld [vmem:[#allocation2 + $0x68] sm:$0xff] }
   0x8   :  { %v633_v3 = vld [vmem:[#allocation2 + $0xf8] sm:$0xff]  ;;  %379 = vmatpush.bf16.msra.mxu2 %v625_v2  ;;  %v632_v7 = vld [vmem:[#allocation2 + $0xf0] sm:$0xff]  ;;  %v623_v10 = vld [vmem:[#allocation2 + $0xa8] sm:$0xff] }
   0x9   :  { %398 = vmatpush.bf16.msra.mxu3 %v633_v3  ;;  %v631_v11 = vld [vmem:[#allocation2 + $0xe8] sm:$0xff]  ;;  %v606_v12 = vld [vmem:[#allocation2 + $0x20] sm:$0xff]  ;;  %v605_v16 = vld [vmem:[#allocation2 + $0x18] sm:$0xff] }
   0xa   :  { %342 = vmatpush.bf16.msra.mxu0 %v608_v4  ;;  %v614_v13 = vld [vmem:[#allocation2 + $0x60] sm:$0xff]  ;;  %v613_v17 = vld [vmem:[#allocation2 + $0x58] sm:$0xff]  ;;  %v604_v20 = vld [vmem:[#allocation2 + $0x10] sm:$0xff] }
   0xb   :  { %361 = vmatpush.bf16.msra.mxu1 %v616_v5  ;;  %v622_v14 = vld [vmem:[#allocation2 + $0xa0] sm:$0xff]  ;;  %v621_v18 = vld [vmem:[#allocation2 + $0x98] sm:$0xff]  ;;  %v612_v21 = vld [vmem:[#allocation2 + $0x50] sm:$0xff] }
   0xc   :  { %380 = vmatpush.bf16.msra.mxu2 %v624_v6  ;;  %v630_v15 = vld [vmem:[#allocation2 + $0xe0] sm:$0xff]  ;;  %v629_v19 = vld [vmem:[#allocation2 + $0xd8] sm:$0xff]  ;;  %v620_v22 = vld [vmem:[#allocation2 + $0x90] sm:$0xff] }
   0xd   :  { %399 = vmatpush.bf16.msra.mxu3 %v632_v7  ;;  %v628_v23 = vld [vmem:[#allocation2 + $0xd0] sm:$0xff]  ;;  %v603_v24 = vld [vmem:[#allocation2 + $0x8] sm:$0xff]  ;;  %v602_v28 = vld [vmem:[#allocation2] sm:$0xff] }
   0xe   :  { %343 = vmatpush.bf16.msra.mxu0 %v607_v8  ;;  %v611_v25 = vld [vmem:[#allocation2 + $0x48] sm:$0xff]  ;;  %v610_v29 = vld [vmem:[#allocation2 + $0x40] sm:$0xff]  ;;  %v596_v33 = vld [vmem:[%s770_s0 + $0xc] sm:$0xf0] }
   0xf   :  { %362 = vmatpush.bf16.msra.mxu1 %v615_v9  ;;  %v619_v26 = vld [vmem:[#allocation2 + $0x88] sm:$0xff]  ;;  %v618_v30 = vld [vmem:[#allocation2 + $0x80] sm:$0xff]  ;;  %v438_v35 = vld [vmem:[%s770_s0 + $0x10] sm:$0xf0] }
  0x10   :  { %381 = vmatpush.bf16.msra.mxu2 %v623_v10  ;;  %v627_v27 = vld [vmem:[#allocation2 + $0xc8] sm:$0xff]  ;;  %v626_v31 = vld [vmem:[#allocation2 + $0xc0] sm:$0xff]  ;;  %v597_v37 = vld [vmem:[%s770_s0 + $0x14] sm:$0xf0] }
  0x11   :  { %400 = vmatpush.bf16.msra.mxu3 %v631_v11  ;;  %v436_v32 = vld [vmem:[%s770_s0] sm:$0xf]  ;;  %v594_v34 = vld [vmem:[%s770_s0 + $0x4] sm:$0xf]  ;;  %v444_v36 = vld [vmem:[%s770_s0 + $0x8] sm:$0xf] }
  0x12   :  { %344 = vmatpush.bf16.msra.mxu0 %v606_v12  ;;  %v595_v38 = vld [vmem:[%s770_s0 + $0xc] sm:$0xf]  ;;  %v446_v39 = vld [vmem:[%s770_s0 + $0x18] sm:$0xf0]  ;;  %v437_v40 = vor.u32 %v596_v33, %v436_v32  ;;  %v441_v41 = vor.u32 %v594_v34, %v438_v35  ;;  %v445_v42 = vor.u32 %v597_v37, %v444_v36  ;;  %v452_v44 = vld [vmem:[%s770_s0 + $0x20] sm:$0xf] }
  0x13   :  { %363 = vmatpush.bf16.msra.mxu1 %v614_v13  ;;  %v449_v43 = vor.u32 %v595_v38, %v446_v39  ;;  %v600_v45 = vld [vmem:[%s770_s0 + $0x2c] sm:$0xf0]  ;;  %v598_v46 = vld [vmem:[%s770_s0 + $0x24] sm:$0xf]  ;;  %v454_v47 = vld [vmem:[%s770_s0 + $0x30] sm:$0xf0] }
  0x14   :  { %382 = vmatpush.bf16.msra.mxu2 %v622_v14  ;;  %v460_v48 = vld [vmem:[%s770_s0 + $0x28] sm:$0xf]  ;;  %v601_v49 = vld [vmem:[%s770_s0 + $0x34] sm:$0xf0]  ;;  %v599_v50 = vld [vmem:[%s770_s0 + $0x2c] sm:$0xf]  ;;  %v453_v52 = vor.u32 %v600_v45, %v452_v44  ;;  %v457_v53 = vor.u32 %v598_v46, %v454_v47 }
  0x15   :  { %401 = vmatpush.bf16.msra.mxu3 %v630_v15  ;;  %v462_v51 = vld [vmem:[%s770_s0 + $0x38] sm:$0xf0]  ;;  %v461_v54 = vor.u32 %v601_v49, %v460_v48  ;;  %v637_v56 = vld [vmem:[%s772_s2] ss:$0 sm:$0xff]  ;;  %v418_v11 = vld [vmem:[%s773_s3 + $0x8] sm:$0xff] }
  0x16   :  { %345 = vmatpush.bf16.msra.mxu0 %v605_v16  ;;  %v465_v55 = vor.u32 %v599_v50, %v462_v51  ;;  %v417_v1 = vld [vmem:[%s773_s3] sm:$0xff] }
  0x17   :  { %364 = vmatpush.bf16.msra.mxu1 %v613_v17 }
  0x18   :  { %383 = vmatpush.bf16.msra.mxu2 %v621_v18 }
  0x19   :  { %402 = vmatpush.bf16.msra.mxu3 %v629_v19 }
  0x1a   :  { %346 = vmatpush.bf16.msra.mxu0 %v604_v20 }
  0x1b   :  { %365 = vmatpush.bf16.msra.mxu1 %v612_v21  ;;  %v419_v21 = vld [vmem:[%s773_s3 + $0x10] sm:$0xff] }
  0x1c   :  { %384 = vmatpush.bf16.msra.mxu2 %v620_v22 }
  0x1d   :  { %403 = vmatpush.bf16.msra.mxu3 %v628_v23 }
  0x1e   :  { %347 = vmatpush.bf16.msra.mxu0 %v603_v24 }
  0x1f   :  { %366 = vmatpush.bf16.msra.mxu1 %v611_v25 }
  0x20   :  { %385 = vmatpush.bf16.msra.mxu2 %v619_v26 }
  0x21   :  { %404 = vmatpush.bf16.msra.mxu3 %v627_v27 }
  0x22   :  { %348 = vmatpush.bf16.msra.mxu0 %v602_v28 }
  0x23   :  { %367 = vmatpush.bf16.msra.mxu1 %v610_v29 }
  0x24   :  { %386 = vmatpush.bf16.msra.mxu2 %v618_v30  ;;  %v420_v30 = vld [vmem:[%s773_s3 + $0x18] sm:$0xff] }
  0x25   :  { %405 = vmatpush.bf16.msra.mxu3 %v626_v31  ;;  %349 = vmatmul.bf16.vlgmr.msra.gmra.mxu0 %v437_v40 }
  0x26   :  { %368 = vmatmul.bf16.vlgmr.msra.gmra.mxu1 %v441_v41 }
  0x27   :  { %387 = vmatmul.bf16.vlgmr.msra.gmra.mxu2 %v445_v42 }
  0x28   :  { %406 = vmatmul.bf16.vlgmr.msra.gmra.mxu3 %v449_v43 }
  0x35   :  { %354 = vmatmul.bf16.gmra.mxu0 %v453_v52 }
  0x36   :  { %373 = vmatmul.bf16.gmra.mxu1 %v457_v53 }
  0x37   :  { %392 = vmatmul.bf16.gmra.mxu2 %v461_v54 }
  0x38   :  { %411 = vmatmul.bf16.gmra.mxu3 %v465_v55 }
  0xa2   :  { %v350_v57 = vpop.f32.mrf.mxu0 }
  0xa3   :  { %v369_v58 = vpop.f32.mrf.mxu1  ;;  %v351_v59 = vadd.f32 %v637_v56, %v350_v57 }
  0xa5   :  { %v370_v60 = vadd.f32 %v369_v58, %v351_v59 }
  0xaa   :  { %v388_v61 = vpop.f32.mrf.mxu2  ;;  %v352_v0 = vpop.f32.mrf.mxu0 }
  0xab   :  { %v407_v62 = vpop.f32.mrf.mxu3  ;;  %v389_v63 = vadd.f32 %v388_v61, %v370_v60  ;;  %v371_v2 = vpop.f32.mrf.mxu1  ;;  %v353_v4 = vadd.f32 %v637_v56, %v352_v0 }
  0xad   :  { %v408_v3 = vadd.f32 %v407_v62, %v389_v63  ;;  %v372_v6 = vadd.f32 %v371_v2, %v353_v4 }
  0xaf   :  { %v421_v5 = vadd.f32 %v417_v1, %v408_v3 }
  0xb1   :  { %425 = vst [vmem:[%s774_s4] sm:$0xff] %v421_v5 }
  0xb2   :  { %v390_v7 = vpop.f32.mrf.mxu2  ;;  %v355_v10 = vpop.f32.mrf.mxu0 }
  0xb3   :  { %v409_v8 = vpop.f32.mrf.mxu3  ;;  %v391_v9 = vadd.f32 %v390_v7, %v372_v6  ;;  %v356_v12 = vadd.f32 %v637_v56, %v355_v10  ;;  %v374_v14 = vpop.f32.mrf.mxu1 }
  0xb5   :  { %v410_v13 = vadd.f32 %v409_v8, %v391_v9  ;;  %v375_v16 = vadd.f32 %v374_v14, %v356_v12 }
  0xb7   :  { %v422_v15 = vadd.f32 %v418_v11, %v410_v13 }
  0xb9   :  { %426 = vst [vmem:[%s774_s4 + $0x8] sm:$0xff] %v422_v15 }
  0xba   :  { %v393_v17 = vpop.f32.mrf.mxu2  ;;  %v357_v20 = vpop.f32.mrf.mxu0 }
  0xbb   :  { %v412_v18 = vpop.f32.mrf.mxu3  ;;  %v394_v19 = vadd.f32 %v393_v17, %v375_v16  ;;  %v358_v23 = vadd.f32 %v637_v56, %v357_v20  ;;  %v376_v25 = vpop.f32.mrf.mxu1 }
  0xbd   :  { %v413_v22 = vadd.f32 %v412_v18, %v394_v19  ;;  %v377_v26 = vadd.f32 %v376_v25, %v358_v23 }
  0xbf   :  { %v423_v24 = vadd.f32 %v419_v21, %v413_v22 }
  0xc1   :  { %427 = vst [vmem:[%s774_s4 + $0x10] sm:$0xff] %v423_v24 }
  0xc2   :  { %v395_v27 = vpop.f32.mrf.mxu2 }
  0xc3   :  { %v396_v28 = vadd.f32 %v395_v27, %v377_v26  ;;  %v414_v29 = vpop.f32.mrf.mxu3 }
  0xc5   :  { %v415_v31 = vadd.f32 %v414_v29, %v396_v28 }
  0xc7   :  { %v424_v32 = vadd.f32 %v420_v30, %v415_v31 }
  0xc9   :  { %428 = vst [vmem:[%s774_s4 + $0x18] sm:$0xff] %v424_v32 }
  0xca   :  { %433 = vsyncpa [#allocation3], 1 }

// kernel: text_net_fwd.21
= control target key start
LH: loop header
LB: loop body
LE: loop exit
PB: predicated region body
PF: predicated region fallthrough
CT: control target
= control target key end

     0   :  { %vm19_vm0 = vcmask 1041408   ;;  %s294_s0 = inlined_call_operand.vmem [shape: f32[2,128], index: 0, kind: input, shape index: {}]   ;;  %s295_s1 = inlined_call_operand.vmem [shape: bf16[128,64], index: 1, kind: input, shape index: {}]   ;;  %s296_s2 = inlined_call_operand.vmem [shape: f32[1,128], index: 2, kind: input, shape index: {}]   ;;  %s297_s3 = inlined_call_operand.vmem [shape: f32[1,128], index: 3, kind: input, shape index: {}]   ;;  %s298_s4 = inlined_call_operand.hbm [shape: f32[2,64], index: 4, kind: output, shape index: {}]  }
   0x1   :  { %v18_v0 = vld [vmem:[%s294_s0] sm:$0x3] }
   0x2   :  { %v20_v1 = vsel %vm19_vm0, %v18_v0, 0.0 }
   0x3   :  { %9 = vsyncpa [#allocation3], 0  ;;  %21 = vadd.xlane.f32.xlu0 %v20_v1  ;;  %v229_v2 = vmov 128.0   ;;  %v194_v3 = vld [vmem:[%s295_s1 + $0x38] sm:$0xff]  ;;  %v193_v15 = vld [vmem:[%s295_s1 + $0x30] sm:$0xff]  ;;  %s230_s9 = smov [#allocation2]  }
   0x4   :  { %199 = vrcp.f32 %v229_v2  ;;  %124 = vmatpush.bf16.msra.mxu0 %v194_v3  ;;  %v192_v16 = vld [vmem:[%s295_s1 + $0x28] sm:$0xff]  ;;  %v191_v17 = vld [vmem:[%s295_s1 + $0x20] sm:$0xff]  ;;  %v190_v18 = vld [vmem:[%s295_s1 + $0x18] sm:$0xff]  ;;  %s144_s10 = sshll.u32 %s230_s9, 4  ;;  %s146_s13 = sshll.u32 %s298_s4, 4  ;;  %vm137_vm5 = vcmask 517120   ;;  %s145_s10 = int_to_ptr.vmem [resolvable:$true] %s144_s10  ;;  %s147_s13 = int_to_ptr.hbm [resolvable:$true] %s146_s13 }
   0x5   :  { %v189_v19 = vld [vmem:[%s295_s1 + $0x10] sm:$0xff]  ;;  %v188_v20 = vld [vmem:[%s295_s1 + $0x8] sm:$0xff]  ;;  %v187_v21 = vld [vmem:[%s295_s1] sm:$0xff] }
   0x6   :  { %v197_v31 = vld [vmem:[%s296_s2] ss:$0 sm:$0xff] }
   0x7   :  { %v198_v34 = vld [vmem:[%s297_s3] ss:$0 sm:$0xff] }
   0x8   :  { %125 = vmatpush.bf16.msra.mxu0 %v193_v15 }
   0xa   :  { %v200_v4 = vpop.eup %199 }
   0xb   :  { %v24_v5 = vmul.f32 128.0, %v200_v4  ;;  %vm28_vm1 = vweird.f32 %v200_v4 }
   0xc   :  { %126 = vmatpush.bf16.msra.mxu0 %v192_v16 }
   0xd   :  { %v25_v6 = vsub.f32 1.0, %v24_v5 }
   0xf   :  { %v26_v7 = vmul.f32 %v200_v4, %v25_v6 }
  0x10   :  { %127 = vmatpush.bf16.msra.mxu0 %v191_v17 }
  0x11   :  { %v27_v8 = vadd.f32 %v200_v4, %v26_v7 }
  0x13   :  { %v29_v9 = vsel %vm28_vm1, %v200_v4, %v27_v8 }
  0x14   :  { %128 = vmatpush.bf16.msra.mxu0 %v190_v18 }
  0x18   :  { %129 = vmatpush.bf16.msra.mxu0 %v189_v19 }
  0x1c   :  { %130 = vmatpush.bf16.msra.mxu0 %v188_v20 }
  0x20   :  { %131 = vmatpush.bf16.msra.mxu0 %v187_v21 }
  0x76   :  { %v22_v10 = vpop.xlane.xlu0 %21 }
  0x77   :  { %v30_v11 = vmul.f32 %v29_v9, %v22_v10 }
  0x79   :  { %v31_v12 = vsub.f32 %v18_v0, %v30_v11 }
  0x7b   :  { %v32_v13 = vmul.f32 %v31_v12, %v31_v12 }
  0x7d   :  { %v33_v14 = vsel %vm19_vm0, %v32_v13, 0.0 }
  0x7e   :  { %34 = vadd.xlane.f32.xlu0 %v33_v14 }
  0xf1   :  { %v35_v22 = vpop.xlane.xlu0 %34 }
  0xf2   :  { %v36_v23 = vmul.f32 %v35_v22, %v29_v9 }
  0xf4   :  { %v37_v24 = vadd.f32 1e-05, %v36_v23 }
  0xf6   :  { %201 = vrsqrt.f32 %v37_v24  ;;  %vm44_vm3 = vweird.f32 %v37_v24 }
  0xfc   :  { %v202_v25 = vpop.eup %201 }
  0xfd   :  { %v39_v26 = vmul.f32 %v202_v25, %v37_v24  ;;  %vm45_vm2 = vweird.f32 %v202_v25 }
  0xfe   :  { %vm46_vm4 = vmor %vm44_vm3, %vm45_vm2 }
  0xff   :  { %v40_v27 = vmul.f32 %v202_v25, %v39_v26 }
 0x101   :  { %v41_v28 = vmul.f32 0.5, %v40_v27 }
 0x103   :  { %v42_v29 = vsub.f32 1.5, %v41_v28 }
 0x105   :  { %v43_v30 = vmul.f32 %v202_v25, %v42_v29 }
 0x107   :  { %v47_v32 = vsel %vm46_vm4, %v202_v25, %v43_v30 }
 0x108   :  { %v48_v33 = vmul.f32 %v47_v32, %v31_v12 }
 0x10a   :  { %v53_v35 = vmul.f32 %v197_v31, %v48_v33 }
 0x10c   :  { %v58_v36 = vadd.f32 %v198_v34, %v53_v35 }
 0x10e   :  { %v59_v37 = vpack.c.bf16 %v58_v36, %v58_v36 }
 0x110   :  { %132 = vmatmul.bf16.vlgmr.msra.gmra.mxu0 %v59_v37 }
 0x18d   :  { %v133_v38 = vpop.f32.mrf.mxu0 }
 0x18e   :  { %138 = vst.msk [vmem:[#allocation2] sm:$0x3] %vm137_vm5, %v133_v38 }
 0x18f   :  { %149 = dma.vmem_to_hbm [thread:$0]  %s145_s10, 32, %s147_s13, [#allocation3]  }
 0x195   :  { %v135_v39 = vpop.f32.mrf.mxu0 }
 0x196   :  { %227 = dma.done.wait [#allocation3], 32  }
 0x197   :  { %228 = vsyncadd [#allocation3], 4294967264 }
 0x198   :  { %154 = vsyncpa [#allocation3], 1 }

// kernel: text_net_fwd.19
= control target key start
LH: loop header
LB: loop body
LE: loop exit
PB: predicated region body
PF: predicated region fallthrough
CT: control target
= control target key end

     0   :  { %10 = vsyncpa [#allocation3], 0  ;;  %s1277_s0 = inlined_call_operand.vmem [shape: f32[32,128], index: 0, kind: input, shape index: {}]   ;;  %s1278_s1 = inlined_call_operand.hbm [shape: bf16[128,512], index: 1, kind: input, shape index: {}]   ;;  %s1279_s2 = inlined_call_operand.vmem [shape: f32[1,128], index: 2, kind: input, shape index: {}]   ;;  %s1280_s3 = inlined_call_operand.vmem [shape: f32[1,128], index: 3, kind: input, shape index: {}]   ;;  %s1281_s4 = inlined_call_operand.vmem [shape: f32[1,512], index: 4, kind: input, shape index: {}]   ;;  %s1282_s5 = inlined_call_operand.vmem [shape: bf16[32,512], index: 5, kind: output, shape index: {}]  }
   0x1   :  { %12 = vsyncpa [#allocation3 + $0x1], 0  ;;  %s1093_s18 = smov 0   ;;  %s1095_s19 = smov 0  }
   0x2   :  { %s1097_s20 = smov 0   ;;  %s1099_s21 = smov 0  }
   0x3   :  { %s1101_s22 = smov 0   ;;  %s1103_s23 = smov 0  }
   0x4 LB: > { %s759_s24 = sadd.s32 4294967295, %s1057_s23   ;;  %s27_s25 = sadd.s32 1, %s1053_s22  ;;  %s1057_s23 = sphi %s1103_s23, %s18_s23   ;;  %s1053_s22 = sphi %s1101_s22, %s1290_s22   ;;  %s1049_s21 = sphi %s1099_s21, %s1289_s21   ;;  %s1045_s20 = sphi %s1097_s20, %s1288_s20   ;;  %s1041_s19 = sphi %s1095_s19, %s1287_s19   ;;  %s1037_s18 = sphi %s1093_s18, %s1286_s18  }
   0x5   : > { %p28_p0 = scmp.ge.s32.totalorder %s27_s25, 2  ;;  %s63_s26 = sadd.s32 1, %s1045_s20 }
   0x6   : > { %p70_p1 = scmp.ne.s32.totalorder %s1045_s20, %s1041_s19  ;;  %p71_p2 = scmp.eq.s32.totalorder %s1057_s23, 0 }
   0x7   : > { %s1292_s25 = smov (%p28_p0, %s27_s25), 0  ;;  %p76_p4 = scmp.ne.s32.totalorder %s1041_s19, %s1037_s18 }
   0x8   : > { %p1129_p3 = por %p71_p2, %p70_p1  ;;  %s60_s28 = ssub.s32 %s1053_s22, %s1292_s25 }
   0x9   : > { %p77_p5 = scmp.eq.s32.totalorder %s759_s24, 0  ;;  %p61_p6 = scmp.eq.s32.totalorder %s60_s28, 0 }
   0xa   : > { %p170_p7 = scmp.eq.s32.totalorder %s759_s24, 1  ;;  %p880_p10 = scmp.lt.s32.totalorder %s1057_s23, 2 }
   0xb   : > { %p1136_p8 = por %p77_p5, %p76_p4  ;;  %s211_s7 = sand.u32 1, %s1045_s20  }
   0xc   : > { %s1141_s30 = scalar_select %p61_p6, %s1045_s20, %s63_s26  }
   0xd   : > { %p1143_p9 = por %p170_p7, %p70_p1  ;;  %s840_s8 = sshll.u32 %s1053_s22, 3 }
   0xe   : > { %s764_s9 = sshll.u32 %s211_s7, 7  ;;  %s220_s12 = scalar_lea.hbm %s1278_s1, %s840_s8 }
   0xf   : > { %s221_s13 = sshll.u32 %s220_s12, 4  ;;  %s215_s14 = scalar_lea.vmem [#allocation2], %s764_s9  ;;  %s222_s13 = int_to_ptr.hbm [resolvable:$true] %s221_s13 }
  0x10   : > { %s223_s15 = sshll.u32 %s215_s14, 4  ;;  %p877_p11 = pnand %p880_p10, %p1129_p3  ;;  %s224_s15 = int_to_ptr.vmem [resolvable:$true] %s223_s15 }
  0x11   : > { %p767_p12 = scmp.ge.s32.totalorder %s1057_s23, 1  ;;  %s212_s16 = scalar_lea.sflag [#allocation3], %s211_s7 }
  0x12   : > { %s1059_s17 = smov 256   ;;  %s1060_s18 = smov 128  }
  0x13   : > { %s1061_s24 = smov 8   ;;  %p239_p13 = scmp.lt.s32.totalorder %s1057_s23, 3 }
  0x14   : > { %879 = dma.hbm_to_vmem [thread:$0]  (!%p877_p11), %s222_s13, 2048, %s224_s15, %s212_s16, %s1059_s17, %s1060_s18, %s1061_s24  }
  0x15   : > { %p240_p0 = pnand %p767_p12, %p239_p13 }
  0x16   : > { %s1158_s26 = sand.u32 (!%p240_p0), 1, %s1041_s19  }
  0x17   : > { %243 = sbr.rel (%p240_p0) target bundleno = 484 (0x1e4), region = 40  ;;  %s768_s28 = sshll.u32 (!%p240_p0), %s1158_s26, 7 }
  0x18   : > { %s246_s8 = scalar_lea.sflag (!%p240_p0), [#allocation3], %s1158_s26  ;;  %s1162_s9 = scalar_lea.vmem (!%p240_p0), [#allocation2], %s768_s28 }
  0x1c   : > { %1032 = dma.done.wait (%p1136_p8), %s246_s8, 2048  }
  0x1d   : > { %1034 = vsyncadd (%p1136_p8), %s246_s8, 4294965248  ;;  %v301_v0 = vld [vmem:[%s1277_s0 + $0x10] sm:$0xff]  ;;  %v299_v1 = vld [vmem:[%s1277_s0] sm:$0xff]  ;;  %v1062_v4 = vmov 128.0   ;;  %s770_s24 = sshll.u32 %s1049_s21, 1  ;;  %s769_s27 = sshll.u32 %s1158_s26, 5 }
  0x1e   : > { %307 = vadd.xlane.f32.xlu0 %v301_v0  ;;  %303 = vadd.xlane.f32.xlu1 %v299_v1  ;;  %v302_v2 = vld [vmem:[%s1277_s0 + $0x18] sm:$0xff]  ;;  %v300_v3 = vld [vmem:[%s1277_s0 + $0x8] sm:$0xff]  ;;  %935 = vrcp.f32 %v1062_v4  ;;  %v829_v27 = vld [vmem:[%s1162_s9 + $0x70] sm:$0xf]  ;;  %p293_p1 = scmp.lt.s32.totalorder %s770_s24, 3  ;;  %s284_s7 = scalar_lea.vmem [#allocation4], %s769_s27 }
  0x1f   : > { %v856_v28 = vld [vmem:[%s1162_s9 + $0x74] sm:$0xf0]  ;;  %v855_v29 = vld [vmem:[%s1162_s9 + $0x74] sm:$0xf]  ;;  %v831_v31 = vld [vmem:[%s1162_s9 + $0x78] sm:$0xf0] }
  0x20   : > { %v830_v30 = vor.u32 %v856_v28, %v829_v27  ;;  %v834_v32 = vor.u32 %v855_v29, %v831_v31  ;;  %v821_v33 = vld [vmem:[%s1162_s9 + $0x60] sm:$0xf]  ;;  %v854_v34 = vld [vmem:[%s1162_s9 + $0x64] sm:$0xf0]  ;;  %v853_v35 = vld [vmem:[%s1162_s9 + $0x64] sm:$0xf] }
  0x21   : > { %v822_v36 = vor.u32 %v854_v34, %v821_v33  ;;  %v823_v37 = vld [vmem:[%s1162_s9 + $0x68] sm:$0xf0]  ;;  %v813_v39 = vld [vmem:[%s1162_s9 + $0x50] sm:$0xf]  ;;  %v852_v40 = vld [vmem:[%s1162_s9 + $0x54] sm:$0xf0] }
  0x22   : > { %510 = vmatpush.bf16.msra.mxu0 %v830_v30  ;;  %858 = vmatpush.bf16.msra.mxu2 %v830_v30  ;;  %v826_v38 = vor.u32 %v853_v35, %v823_v37  ;;  %v851_v41 = vld [vmem:[%s1162_s9 + $0x54] sm:$0xf]  ;;  %v814_v42 = vor.u32 %v852_v40, %v813_v39  ;;  %v815_v43 = vld [vmem:[%s1162_s9 + $0x58] sm:$0xf0]  ;;  %v805_v45 = vld [vmem:[%s1162_s9 + $0x40] sm:$0xf] }
  0x23   : > { %529 = vmatpush.bf16.msra.mxu1 %v834_v32  ;;  %866 = vmatpush.bf16.msra.mxu3 %v834_v32  ;;  %v818_v44 = vor.u32 %v851_v41, %v815_v43  ;;  %v850_v46 = vld [vmem:[%s1162_s9 + $0x44] sm:$0xf0]  ;;  %v849_v47 = vld [vmem:[%s1162_s9 + $0x44] sm:$0xf]  ;;  %v807_v49 = vld [vmem:[%s1162_s9 + $0x48] sm:$0xf0] }
  0x24   : > { %v936_v5 = vpop.eup %935  ;;  %v806_v48 = vor.u32 %v850_v46, %v805_v45  ;;  %v810_v50 = vor.u32 %v849_v47, %v807_v49  ;;  %v797_v51 = vld [vmem:[%s1162_s9 + $0x30] sm:$0xf]  ;;  %v848_v52 = vld [vmem:[%s1162_s9 + $0x34] sm:$0xf0]  ;;  %v847_v53 = vld [vmem:[%s1162_s9 + $0x34] sm:$0xf] }
  0x25   : > { %v312_v6 = vmul.f32 128.0, %v936_v5  ;;  %vm316_vm0 = vweird.f32 %v936_v5  ;;  %v798_v54 = vor.u32 %v848_v52, %v797_v51  ;;  %v799_v55 = vld [vmem:[%s1162_s9 + $0x38] sm:$0xf0]  ;;  %v789_v57 = vld [vmem:[%s1162_s9 + $0x20] sm:$0xf]  ;;  %s1294_s24 = smov (!%p293_p1, %s770_s24), 3 }
  0x26   : > { %309 = vadd.xlane.f32.xlu0 %v302_v2  ;;  %305 = vadd.xlane.f32.xlu1 %v300_v3  ;;  %v802_v56 = vor.u32 %v847_v53, %v799_v55  ;;  %v846_v58 = vld [vmem:[%s1162_s9 + $0x24] sm:$0xf0]  ;;  %v845_v59 = vld [vmem:[%s1162_s9 + $0x24] sm:$0xf]  ;;  %v791_v61 = vld [vmem:[%s1162_s9 + $0x28] sm:$0xf0] }
  0x27   : > { %v313_v7 = vsub.f32 1.0, %v312_v6  ;;  %511 = vmatpush.bf16.msra.mxu0 %v822_v36  ;;  %859 = vmatpush.bf16.msra.mxu2 %v822_v36  ;;  %v790_v60 = vor.u32 %v846_v58, %v789_v57  ;;  %v794_v62 = vor.u32 %v845_v59, %v791_v61  ;;  %v781_v63 = vld [vmem:[%s1162_s9 + $0x10] sm:$0xf]  ;;  %v773_v4 = vld [vmem:[%s1162_s9] sm:$0xf]  ;;  %s857_s26 = sshll.u32 (%p1143_p9), %s1049_s21, 3 }
  0x28   : > { %530 = vmatpush.bf16.msra.mxu1 %v826_v38  ;;  %867 = vmatpush.bf16.msra.mxu3 %v826_v38  ;;  %v933_v51 = vld [vmem:[%s1279_s2] ss:$0 sm:$0xff]  ;;  %s616_s12 = scalar_lea.vmem (%p1143_p9), %s1282_s5, %s857_s26 }
  0x29   : > { %v314_v8 = vmul.f32 %v936_v5, %v313_v7  ;;  %v841_v7 = vld [vmem:[%s1162_s9 + $0x4] sm:$0xf]  ;;  %v934_v58 = vld [vmem:[%s1280_s3] ss:$0 sm:$0xff] }
  0x2b   : > { %v315_v9 = vadd.f32 %v936_v5, %v314_v8  ;;  %512 = vmatpush.bf16.msra.mxu0 %v814_v42  ;;  %860 = vmatpush.bf16.msra.mxu2 %v814_v42  ;;  %v775_v8 = vld [vmem:[%s1162_s9 + $0x8] sm:$0xf0] }
  0x2c   : > { %531 = vmatpush.bf16.msra.mxu1 %v818_v44  ;;  %868 = vmatpush.bf16.msra.mxu3 %v818_v44 }
  0x2d   : > { %v1180_v10 = vsel %vm316_vm0, %v936_v5, %v315_v9  ;;  %v842_v5 = vld [vmem:[%s1162_s9 + $0x4] sm:$0xf0] }
  0x2f   : > { %513 = vmatpush.bf16.msra.mxu0 %v806_v48  ;;  %861 = vmatpush.bf16.msra.mxu2 %v806_v48 }
  0x30   : > { %532 = vmatpush.bf16.msra.mxu1 %v810_v50  ;;  %869 = vmatpush.bf16.msra.mxu3 %v810_v50 }
  0x33   : > { %514 = vmatpush.bf16.msra.mxu0 %v798_v54  ;;  %862 = vmatpush.bf16.msra.mxu2 %v798_v54 }
  0x34   : > { %533 = vmatpush.bf16.msra.mxu1 %v802_v56  ;;  %870 = vmatpush.bf16.msra.mxu3 %v802_v56 }
  0x37   : > { %515 = vmatpush.bf16.msra.mxu0 %v790_v60  ;;  %863 = vmatpush.bf16.msra.mxu2 %v790_v60 }
  0x38   : > { %534 = vmatpush.bf16.msra.mxu1 %v794_v62  ;;  %871 = vmatpush.bf16.msra.mxu3 %v794_v62 }
  0x91   : > { %v308_v11 = vpop.xlane.xlu0 %307  ;;  %v304_v12 = vpop.xlane.xlu1 %303 }
  0x92   : > { %v320_v13 = vmul.f32 %v1180_v10, %v308_v11  ;;  %v318_v14 = vmul.f32 %v1180_v10, %v304_v12 }
  0x94   : > { %v1184_v15 = vsub.f32 %v299_v1, %v318_v14  ;;  %v1186_v16 = vsub.f32 %v301_v0, %v320_v13  ;;  %v844_v0 = vld [vmem:[%s1162_s9 + $0x14] sm:$0xf0]  ;;  %v843_v1 = vld [vmem:[%s1162_s9 + $0x14] sm:$0xf]  ;;  %v774_v14 = vor.u32 %v842_v5, %v773_v4 }
  0x96   : > { %v328_v17 = vmul.f32 %v1186_v16, %v1186_v16  ;;  %v326_v18 = vmul.f32 %v1184_v15, %v1184_v15 }
  0x98   : > { %334 = vadd.xlane.f32.xlu2 %v328_v17  ;;  %330 = vadd.xlane.f32.xlu0 %v326_v18  ;;  %v778_v17 = vor.u32 %v841_v7, %v775_v8 }
  0x99   : > { %v310_v19 = vpop.xlane.xlu0 %309  ;;  %v306_v20 = vpop.xlane.xlu1 %305 }
  0x9a   : > { %v321_v21 = vmul.f32 %v1180_v10, %v310_v19  ;;  %v319_v22 = vmul.f32 %v1180_v10, %v306_v20 }
  0x9c   : > { %v1194_v23 = vsub.f32 %v302_v2, %v321_v21  ;;  %v1196_v24 = vsub.f32 %v300_v3, %v319_v22  ;;  %v782_v2 = vor.u32 %v844_v0, %v781_v63  ;;  %v783_v3 = vld [vmem:[%s1162_s9 + $0x18] sm:$0xf0]  ;;  %s295_s9 = scalar_lea.vmem %s1281_s4, %s1294_s24 }
  0x9d   : > { %v786_v6 = vor.u32 %v843_v1, %v783_v3 }
  0x9e   : > { %v329_v25 = vmul.f32 %v1194_v23, %v1194_v23  ;;  %v327_v26 = vmul.f32 %v1196_v24, %v1196_v24  ;;  %516 = vmatpush.bf16.msra.mxu0 %v782_v2  ;;  %864 = vmatpush.bf16.msra.mxu2 %v782_v2 }
  0x9f   : > { %535 = vmatpush.bf16.msra.mxu1 %v786_v6  ;;  %872 = vmatpush.bf16.msra.mxu3 %v786_v6 }
  0xa0   : > { %336 = vadd.xlane.f32.xlu2 %v329_v25  ;;  %332 = vadd.xlane.f32.xlu1 %v327_v26 }
  0xa2   : > { %517 = vmatpush.bf16.msra.mxu0 %v774_v14  ;;  %865 = vmatpush.bf16.msra.mxu2 %v774_v14 }
  0xa3   : > { %536 = vmatpush.bf16.msra.mxu1 %v778_v17  ;;  %873 = vmatpush.bf16.msra.mxu3 %v778_v17 }
 0x10b   : > { %v335_v9 = vpop.xlane.xlu2 %334  ;;  %v331_v11 = vpop.xlane.xlu0 %330 }
 0x10c   : > { %v340_v12 = vmul.f32 %v335_v9, %v1180_v10  ;;  %v338_v13 = vmul.f32 %v331_v11, %v1180_v10 }
 0x10e   : > { %v344_v18 = vadd.f32 1e-05, %v340_v12  ;;  %v342_v19 = vadd.f32 1e-05, %v338_v13 }
 0x110   : > { %937 = vrsqrt.f32 %v344_v18  ;;  %vm352_vm2 = vweird.f32 %v342_v19  ;;  %vm372_vm4 = vweird.f32 %v344_v18 }
 0x111   : > { %939 = vrsqrt.f32 %v342_v19 }
 0x113   : > { %v337_v20 = vpop.xlane.xlu2 %336  ;;  %v333_v21 = vpop.xlane.xlu1 %332 }
 0x114   : > { %v341_v22 = vmul.f32 %v337_v20, %v1180_v10  ;;  %v339_v25 = vmul.f32 %v333_v21, %v1180_v10 }
 0x116   : > { %v938_v26 = vpop.eup %937  ;;  %v345_v27 = vadd.f32 1e-05, %v341_v22  ;;  %v343_v28 = vadd.f32 1e-05, %v339_v25 }
 0x117   : > { %v940_v29 = vpop.eup %939  ;;  %v367_v30 = vmul.f32 %v938_v26, %v344_v18  ;;  %vm373_vm1 = vweird.f32 %v938_v26 }
 0x118   : > { %v347_v31 = vmul.f32 %v940_v29, %v342_v19  ;;  %941 = vrsqrt.f32 %v345_v27  ;;  %vm353_vm3 = vweird.f32 %v940_v29  ;;  %vm374_vm5 = vmor %vm372_vm4, %vm373_vm1  ;;  %vm362_vm8 = vweird.f32 %v343_v28 }
 0x119   : > { %v368_v32 = vmul.f32 %v938_v26, %v367_v30  ;;  %943 = vrsqrt.f32 %v343_v28  ;;  %vm354_vm6 = vmor %vm352_vm2, %vm353_vm3  ;;  %vm382_vm10 = vweird.f32 %v345_v27 }
 0x11a   : > { %v348_v33 = vmul.f32 %v940_v29, %v347_v31 }
 0x11b   : > { %v369_v34 = vmul.f32 0.5, %v368_v32 }
 0x11c   : > { %v349_v35 = vmul.f32 0.5, %v348_v33 }
 0x11d   : > { %v370_v36 = vsub.f32 1.5, %v369_v34 }
 0x11e   : > { %v942_v37 = vpop.eup %941  ;;  %v350_v38 = vsub.f32 1.5, %v349_v35 }
 0x11f   : > { %v944_v39 = vpop.eup %943  ;;  %v371_v40 = vmul.f32 %v938_v26, %v370_v36  ;;  %v377_v41 = vmul.f32 %v942_v37, %v345_v27  ;;  %vm383_vm7 = vweird.f32 %v942_v37 }
 0x120   : > { %v351_v10 = vmul.f32 %v940_v29, %v350_v38  ;;  %v357_v42 = vmul.f32 %v944_v39, %v343_v28  ;;  %vm363_vm9 = vweird.f32 %v944_v39  ;;  %vm384_vm11 = vmor %vm382_vm10, %vm383_vm7 }
 0x121   : > { %v378_v43 = vmul.f32 %v942_v37, %v377_v41  ;;  %v375_v46 = vsel %vm374_vm5, %v938_v26, %v371_v40  ;;  %vm364_vm12 = vmor %vm362_vm8, %vm363_vm9 }
 0x122   : > { %v358_v44 = vmul.f32 %v944_v39, %v357_v42  ;;  %v355_v48 = vsel %vm354_vm6, %v940_v29, %v351_v10  ;;  %v388_v52 = vmul.f32 %v375_v46, %v1186_v16 }
 0x123   : > { %v379_v45 = vmul.f32 0.5, %v378_v43  ;;  %v386_v54 = vmul.f32 %v355_v48, %v1184_v15 }
 0x124   : > { %v359_v47 = vmul.f32 0.5, %v358_v44  ;;  %v396_v60 = vmul.f32 %v933_v51, %v388_v52 }
 0x125   : > { %v380_v49 = vsub.f32 1.5, %v379_v45  ;;  %v394_v16 = vmul.f32 %v933_v51, %v386_v54 }
 0x126   : > { %v360_v50 = vsub.f32 1.5, %v359_v47  ;;  %v404_v0 = vadd.f32 %v934_v58, %v396_v60 }
 0x127   : > { %v381_v53 = vmul.f32 %v942_v37, %v380_v49  ;;  %v402_v1 = vadd.f32 %v934_v58, %v394_v16 }
 0x128   : > { %v361_v55 = vmul.f32 %v944_v39, %v360_v50 }
 0x129   : > { %v385_v56 = vsel %vm384_vm11, %v942_v37, %v381_v53 }
 0x12a   : > { %v365_v57 = vsel %vm364_vm12, %v944_v39, %v361_v55  ;;  %v389_v59 = vmul.f32 %v385_v56, %v1194_v23  ;;  %v424_v23 = vld [vmem:[%s295_s9] sm:$0x3] }
 0x12b   : > { %v387_v61 = vmul.f32 %v365_v57, %v1196_v24  ;;  %v426_v24 = vperm.slane %v424_v23, 0  ;;  %v427_v5 = vperm.slane %v424_v23, 1 }
 0x12c   : > { %v397_v62 = vmul.f32 %v933_v51, %v389_v59 }
 0x12d   : > { %v395_v63 = vmul.f32 %v933_v51, %v387_v61 }
 0x12e   : > { %v405_v15 = vadd.f32 %v934_v58, %v397_v62 }
 0x12f   : > { %v403_v2 = vadd.f32 %v934_v58, %v395_v63 }
 0x130   : > { %v407_v3 = vpack.c.bf16 %v405_v15, %v404_v0 }
 0x131   : > { %v406_v4 = vpack.c.bf16 %v403_v2, %v402_v1 }
 0x132   : > { %523 = vmatmul.bf16.vlgmr.msra.gmra.mxu2 %v407_v3  ;;  %542 = vmatmul.bf16.vlgmr.msra.gmra.mxu3 %v407_v3 }
 0x133   : > { %518 = vmatmul.bf16.vlgmr.msra.gmra.mxu0 %v406_v4  ;;  %537 = vmatmul.bf16.vlgmr.msra.gmra.mxu1 %v406_v4 }
 0x1b0   : > { %v519_v6 = vpop.f32.mrf.mxu0  ;;  %v538_v7 = vpop.f32.mrf.mxu1 }
 0x1b1   : > { %v520_v8 = vadd.f32 %v519_v6, %v426_v24  ;;  %v539_v9 = vadd.f32 %v538_v7, %v427_v5 }
 0x1b3   : > { %v548_v11 = vmul.f32 -1.702, %v520_v8  ;;  %v549_v12 = vmul.f32 -1.702, %v539_v9 }
 0x1b5   : > { %v556_v13 = vmul.f32 1.442695, %v548_v11  ;;  %v558_v14 = vmul.f32 1.442695, %v549_v12  ;;  %v524_v17 = vpop.f32.mrf.mxu2  ;;  %v543_v18 = vpop.f32.mrf.mxu3 }
 0x1b6   : > { %v525_v19 = vadd.f32 %v524_v17, %v426_v24  ;;  %v544_v20 = vadd.f32 %v543_v18, %v427_v5 }
 0x1b7   : > { %945 = vpow2.f32 %v556_v13 }
 0x1b8   : > { %947 = vpow2.f32 %v558_v14  ;;  %v552_v21 = vmul.f32 -1.702, %v525_v19  ;;  %v553_v22 = vmul.f32 -1.702, %v544_v20  ;;  %v521_v25 = vpop.f32.mrf.mxu0  ;;  %v540_v26 = vpop.f32.mrf.mxu1 }
 0x1b9   : > { %v522_v27 = vadd.f32 %v521_v25, %v426_v24  ;;  %v541_v28 = vadd.f32 %v540_v26, %v427_v5 }
 0x1ba   : > { %v564_v29 = vmul.f32 1.442695, %v552_v21  ;;  %v566_v30 = vmul.f32 1.442695, %v553_v22 }
 0x1bb   : > { %v550_v31 = vmul.f32 -1.702, %v522_v27  ;;  %v551_v32 = vmul.f32 -1.702, %v541_v28 }
 0x1bc   : > { %949 = vpow2.f32 %v564_v29 }
 0x1bd   : > { %v946_v33 = vpop.eup %945  ;;  %951 = vpow2.f32 %v566_v30  ;;  %v560_v34 = vmul.f32 1.442695, %v550_v31  ;;  %v526_v35 = vpop.f32.mrf.mxu2  ;;  %v562_v39 = vmul.f32 1.442695, %v551_v32 }
 0x1be   : > { %v545_v36 = vpop.f32.mrf.mxu3  ;;  %v948_v37 = vpop.eup %947  ;;  %v572_v38 = vadd.f32 1.0, %v946_v33  ;;  %v527_v40 = vadd.f32 %v526_v35, %v426_v24 }
 0x1bf   : > { %v546_v41 = vadd.f32 %v545_v36, %v427_v5  ;;  %v573_v10 = vadd.f32 1.0, %v948_v37  ;;  %953 = vpow2.f32 %v560_v34 }
 0x1c0   : > { %955 = vrcp.f32 %v572_v38  ;;  %v554_v42 = vmul.f32 -1.702, %v527_v40 }
 0x1c1   : > { %v555_v43 = vmul.f32 -1.702, %v546_v41  ;;  %957 = vrcp.f32 %v573_v10 }
 0x1c2   : > { %v950_v44 = vpop.eup %949  ;;  %959 = vpow2.f32 %v562_v39  ;;  %v568_v45 = vmul.f32 1.442695, %v554_v42 }
 0x1c3   : > { %v952_v46 = vpop.eup %951  ;;  %v576_v47 = vadd.f32 1.0, %v950_v44  ;;  %v570_v48 = vmul.f32 1.442695, %v555_v43 }
 0x1c4   : > { %v577_v49 = vadd.f32 1.0, %v952_v46  ;;  %961 = vpow2.f32 %v568_v45 }
 0x1c5   : > { %v954_v50 = vpop.eup %953  ;;  %963 = vrcp.f32 %v576_v47 }
 0x1c6   : > { %v956_v51 = vpop.eup %955  ;;  %965 = vrcp.f32 %v577_v49  ;;  %v574_v52 = vadd.f32 1.0, %v954_v50 }
 0x1c7   : > { %v958_v53 = vpop.eup %957  ;;  %v588_v54 = vmul.f32 %v956_v51, %v520_v8  ;;  %967 = vpow2.f32 %v570_v48 }
 0x1c8   : > { %v960_v55 = vpop.eup %959  ;;  %v589_v56 = vmul.f32 %v958_v53, %v539_v9  ;;  %969 = vrcp.f32 %v574_v52 }
 0x1c9   : > { %v575_v57 = vadd.f32 1.0, %v960_v55 }
 0x1ca   : > { %v962_v58 = vpop.eup %961  ;;  %v596_v59 = vpack.c.bf16 %v589_v56, %v588_v54 }
 0x1cb   : > { %v964_v60 = vpop.eup %963  ;;  %971 = vrcp.f32 %v575_v57  ;;  %v578_v61 = vadd.f32 1.0, %v962_v58 }
 0x1cc   : > { %v966_v16 = vpop.eup %965  ;;  %600 = vst [vmem:[%s284_s7] sm:$0xff] %v596_v59  ;;  %v592_v62 = vmul.f32 %v964_v60, %v525_v19 }
 0x1cd   : > { %v968_v63 = vpop.eup %967  ;;  %v593_v0 = vmul.f32 %v966_v16, %v544_v20  ;;  %973 = vrcp.f32 %v578_v61 }
 0x1ce   : > { %v970_v15 = vpop.eup %969  ;;  %v579_v1 = vadd.f32 1.0, %v968_v63 }
 0x1cf   : > { %v598_v2 = vpack.c.bf16 %v593_v0, %v592_v62  ;;  %v590_v3 = vmul.f32 %v970_v15, %v522_v27 }
 0x1d0   : > { %975 = vrcp.f32 %v579_v1 }
 0x1d1   : > { %v972_v4 = vpop.eup %971  ;;  %602 = vst [vmem:[%s284_s7 + $0x10] sm:$0xff] %v598_v2 }
 0x1d2   : > { %v591_v23 = vmul.f32 %v972_v4, %v541_v28 }
 0x1d3   : > { %v974_v24 = vpop.eup %973  ;;  %v651_v11 = vld [vmem:[%s284_s7] sm:$0xff] (%p1143_p9) }
 0x1d4   : > { %v597_v5 = vpack.c.bf16 %v591_v23, %v590_v3  ;;  %v594_v6 = vmul.f32 %v974_v24, %v527_v40  ;;  %652 = vst [vmem:[%s616_s12] sm:$0xff] (%p1143_p9), %v651_v11 }
 0x1d6   : > { %v976_v7 = vpop.eup %975  ;;  %601 = vst [vmem:[%s284_s7 + $0x8] sm:$0xff] %v597_v5 }
 0x1d7   : > { %v595_v8 = vmul.f32 %v976_v7, %v546_v41  ;;  %610 = sbr.rel (!%p1143_p9) target bundleno = 484 (0x1e4), region = 48 }
 0x1d8   : > { %v655_v13 = vld [vmem:[%s284_s7 + $0x10] sm:$0xff] (%p1143_p9) }
 0x1d9   : > { %v599_v9 = vpack.c.bf16 %v595_v8, %v594_v6  ;;  %656 = vst [vmem:[%s616_s12 + $0x20] sm:$0xff] (%p1143_p9), %v655_v13 }
 0x1db   : > { %603 = vst [vmem:[%s284_s7 + $0x18] sm:$0xff] %v599_v9 }
 0x1dd   : > { %v653_v12 = vld [vmem:[%s284_s7 + $0x8] sm:$0xff] }
 0x1de   : > { %654 = vst [vmem:[%s616_s12 + $0x10] sm:$0xff] %v653_v12 }
 0x1e2   : > { %v657_v14 = vld [vmem:[%s284_s7 + $0x18] sm:$0xff] }
 0x1e3   : > { %658 = vst [vmem:[%s616_s12 + $0x30] sm:$0xff] %v657_v14 }
 0x1e4 PF: > { %s18_s23 = sadd.s32 1, %s1057_s23   ;;  %s1286_s18 = smov %s1041_s19 }
 0x1e5   : > { %p15_p2 = scmp.ge.s32.totalorder %s18_s23, 4   ;;  %s1287_s19 = smov %s1045_s20 }
 0x1e6   : > { %s1288_s20 = smov %s1141_s30  ;;  %s1289_s21 = smov %s1053_s22 }
 0x1e7   : > { %s1290_s22 = smov %s1292_s25  ;;  %17 = sbr.rel (!%p15_p2) target bundleno = 4 (0x4), region = 124 }
 0x1ec   :  { %674 = vsyncpa [#allocation3], 1 }
 0x1ed   :  { %676 = vsyncpa [#allocation3 + $0x1], 1 }

</bundles_post_ra>
